<compile_context>
chip_gen: v5e
topology: v5e:2x2
jax: 0.10.0
libtpu: 0.0.40
codegen_flags: <defaults>
</compile_context>

<pallas_src>
import jax
import jax.numpy as jnp
from jax.experimental import pallas as pl
from jax.experimental.pallas import tpu as pltpu

_SUBLANE = 8  # f32 sublane count; batch tiles are padded to a multiple of this.


def deepconvlstm_kernel(x_ref,
                        w1_ref, b1_ref, w2_ref, b2_ref,
                        w3_ref, b3_ref, w4_ref, b4_ref,
                        wih0_ref, whh0_ref, bl0_ref,
                        w1cat_ref, bl1_ref,
                        wf1_ref, bf1_ref, wf2_ref, bf2_ref,
                        out_ref, gx_ref):
    Bt = out_ref.shape[0]                 # batch-tile rows (multiple of 8)
    T, _, H4 = gx_ref.shape
    H = H4 // 4

    # ---- conv stack: valid Conv1d + ReLU on the whole time-major slab ---------
    # Slab rows are ordered t*Bt + b; tap k reads rows shifted by k*Bt, so each
    # tap is a single full-batch-tile matmul (bf16 operands, f32 accumulation).
    feat = x_ref[0]                       # (L*Bt, Cin) bf16
    for w_ref, b_ref in ((w1_ref, b1_ref), (w2_ref, b2_ref),
                         (w3_ref, b3_ref), (w4_ref, b4_ref)):
        K = w_ref.shape[0]                # filter size
        R = feat.shape[0] - (K - 1) * Bt  # valid output rows (static)
        acc = jnp.dot(feat[0:R, :], w_ref[0],
                      preferred_element_type=jnp.float32) + b_ref[...]
        for k in range(1, K):
            acc = acc + jnp.dot(feat[k * Bt:k * Bt + R, :], w_ref[k],
                                preferred_element_type=jnp.float32)
        feat = jnp.maximum(acc, 0.0).astype(jnp.bfloat16)   # ReLU, bf16 for next MXU

    # ---- LSTM layer-0 input contributions for ALL timesteps in one matmul -----
    gx = (jnp.dot(feat, wih0_ref[...], preferred_element_type=jnp.float32)
          + bl0_ref[...])
    gx_ref[...] = gx.reshape(T, Bt, H4).astype(jnp.bfloat16)

    def gates_to_hc(gates, c):
        # Gate column order is [i | f | o | g] (reordered in prepare_params), so
        # sigmoid only needs the first 3H lanes and tanh only the last H.
        if H >= 128:
            sig = jax.nn.sigmoid(gates[:, :3 * H])
            g = jnp.tanh(gates[:, 3 * H:])
        else:  # gates fit in one vreg: full-width EUP pushes + cheap lane slices
            sig = jax.nn.sigmoid(gates)[:, :3 * H]
            g = jnp.tanh(gates)[:, 3 * H:]
        i = sig[:, 0:H]
        f = sig[:, H:2 * H]
        o = sig[:, 2 * H:3 * H]
        c_new = f * c + i * g                       # f32 VPU math
        h_new = o * jnp.tanh(c_new)
        return h_new, c_new

    def step(t, carry):
        h0, c0, h1, c1 = carry
        # Layer 0: precomputed x-gates + recurrent matmul (weights read from VMEM).
        g0 = (gx_ref[t].astype(jnp.float32)
              + jnp.dot(h0.astype(jnp.bfloat16), whh0_ref[...],
                        preferred_element_type=jnp.float32))
        h0, c0 = gates_to_hc(g0, c0)
        # Layer 1: fused [W_ih1^T; W_hh1^T] -> one MXU push on the critical path.
        hcat = jnp.concatenate([h0, h1], axis=-1).astype(jnp.bfloat16)
        g1 = (jnp.dot(hcat, w1cat_ref[...], preferred_element_type=jnp.float32)
              + bl1_ref[...])
        h1, c1 = gates_to_hc(g1, c1)
        return h0, c0, h1, c1

    z = jnp.zeros((Bt, H), jnp.float32)
    _, _, h1, _ = jax.lax.fori_loop(0, T, step, (z, z, z, z), unroll=min(8, T))

    # ---- head: fc1 -> relu -> dropout(eval) -> fc2 ----------------------------
    hid = jnp.maximum(
        jnp.dot(h1.astype(jnp.bfloat16), wf1_ref[...],
                preferred_element_type=jnp.float32) + bf1_ref[...], 0.0)
    # TODO(synk): nn.Dropout(p=0.5) is identity in eval mode; training-mode random
    # masking/scaling is intentionally not applied here.
    out_ref[...] = (jnp.dot(hid.astype(jnp.bfloat16), wf2_ref[...],
                            preferred_element_type=jnp.float32) + bf2_ref[...])


def prepare_params(params):
    """One-time parameter preprocessing (hoisted out of the forward path)."""
    (cw1, cb1, cw2, cb2, cw3, cb3, cw4, cb4,
     wih0, whh0, bih0, bhh0, wih1, whh1, bih1, bhh1,
     wf1, bf1, wf2, bf2) = params
    H = whh0.shape[1]

    def conv_w(w):   # PyTorch (Cout, Cin, K) -> (K, Cin, Cout) bf16 MXU operand
        return jnp.transpose(w, (2, 1, 0)).astype(jnp.bfloat16)

    def row(b):      # 1-D bias -> (1, C) f32 row
        return b.reshape(1, -1).astype(jnp.float32)

    def reorder(w):  # PyTorch gate blocks [i|f|g|o] -> [i|f|o|g] along last axis
        return jnp.concatenate(
            [w[..., :2 * H], w[..., 3 * H:4 * H], w[..., 2 * H:3 * H]], axis=-1)

    def lstm_w(w):   # (4H, In) -> (In, 4H), reordered, bf16
        return reorder(w.T).astype(jnp.bfloat16)

    w1cat = jnp.concatenate([lstm_w(wih1), lstm_w(whh1)], axis=0)   # (2H, 4H)

    return (conv_w(cw1), row(cb1), conv_w(cw2), row(cb2),
            conv_w(cw3), row(cb3), conv_w(cw4), row(cb4),
            lstm_w(wih0), lstm_w(whh0), row(reorder(bih0 + bhh0)),
            w1cat, row(reorder(bih1 + bhh1)),
            wf1.T.astype(jnp.bfloat16), row(bf1),
            wf2.T.astype(jnp.bfloat16), row(bf2))


def _choose_batch_tile(B, T, H4):
    """Sublane-aligned batch tile; bounds the per-tile gx scratch (v7x-safe)."""
    b_pad = max(_SUBLANE, -(-B // _SUBLANE) * _SUBLANE)
    budget = 8 * 1024 * 1024                       # bf16 gx bytes per tile
    bt = min(b_pad, 256)
    while bt > _SUBLANE and T * bt * H4 * 2 > budget:
        bt -= _SUBLANE
    b_total = -(-b_pad // bt) * bt                 # pad batch to whole tiles
    return b_total, bt


@jax.jit
def deepconvlstm_forward(x_ncl, prepped):
    """x_ncl: (B, n_channels, L) float32 — exactly the PyTorch Conv1d input layout."""
    B, Cin, L = x_ncl.shape
    K = prepped[0].shape[0]                  # conv filter size
    T = L - 4 * (K - 1)                      # sequence length after the conv stack
    H4 = prepped[9].shape[1]                 # 4 * hidden_size (from W_hh0^T)
    n_out = prepped[15].shape[1]             # num_classes (from W_fc2^T)

    B_total, Bt = _choose_batch_tile(B, T, H4)
    Nb = B_total // Bt

    # Time-major, batch-interleaved slab per batch tile: row t*Bt + b <- x[b,:,t].
    xp = jnp.pad(x_ncl.astype(jnp.float32), ((0, B_total - B), (0, 0), (0, 0)))
    x_tm = (jnp.transpose(xp, (2, 0, 1))          # (L, B_total, Cin)
            .reshape(L, Nb, Bt, Cin)
            .transpose(1, 0, 2, 3)                # (Nb, L, Bt, Cin)
            .reshape(Nb, L * Bt, Cin)
            .astype(jnp.bfloat16))
    # TODO(synk): for very large L*B this wrapper transpose is an extra HBM pass;
    # fold it into the per-tile DMA via an index_map over (B, C, L) if profiled hot.

    vmem = pl.BlockSpec(memory_space=pltpu.MemorySpace.VMEM)
    out = pl.pallas_call(
        deepconvlstm_kernel,
        out_shape=jax.ShapeDtypeStruct((B_total, n_out), jnp.float32),
        grid=(Nb,),
        in_specs=([pl.BlockSpec((1, L * Bt, Cin), lambda i: (i, 0, 0))]
                  + [vmem] * len(prepped)),
        out_specs=pl.BlockSpec((Bt, n_out), lambda i: (i, 0)),
        scratch_shapes=[pltpu.VMEM((T, Bt, H4), jnp.bfloat16)],
        compiler_params=pltpu.CompilerParams(
            dimension_semantics=("parallel",),
            vmem_limit_bytes=48 * 1024 * 1024),
    )(x_tm, *prepped)
    return out[:B]


def reference_forward(x_ncl, params):
    """Pure-JAX f32 reference of the PyTorch forward (eval mode), for self-checking."""
    (cw1, cb1, cw2, cb2, cw3, cb3, cw4, cb4,
     wih0, whh0, bih0, bhh0, wih1, whh1, bih1, bhh1,
     wf1, bf1, wf2, bf2) = params
    x = x_ncl.astype(jnp.float32)
    for w, b in ((cw1, cb1), (cw2, cb2), (cw3, cb3), (cw4, cb4)):
        K = w.shape[2]
        Lc = x.shape[2]
        y = b[None, :, None] + sum(
            jnp.einsum('bcl,oc->bol', x[:, :, k:Lc - K + 1 + k], w[:, :, k])
            for k in range(K))
        x = jax.nn.relu(y)
    x = jnp.transpose(x, (0, 2, 1))                          # (B, T, C)
    Bn, T, _ = x.shape
    H = whh0.shape[1]

    def cell(xt, h, c, wih, whh, bih, bhh):
        gates = xt @ wih.T + bih + h @ whh.T + bhh
        i, f, g, o = jnp.split(gates, 4, axis=1)
        c = jax.nn.sigmoid(f) * c + jax.nn.sigmoid(i) * jnp.tanh(g)
        h = jax.nn.sigmoid(o) * jnp.tanh(c)
        return h, c

    h0 = c0 = h1 = c1 = jnp.zeros((Bn, H), jnp.float32)
    for t in range(T):
        h0, c0 = cell(x[:, t, :], h0, c0, wih0, whh0, bih0, bhh0)
        h1, c1 = cell(h0, h1, c1, wih1, whh1, bih1, bhh1)
    hid = jax.nn.relu(h1 @ wf1.T + bf1)
    return hid @ wf2.T + bf2


def init_params(key, n_filters, num_classes, filter_size, hidden_size, n_channels):
    """Deterministic synthetic parameters matching the nn.Module shapes."""
    keys = jax.random.split(key, 20)

    def u(k, shape, scale=0.1):
        return jax.random.uniform(k, shape, jnp.float32, -scale, scale)

    dims = [n_channels, n_filters, n_filters * 2, n_filters * 4, n_filters * 8]
    conv = []
    for i in range(4):
        conv.append(u(keys[2 * i], (dims[i + 1], dims[i], filter_size)))   # (Cout, Cin, K)
        conv.append(u(keys[2 * i + 1], (dims[i + 1],)))

    H = hidden_size
    in_sizes = [n_filters * 8, H]
    lstm = []
    idx = 8
    for layer in range(2):
        lstm.append(u(keys[idx], (4 * H, in_sizes[layer]))); idx += 1       # W_ih
        lstm.append(u(keys[idx], (4 * H, H))); idx += 1                     # W_hh
        lstm.append(u(keys[idx], (4 * H,))); idx += 1                       # b_ih
        lstm.append(u(keys[idx], (4 * H,))); idx += 1                       # b_hh

    fc = [u(keys[idx], (H // 2, H)), u(keys[idx + 1], (H // 2,)),
          u(keys[idx + 2], (num_classes, H // 2)), u(keys[idx + 3], (num_classes,))]

    return tuple(conv + lstm + fc)


if __name__ == "__main__":
    # Small shapes consistent with the module: Conv1d input is (B, n_channels, L).
    B, n_channels, L = 2, 9, 16
    n_filters, hidden_size, num_classes, filter_size = 8, 32, 5, 3   # seq after convs: 16-4*2=8

    key = jax.random.PRNGKey(0)
    kx, kp = jax.random.split(key)
    x = jax.random.normal(kx, (B, n_channels, L), jnp.float32)
    params = init_params(kp, n_filters, num_classes, filter_size, hidden_size, n_channels)

    prepped = prepare_params(params)          # one-time; not on the forward path
    out = jax.block_until_ready(deepconvlstm_forward(x, prepped))
    assert out.shape == (B, num_classes) and out.dtype == jnp.float32

    ref = jax.block_until_ready(reference_forward(x, params))
    max_err = float(jnp.max(jnp.abs(out - ref)))
    assert max_err < 1e-2, f"kernel/reference mismatch: max abs err {max_err}"
    print("KERNEL_OK")
</pallas_src>

<mosaic_0001>
module attributes {stable_mosaic.version = 11 : i64} {
  func.func @deepconvlstm_kernel(%arg0: i32, %arg1: memref<1x128x9xbf16, #tpu.memory_space<vmem>>, %arg2: memref<3x9x8xbf16, #tpu.memory_space<vmem>>, %arg3: memref<1x8xf32, #tpu.memory_space<vmem>>, %arg4: memref<3x8x16xbf16, #tpu.memory_space<vmem>>, %arg5: memref<1x16xf32, #tpu.memory_space<vmem>>, %arg6: memref<3x16x32xbf16, #tpu.memory_space<vmem>>, %arg7: memref<1x32xf32, #tpu.memory_space<vmem>>, %arg8: memref<3x32x64xbf16, #tpu.memory_space<vmem>>, %arg9: memref<1x64xf32, #tpu.memory_space<vmem>>, %arg10: memref<64x128xbf16, #tpu.memory_space<vmem>>, %arg11: memref<32x128xbf16, #tpu.memory_space<vmem>>, %arg12: memref<1x128xf32, #tpu.memory_space<vmem>>, %arg13: memref<64x128xbf16, #tpu.memory_space<vmem>>, %arg14: memref<1x128xf32, #tpu.memory_space<vmem>>, %arg15: memref<32x16xbf16, #tpu.memory_space<vmem>>, %arg16: memref<1x16xf32, #tpu.memory_space<vmem>>, %arg17: memref<16x5xbf16, #tpu.memory_space<vmem>>, %arg18: memref<1x5xf32, #tpu.memory_space<vmem>>, %arg19: memref<8x5xf32, #tpu.memory_space<vmem>>, %arg20: memref<8x8x128xbf16, #tpu.memory_space<vmem>>) attributes {dimension_semantics = [#tpu.dimension_semantics<parallel>], iteration_bounds = array<i64: 1>, scalar_prefetch = 0 : i64, scratch_operands = 1 : i64, tpu.core_type = #tpu.core_type<tc>, window_params = [{transform_indices = @transform_0, window_bounds = array<i64: 1, 128, 9>}, {pipeline_mode = #tpu.pipeline_mode<synchronous>, transform_indices = @transform_1, window_bounds = array<i64: 3, 9, 8>}, {pipeline_mode = #tpu.pipeline_mode<synchronous>, transform_indices = @transform_2, window_bounds = array<i64: 1, 8>}, {pipeline_mode = #tpu.pipeline_mode<synchronous>, transform_indices = @transform_3, window_bounds = array<i64: 3, 8, 16>}, {pipeline_mode = #tpu.pipeline_mode<synchronous>, transform_indices = @transform_4, window_bounds = array<i64: 1, 16>}, {pipeline_mode = #tpu.pipeline_mode<synchronous>, transform_indices = @transform_5, window_bounds = array<i64: 3, 16, 32>}, {pipeline_mode = #tpu.pipeline_mode<synchronous>, transform_indices = @transform_6, window_bounds = array<i64: 1, 32>}, {pipeline_mode = #tpu.pipeline_mode<synchronous>, transform_indices = @transform_7, window_bounds = array<i64: 3, 32, 64>}, {pipeline_mode = #tpu.pipeline_mode<synchronous>, transform_indices = @transform_8, window_bounds = array<i64: 1, 64>}, {pipeline_mode = #tpu.pipeline_mode<synchronous>, transform_indices = @transform_9, window_bounds = array<i64: 64, 128>}, {pipeline_mode = #tpu.pipeline_mode<synchronous>, transform_indices = @transform_10, window_bounds = array<i64: 32, 128>}, {pipeline_mode = #tpu.pipeline_mode<synchronous>, transform_indices = @transform_11, window_bounds = array<i64: 1, 128>}, {pipeline_mode = #tpu.pipeline_mode<synchronous>, transform_indices = @transform_12, window_bounds = array<i64: 64, 128>}, {pipeline_mode = #tpu.pipeline_mode<synchronous>, transform_indices = @transform_13, window_bounds = array<i64: 1, 128>}, {pipeline_mode = #tpu.pipeline_mode<synchronous>, transform_indices = @transform_14, window_bounds = array<i64: 32, 16>}, {pipeline_mode = #tpu.pipeline_mode<synchronous>, transform_indices = @transform_15, window_bounds = array<i64: 1, 16>}, {pipeline_mode = #tpu.pipeline_mode<synchronous>, transform_indices = @transform_16, window_bounds = array<i64: 16, 5>}, {pipeline_mode = #tpu.pipeline_mode<synchronous>, transform_indices = @transform_17, window_bounds = array<i64: 1, 5>}, {transform_indices = @transform_18, window_bounds = array<i64: 8, 5>}]} {
    %c0 = arith.constant 0 : index
    %c0_0 = arith.constant 0 : index
    %c0_1 = arith.constant 0 : index
    %0 = vector.load %arg1[%c0, %c0_0, %c0_1] : memref<1x128x9xbf16, #tpu.memory_space<vmem>>, vector<1x128x9xbf16>
    %1 = vector.shape_cast %0 : vector<1x128x9xbf16> to vector<128x9xbf16>
    %2 = vector.extract_strided_slice %1 {offsets = [0, 0], sizes = [112, 9], strides = [1, 1]} : vector<128x9xbf16> to vector<112x9xbf16>
    %c0_2 = arith.constant 0 : index
    %c0_3 = arith.constant 0 : index
    %c0_4 = arith.constant 0 : index
    %3 = vector.load %arg2[%c0_2, %c0_3, %c0_4] : memref<3x9x8xbf16, #tpu.memory_space<vmem>>, vector<1x9x8xbf16>
    %4 = vector.shape_cast %3 : vector<1x9x8xbf16> to vector<9x8xbf16>
    %cst = arith.constant dense<0.000000e+00> : vector<112x8xf32>
    %5 = tpu.matmul %2, %4, %cst {dimension_numbers = #tpu.dot_dimension_numbers<[1], [0], [0], [1], [0, 0, 1, 1], [], []>} : vector<112x9xbf16>, vector<9x8xbf16>, vector<112x8xf32> -> vector<112x8xf32>
    %c0_5 = arith.constant 0 : index
    %c0_6 = arith.constant 0 : index
    %6 = vector.load %arg3[%c0_5, %c0_6] : memref<1x8xf32, #tpu.memory_space<vmem>>, vector<1x8xf32>
    %7 = vector.broadcast %6 : vector<1x8xf32> to vector<112x8xf32>
    %8 = arith.addf %5, %7 : vector<112x8xf32>
    %9 = vector.extract_strided_slice %1 {offsets = [8, 0], sizes = [112, 9], strides = [1, 1]} : vector<128x9xbf16> to vector<112x9xbf16>
    %c1 = arith.constant 1 : index
    %c0_7 = arith.constant 0 : index
    %c0_8 = arith.constant 0 : index
    %10 = vector.load %arg2[%c1, %c0_7, %c0_8] : memref<3x9x8xbf16, #tpu.memory_space<vmem>>, vector<1x9x8xbf16>
    %11 = vector.shape_cast %10 : vector<1x9x8xbf16> to vector<9x8xbf16>
    %cst_9 = arith.constant dense<0.000000e+00> : vector<112x8xf32>
    %12 = tpu.matmul %9, %11, %cst_9 {dimension_numbers = #tpu.dot_dimension_numbers<[1], [0], [0], [1], [0, 0, 1, 1], [], []>} : vector<112x9xbf16>, vector<9x8xbf16>, vector<112x8xf32> -> vector<112x8xf32>
    %13 = arith.addf %8, %12 : vector<112x8xf32>
    %14 = vector.extract_strided_slice %1 {offsets = [16, 0], sizes = [112, 9], strides = [1, 1]} : vector<128x9xbf16> to vector<112x9xbf16>
    %c2 = arith.constant 2 : index
    %c0_10 = arith.constant 0 : index
    %c0_11 = arith.constant 0 : index
    %15 = vector.load %arg2[%c2, %c0_10, %c0_11] : memref<3x9x8xbf16, #tpu.memory_space<vmem>>, vector<1x9x8xbf16>
    %16 = vector.shape_cast %15 : vector<1x9x8xbf16> to vector<9x8xbf16>
    %cst_12 = arith.constant dense<0.000000e+00> : vector<112x8xf32>
    %17 = tpu.matmul %14, %16, %cst_12 {dimension_numbers = #tpu.dot_dimension_numbers<[1], [0], [0], [1], [0, 0, 1, 1], [], []>} : vector<112x9xbf16>, vector<9x8xbf16>, vector<112x8xf32> -> vector<112x8xf32>
    %18 = arith.addf %13, %17 : vector<112x8xf32>
    %cst_13 = arith.constant 0.000000e+00 : f32
    %19 = vector.broadcast %cst_13 : f32 to vector<112x8xf32>
    %20 = arith.maximumf %18, %19 : vector<112x8xf32>
    %21 = arith.truncf %20 : vector<112x8xf32> to vector<112x8xbf16>
    %22 = vector.extract_strided_slice %21 {offsets = [0, 0], sizes = [96, 8], strides = [1, 1]} : vector<112x8xbf16> to vector<96x8xbf16>
    %c0_14 = arith.constant 0 : index
    %c0_15 = arith.constant 0 : index
    %c0_16 = arith.constant 0 : index
    %23 = vector.load %arg4[%c0_14, %c0_15, %c0_16] : memref<3x8x16xbf16, #tpu.memory_space<vmem>>, vector<1x8x16xbf16>
    %24 = vector.shape_cast %23 : vector<1x8x16xbf16> to vector<8x16xbf16>
    %cst_17 = arith.constant dense<0.000000e+00> : vector<96x16xf32>
    %25 = tpu.matmul %22, %24, %cst_17 {dimension_numbers = #tpu.dot_dimension_numbers<[1], [0], [0], [1], [0, 0, 1, 1], [], []>} : vector<96x8xbf16>, vector<8x16xbf16>, vector<96x16xf32> -> vector<96x16xf32>
    %c0_18 = arith.constant 0 : index
    %c0_19 = arith.constant 0 : index
    %26 = vector.load %arg5[%c0_18, %c0_19] : memref<1x16xf32, #tpu.memory_space<vmem>>, vector<1x16xf32>
    %27 = vector.broadcast %26 : vector<1x16xf32> to vector<96x16xf32>
    %28 = arith.addf %25, %27 : vector<96x16xf32>
    %29 = vector.extract_strided_slice %21 {offsets = [8, 0], sizes = [96, 8], strides = [1, 1]} : vector<112x8xbf16> to vector<96x8xbf16>
    %c1_20 = arith.constant 1 : index
    %c0_21 = arith.constant 0 : index
    %c0_22 = arith.constant 0 : index
    %30 = vector.load %arg4[%c1_20, %c0_21, %c0_22] : memref<3x8x16xbf16, #tpu.memory_space<vmem>>, vector<1x8x16xbf16>
    %31 = vector.shape_cast %30 : vector<1x8x16xbf16> to vector<8x16xbf16>
    %cst_23 = arith.constant dense<0.000000e+00> : vector<96x16xf32>
    %32 = tpu.matmul %29, %31, %cst_23 {dimension_numbers = #tpu.dot_dimension_numbers<[1], [0], [0], [1], [0, 0, 1, 1], [], []>} : vector<96x8xbf16>, vector<8x16xbf16>, vector<96x16xf32> -> vector<96x16xf32>
    %33 = arith.addf %28, %32 : vector<96x16xf32>
    %34 = vector.extract_strided_slice %21 {offsets = [16, 0], sizes = [96, 8], strides = [1, 1]} : vector<112x8xbf16> to vector<96x8xbf16>
    %c2_24 = arith.constant 2 : index
    %c0_25 = arith.constant 0 : index
    %c0_26 = arith.constant 0 : index
    %35 = vector.load %arg4[%c2_24, %c0_25, %c0_26] : memref<3x8x16xbf16, #tpu.memory_space<vmem>>, vector<1x8x16xbf16>
    %36 = vector.shape_cast %35 : vector<1x8x16xbf16> to vector<8x16xbf16>
    %cst_27 = arith.constant dense<0.000000e+00> : vector<96x16xf32>
    %37 = tpu.matmul %34, %36, %cst_27 {dimension_numbers = #tpu.dot_dimension_numbers<[1], [0], [0], [1], [0, 0, 1, 1], [], []>} : vector<96x8xbf16>, vector<8x16xbf16>, vector<96x16xf32> -> vector<96x16xf32>
    %38 = arith.addf %33, %37 : vector<96x16xf32>
    %cst_28 = arith.constant 0.000000e+00 : f32
    %39 = vector.broadcast %cst_28 : f32 to vector<96x16xf32>
    %40 = arith.maximumf %38, %39 : vector<96x16xf32>
    %41 = arith.truncf %40 : vector<96x16xf32> to vector<96x16xbf16>
    %42 = vector.extract_strided_slice %41 {offsets = [0, 0], sizes = [80, 16], strides = [1, 1]} : vector<96x16xbf16> to vector<80x16xbf16>
    %c0_29 = arith.constant 0 : index
    %c0_30 = arith.constant 0 : index
    %c0_31 = arith.constant 0 : index
    %43 = vector.load %arg6[%c0_29, %c0_30, %c0_31] : memref<3x16x32xbf16, #tpu.memory_space<vmem>>, vector<1x16x32xbf16>
    %44 = vector.shape_cast %43 : vector<1x16x32xbf16> to vector<16x32xbf16>
    %cst_32 = arith.constant dense<0.000000e+00> : vector<80x32xf32>
    %45 = tpu.matmul %42, %44, %cst_32 {dimension_numbers = #tpu.dot_dimension_numbers<[1], [0], [0], [1], [0, 0, 1, 1], [], []>} : vector<80x16xbf16>, vector<16x32xbf16>, vector<80x32xf32> -> vector<80x32xf32>
    %c0_33 = arith.constant 0 : index
    %c0_34 = arith.constant 0 : index
    %46 = vector.load %arg7[%c0_33, %c0_34] : memref<1x32xf32, #tpu.memory_space<vmem>>, vector<1x32xf32>
    %47 = vector.broadcast %46 : vector<1x32xf32> to vector<80x32xf32>
    %48 = arith.addf %45, %47 : vector<80x32xf32>
    %49 = vector.extract_strided_slice %41 {offsets = [8, 0], sizes = [80, 16], strides = [1, 1]} : vector<96x16xbf16> to vector<80x16xbf16>
    %c1_35 = arith.constant 1 : index
    %c0_36 = arith.constant 0 : index
    %c0_37 = arith.constant 0 : index
    %50 = vector.load %arg6[%c1_35, %c0_36, %c0_37] : memref<3x16x32xbf16, #tpu.memory_space<vmem>>, vector<1x16x32xbf16>
    %51 = vector.shape_cast %50 : vector<1x16x32xbf16> to vector<16x32xbf16>
    %cst_38 = arith.constant dense<0.000000e+00> : vector<80x32xf32>
    %52 = tpu.matmul %49, %51, %cst_38 {dimension_numbers = #tpu.dot_dimension_numbers<[1], [0], [0], [1], [0, 0, 1, 1], [], []>} : vector<80x16xbf16>, vector<16x32xbf16>, vector<80x32xf32> -> vector<80x32xf32>
    %53 = arith.addf %48, %52 : vector<80x32xf32>
    %54 = vector.extract_strided_slice %41 {offsets = [16, 0], sizes = [80, 16], strides = [1, 1]} : vector<96x16xbf16> to vector<80x16xbf16>
    %c2_39 = arith.constant 2 : index
    %c0_40 = arith.constant 0 : index
    %c0_41 = arith.constant 0 : index
    %55 = vector.load %arg6[%c2_39, %c0_40, %c0_41] : memref<3x16x32xbf16, #tpu.memory_space<vmem>>, vector<1x16x32xbf16>
    %56 = vector.shape_cast %55 : vector<1x16x32xbf16> to vector<16x32xbf16>
    %cst_42 = arith.constant dense<0.000000e+00> : vector<80x32xf32>
    %57 = tpu.matmul %54, %56, %cst_42 {dimension_numbers = #tpu.dot_dimension_numbers<[1], [0], [0], [1], [0, 0, 1, 1], [], []>} : vector<80x16xbf16>, vector<16x32xbf16>, vector<80x32xf32> -> vector<80x32xf32>
    %58 = arith.addf %53, %57 : vector<80x32xf32>
    %cst_43 = arith.constant 0.000000e+00 : f32
    %59 = vector.broadcast %cst_43 : f32 to vector<80x32xf32>
    %60 = arith.maximumf %58, %59 : vector<80x32xf32>
    %61 = arith.truncf %60 : vector<80x32xf32> to vector<80x32xbf16>
    %62 = vector.extract_strided_slice %61 {offsets = [0, 0], sizes = [64, 32], strides = [1, 1]} : vector<80x32xbf16> to vector<64x32xbf16>
    %c0_44 = arith.constant 0 : index
    %c0_45 = arith.constant 0 : index
    %c0_46 = arith.constant 0 : index
    %63 = vector.load %arg8[%c0_44, %c0_45, %c0_46] : memref<3x32x64xbf16, #tpu.memory_space<vmem>>, vector<1x32x64xbf16>
    %64 = vector.shape_cast %63 : vector<1x32x64xbf16> to vector<32x64xbf16>
    %cst_47 = arith.constant dense<0.000000e+00> : vector<64x64xf32>
    %65 = tpu.matmul %62, %64, %cst_47 {dimension_numbers = #tpu.dot_dimension_numbers<[1], [0], [0], [1], [0, 0, 1, 1], [], []>} : vector<64x32xbf16>, vector<32x64xbf16>, vector<64x64xf32> -> vector<64x64xf32>
    %c0_48 = arith.constant 0 : index
    %c0_49 = arith.constant 0 : index
    %66 = vector.load %arg9[%c0_48, %c0_49] : memref<1x64xf32, #tpu.memory_space<vmem>>, vector<1x64xf32>
    %67 = vector.broadcast %66 : vector<1x64xf32> to vector<64x64xf32>
    %68 = arith.addf %65, %67 : vector<64x64xf32>
    %69 = vector.extract_strided_slice %61 {offsets = [8, 0], sizes = [64, 32], strides = [1, 1]} : vector<80x32xbf16> to vector<64x32xbf16>
    %c1_50 = arith.constant 1 : index
    %c0_51 = arith.constant 0 : index
    %c0_52 = arith.constant 0 : index
    %70 = vector.load %arg8[%c1_50, %c0_51, %c0_52] : memref<3x32x64xbf16, #tpu.memory_space<vmem>>, vector<1x32x64xbf16>
    %71 = vector.shape_cast %70 : vector<1x32x64xbf16> to vector<32x64xbf16>
    %cst_53 = arith.constant dense<0.000000e+00> : vector<64x64xf32>
    %72 = tpu.matmul %69, %71, %cst_53 {dimension_numbers = #tpu.dot_dimension_numbers<[1], [0], [0], [1], [0, 0, 1, 1], [], []>} : vector<64x32xbf16>, vector<32x64xbf16>, vector<64x64xf32> -> vector<64x64xf32>
    %73 = arith.addf %68, %72 : vector<64x64xf32>
    %74 = vector.extract_strided_slice %61 {offsets = [16, 0], sizes = [64, 32], strides = [1, 1]} : vector<80x32xbf16> to vector<64x32xbf16>
    %c2_54 = arith.constant 2 : index
    %c0_55 = arith.constant 0 : index
    %c0_56 = arith.constant 0 : index
    %75 = vector.load %arg8[%c2_54, %c0_55, %c0_56] : memref<3x32x64xbf16, #tpu.memory_space<vmem>>, vector<1x32x64xbf16>
    %76 = vector.shape_cast %75 : vector<1x32x64xbf16> to vector<32x64xbf16>
    %cst_57 = arith.constant dense<0.000000e+00> : vector<64x64xf32>
    %77 = tpu.matmul %74, %76, %cst_57 {dimension_numbers = #tpu.dot_dimension_numbers<[1], [0], [0], [1], [0, 0, 1, 1], [], []>} : vector<64x32xbf16>, vector<32x64xbf16>, vector<64x64xf32> -> vector<64x64xf32>
    %78 = arith.addf %73, %77 : vector<64x64xf32>
    %cst_58 = arith.constant 0.000000e+00 : f32
    %79 = vector.broadcast %cst_58 : f32 to vector<64x64xf32>
    %80 = arith.maximumf %78, %79 : vector<64x64xf32>
    %81 = arith.truncf %80 : vector<64x64xf32> to vector<64x64xbf16>
    %c0_59 = arith.constant 0 : index
    %c0_60 = arith.constant 0 : index
    %82 = vector.load %arg10[%c0_59, %c0_60] : memref<64x128xbf16, #tpu.memory_space<vmem>>, vector<64x128xbf16>
    %cst_61 = arith.constant dense<0.000000e+00> : vector<64x128xf32>
    %83 = tpu.matmul %81, %82, %cst_61 {dimension_numbers = #tpu.dot_dimension_numbers<[1], [0], [0], [1], [0, 0, 1, 1], [], []>} : vector<64x64xbf16>, vector<64x128xbf16>, vector<64x128xf32> -> vector<64x128xf32>
    %c0_62 = arith.constant 0 : index
    %c0_63 = arith.constant 0 : index
    %84 = vector.load %arg12[%c0_62, %c0_63] : memref<1x128xf32, #tpu.memory_space<vmem>>, vector<1x128xf32>
    %85 = vector.broadcast %84 : vector<1x128xf32> to vector<64x128xf32>
    %86 = arith.addf %83, %85 : vector<64x128xf32>
    %87 = vector.shape_cast %86 : vector<64x128xf32> to vector<8x8x128xf32>
    %88 = arith.truncf %87 : vector<8x8x128xf32> to vector<8x8x128xbf16>
    %c0_64 = arith.constant 0 : index
    %c0_65 = arith.constant 0 : index
    %c0_66 = arith.constant 0 : index
    %89 = vector.load %arg20[%c0_64, %c0_65, %c0_66] : memref<8x8x128xbf16, #tpu.memory_space<vmem>>, vector<8x8x128xbf16>
    tpu.vector_store %arg20[%c0_64, %c0_65, %c0_66], %88 {strides = array<i32>} : memref<8x8x128xbf16, #tpu.memory_space<vmem>>, vector<8x8x128xbf16>,
    %cst_67 = arith.constant 0.000000e+00 : f32
    %90 = vector.broadcast %cst_67 : f32 to vector<8x32xf32>
    %c0_i32 = arith.constant 0 : i32
    %91 = arith.index_cast %c0_i32 : i32 to index
    %c0_68 = arith.constant 0 : index
    %c0_69 = arith.constant 0 : index
    %92 = vector.load %arg20[%91, %c0_68, %c0_69] : memref<8x8x128xbf16, #tpu.memory_space<vmem>>, vector<1x8x128xbf16>
    %93 = vector.shape_cast %92 : vector<1x8x128xbf16> to vector<8x128xbf16>
    %94 = arith.extf %93 : vector<8x128xbf16> to vector<8x128xf32>
    %95 = arith.truncf %90 : vector<8x32xf32> to vector<8x32xbf16>
    %c0_70 = arith.constant 0 : index
    %c0_71 = arith.constant 0 : index
    %96 = vector.load %arg11[%c0_70, %c0_71] : memref<32x128xbf16, #tpu.memory_space<vmem>>, vector<32x128xbf16>
    %cst_72 = arith.constant dense<0.000000e+00> : vector<8x128xf32>
    %97 = tpu.matmul %95, %96, %cst_72 {dimension_numbers = #tpu.dot_dimension_numbers<[1], [0], [0], [1], [0, 0, 1, 1], [], []>} : vector<8x32xbf16>, vector<32x128xbf16>, vector<8x128xf32> -> vector<8x128xf32>
    %98 = arith.addf %94, %97 : vector<8x128xf32>
    %99 = arith.negf %98 : vector<8x128xf32>
    %100 = math.exp %99 : vector<8x128xf32>
    %cst_73 = arith.constant 1.000000e+00 : f32
    %101 = vector.broadcast %cst_73 : f32 to vector<8x128xf32>
    %102 = arith.addf %101, %100 : vector<8x128xf32>
    %103 = arith.divf %101, %102 : vector<8x128xf32>
    %104 = vector.extract_strided_slice %103 {offsets = [0, 0], sizes = [8, 96], strides = [1, 1]} : vector<8x128xf32> to vector<8x96xf32>
    %105 = math.tanh %98 : vector<8x128xf32>
    %106 = vector.extract_strided_slice %105 {offsets = [0, 96], sizes = [8, 32], strides = [1, 1]} : vector<8x128xf32> to vector<8x32xf32>
    %107 = vector.extract_strided_slice %104 {offsets = [0, 0], sizes = [8, 32], strides = [1, 1]} : vector<8x96xf32> to vector<8x32xf32>
    %108 = vector.extract_strided_slice %104 {offsets = [0, 32], sizes = [8, 32], strides = [1, 1]} : vector<8x96xf32> to vector<8x32xf32>
    %109 = vector.extract_strided_slice %104 {offsets = [0, 64], sizes = [8, 32], strides = [1, 1]} : vector<8x96xf32> to vector<8x32xf32>
    %110 = arith.mulf %108, %90 : vector<8x32xf32>
    %111 = arith.mulf %107, %106 : vector<8x32xf32>
    %112 = arith.addf %110, %111 : vector<8x32xf32>
    %113 = math.tanh %112 : vector<8x32xf32>
    %114 = arith.mulf %109, %113 : vector<8x32xf32>
    %115 = tpu.concatenate %114, %90 in 1 : vector<8x32xf32>, vector<8x32xf32> -> vector<8x64xf32>
    %116 = arith.truncf %115 : vector<8x64xf32> to vector<8x64xbf16>
    %c0_74 = arith.constant 0 : index
    %c0_75 = arith.constant 0 : index
    %117 = vector.load %arg13[%c0_74, %c0_75] : memref<64x128xbf16, #tpu.memory_space<vmem>>, vector<64x128xbf16>
    %cst_76 = arith.constant dense<0.000000e+00> : vector<8x128xf32>
    %118 = tpu.matmul %116, %117, %cst_76 {dimension_numbers = #tpu.dot_dimension_numbers<[1], [0], [0], [1], [0, 0, 1, 1], [], []>} : vector<8x64xbf16>, vector<64x128xbf16>, vector<8x128xf32> -> vector<8x128xf32>
    %c0_77 = arith.constant 0 : index
    %c0_78 = arith.constant 0 : index
    %119 = vector.load %arg14[%c0_77, %c0_78] : memref<1x128xf32, #tpu.memory_space<vmem>>, vector<1x128xf32>
    %120 = vector.broadcast %119 : vector<1x128xf32> to vector<8x128xf32>
    %121 = arith.addf %118, %120 : vector<8x128xf32>
    %122 = arith.negf %121 : vector<8x128xf32>
    %123 = math.exp %122 : vector<8x128xf32>
    %cst_79 = arith.constant 1.000000e+00 : f32
    %124 = vector.broadcast %cst_79 : f32 to vector<8x128xf32>
    %125 = arith.addf %124, %123 : vector<8x128xf32>
    %126 = arith.divf %124, %125 : vector<8x128xf32>
    %127 = vector.extract_strided_slice %126 {offsets = [0, 0], sizes = [8, 96], strides = [1, 1]} : vector<8x128xf32> to vector<8x96xf32>
    %128 = math.tanh %121 : vector<8x128xf32>
    %129 = vector.extract_strided_slice %128 {offsets = [0, 96], sizes = [8, 32], strides = [1, 1]} : vector<8x128xf32> to vector<8x32xf32>
    %130 = vector.extract_strided_slice %127 {offsets = [0, 0], sizes = [8, 32], strides = [1, 1]} : vector<8x96xf32> to vector<8x32xf32>
    %131 = vector.extract_strided_slice %127 {offsets = [0, 32], sizes = [8, 32], strides = [1, 1]} : vector<8x96xf32> to vector<8x32xf32>
    %132 = vector.extract_strided_slice %127 {offsets = [0, 64], sizes = [8, 32], strides = [1, 1]} : vector<8x96xf32> to vector<8x32xf32>
    %133 = arith.mulf %131, %90 : vector<8x32xf32>
    %134 = arith.mulf %130, %129 : vector<8x32xf32>
    %135 = arith.addf %133, %134 : vector<8x32xf32>
    %136 = math.tanh %135 : vector<8x32xf32>
    %137 = arith.mulf %132, %136 : vector<8x32xf32>
    %c1_i32 = arith.constant 1 : i32
    %138 = arith.index_cast %c1_i32 : i32 to index
    %c0_80 = arith.constant 0 : index
    %c0_81 = arith.constant 0 : index
    %139 = vector.load %arg20[%138, %c0_80, %c0_81] : memref<8x8x128xbf16, #tpu.memory_space<vmem>>, vector<1x8x128xbf16>
    %140 = vector.shape_cast %139 : vector<1x8x128xbf16> to vector<8x128xbf16>
    %141 = arith.extf %140 : vector<8x128xbf16> to vector<8x128xf32>
    %142 = arith.truncf %114 : vector<8x32xf32> to vector<8x32xbf16>
    %c0_82 = arith.constant 0 : index
    %c0_83 = arith.constant 0 : index
    %143 = vector.load %arg11[%c0_82, %c0_83] : memref<32x128xbf16, #tpu.memory_space<vmem>>, vector<32x128xbf16>
    %cst_84 = arith.constant dense<0.000000e+00> : vector<8x128xf32>
    %144 = tpu.matmul %142, %143, %cst_84 {dimension_numbers = #tpu.dot_dimension_numbers<[1], [0], [0], [1], [0, 0, 1, 1], [], []>} : vector<8x32xbf16>, vector<32x128xbf16>, vector<8x128xf32> -> vector<8x128xf32>
    %145 = arith.addf %141, %144 : vector<8x128xf32>
    %146 = arith.negf %145 : vector<8x128xf32>
    %147 = math.exp %146 : vector<8x128xf32>
    %cst_85 = arith.constant 1.000000e+00 : f32
    %148 = vector.broadcast %cst_85 : f32 to vector<8x128xf32>
    %149 = arith.addf %148, %147 : vector<8x128xf32>
    %150 = arith.divf %148, %149 : vector<8x128xf32>
    %151 = vector.extract_strided_slice %150 {offsets = [0, 0], sizes = [8, 96], strides = [1, 1]} : vector<8x128xf32> to vector<8x96xf32>
    %152 = math.tanh %145 : vector<8x128xf32>
    %153 = vector.extract_strided_slice %152 {offsets = [0, 96], sizes = [8, 32], strides = [1, 1]} : vector<8x128xf32> to vector<8x32xf32>
    %154 = vector.extract_strided_slice %151 {offsets = [0, 0], sizes = [8, 32], strides = [1, 1]} : vector<8x96xf32> to vector<8x32xf32>
    %155 = vector.extract_strided_slice %151 {offsets = [0, 32], sizes = [8, 32], strides = [1, 1]} : vector<8x96xf32> to vector<8x32xf32>
    %156 = vector.extract_strided_slice %151 {offsets = [0, 64], sizes = [8, 32], strides = [1, 1]} : vector<8x96xf32> to vector<8x32xf32>
    %157 = arith.mulf %155, %112 : vector<8x32xf32>
    %158 = arith.mulf %154, %153 : vector<8x32xf32>
    %159 = arith.addf %157, %158 : vector<8x32xf32>
    %160 = math.tanh %159 : vector<8x32xf32>
    %161 = arith.mulf %156, %160 : vector<8x32xf32>
    %162 = tpu.concatenate %161, %137 in 1 : vector<8x32xf32>, vector<8x32xf32> -> vector<8x64xf32>
    %163 = arith.truncf %162 : vector<8x64xf32> to vector<8x64xbf16>
    %c0_86 = arith.constant 0 : index
    %c0_87 = arith.constant 0 : index
    %164 = vector.load %arg13[%c0_86, %c0_87] : memref<64x128xbf16, #tpu.memory_space<vmem>>, vector<64x128xbf16>
    %cst_88 = arith.constant dense<0.000000e+00> : vector<8x128xf32>
    %165 = tpu.matmul %163, %164, %cst_88 {dimension_numbers = #tpu.dot_dimension_numbers<[1], [0], [0], [1], [0, 0, 1, 1], [], []>} : vector<8x64xbf16>, vector<64x128xbf16>, vector<8x128xf32> -> vector<8x128xf32>
    %c0_89 = arith.constant 0 : index
    %c0_90 = arith.constant 0 : index
    %166 = vector.load %arg14[%c0_89, %c0_90] : memref<1x128xf32, #tpu.memory_space<vmem>>, vector<1x128xf32>
    %167 = vector.broadcast %166 : vector<1x128xf32> to vector<8x128xf32>
    %168 = arith.addf %165, %167 : vector<8x128xf32>
    %169 = arith.negf %168 : vector<8x128xf32>
    %170 = math.exp %169 : vector<8x128xf32>
    %cst_91 = arith.constant 1.000000e+00 : f32
    %171 = vector.broadcast %cst_91 : f32 to vector<8x128xf32>
    %172 = arith.addf %171, %170 : vector<8x128xf32>
    %173 = arith.divf %171, %172 : vector<8x128xf32>
    %174 = vector.extract_strided_slice %173 {offsets = [0, 0], sizes = [8, 96], strides = [1, 1]} : vector<8x128xf32> to vector<8x96xf32>
    %175 = math.tanh %168 : vector<8x128xf32>
    %176 = vector.extract_strided_slice %175 {offsets = [0, 96], sizes = [8, 32], strides = [1, 1]} : vector<8x128xf32> to vector<8x32xf32>
    %177 = vector.extract_strided_slice %174 {offsets = [0, 0], sizes = [8, 32], strides = [1, 1]} : vector<8x96xf32> to vector<8x32xf32>
    %178 = vector.extract_strided_slice %174 {offsets = [0, 32], sizes = [8, 32], strides = [1, 1]} : vector<8x96xf32> to vector<8x32xf32>
    %179 = vector.extract_strided_slice %174 {offsets = [0, 64], sizes = [8, 32], strides = [1, 1]} : vector<8x96xf32> to vector<8x32xf32>
    %180 = arith.mulf %178, %135 : vector<8x32xf32>
    %181 = arith.mulf %177, %176 : vector<8x32xf32>
    %182 = arith.addf %180, %181 : vector<8x32xf32>
    %183 = math.tanh %182 : vector<8x32xf32>
    %184 = arith.mulf %179, %183 : vector<8x32xf32>
    %c2_i32 = arith.constant 2 : i32
    %185 = arith.index_cast %c2_i32 : i32 to index
    %c0_92 = arith.constant 0 : index
    %c0_93 = arith.constant 0 : index
    %186 = vector.load %arg20[%185, %c0_92, %c0_93] : memref<8x8x128xbf16, #tpu.memory_space<vmem>>, vector<1x8x128xbf16>
    %187 = vector.shape_cast %186 : vector<1x8x128xbf16> to vector<8x128xbf16>
    %188 = arith.extf %187 : vector<8x128xbf16> to vector<8x128xf32>
    %189 = arith.truncf %161 : vector<8x32xf32> to vector<8x32xbf16>
    %c0_94 = arith.constant 0 : index
    %c0_95 = arith.constant 0 : index
    %190 = vector.load %arg11[%c0_94, %c0_95] : memref<32x128xbf16, #tpu.memory_space<vmem>>, vector<32x128xbf16>
    %cst_96 = arith.constant dense<0.000000e+00> : vector<8x128xf32>
    %191 = tpu.matmul %189, %190, %cst_96 {dimension_numbers = #tpu.dot_dimension_numbers<[1], [0], [0], [1], [0, 0, 1, 1], [], []>} : vector<8x32xbf16>, vector<32x128xbf16>, vector<8x128xf32> -> vector<8x128xf32>
    %192 = arith.addf %188, %191 : vector<8x128xf32>
    %193 = arith.negf %192 : vector<8x128xf32>
    %194 = math.exp %193 : vector<8x128xf32>
    %cst_97 = arith.constant 1.000000e+00 : f32
    %195 = vector.broadcast %cst_97 : f32 to vector<8x128xf32>
    %196 = arith.addf %195, %194 : vector<8x128xf32>
    %197 = arith.divf %195, %196 : vector<8x128xf32>
    %198 = vector.extract_strided_slice %197 {offsets = [0, 0], sizes = [8, 96], strides = [1, 1]} : vector<8x128xf32> to vector<8x96xf32>
    %199 = math.tanh %192 : vector<8x128xf32>
    %200 = vector.extract_strided_slice %199 {offsets = [0, 96], sizes = [8, 32], strides = [1, 1]} : vector<8x128xf32> to vector<8x32xf32>
    %201 = vector.extract_strided_slice %198 {offsets = [0, 0], sizes = [8, 32], strides = [1, 1]} : vector<8x96xf32> to vector<8x32xf32>
    %202 = vector.extract_strided_slice %198 {offsets = [0, 32], sizes = [8, 32], strides = [1, 1]} : vector<8x96xf32> to vector<8x32xf32>
    %203 = vector.extract_strided_slice %198 {offsets = [0, 64], sizes = [8, 32], strides = [1, 1]} : vector<8x96xf32> to vector<8x32xf32>
    %204 = arith.mulf %202, %159 : vector<8x32xf32>
    %205 = arith.mulf %201, %200 : vector<8x32xf32>
    %206 = arith.addf %204, %205 : vector<8x32xf32>
    %207 = math.tanh %206 : vector<8x32xf32>
    %208 = arith.mulf %203, %207 : vector<8x32xf32>
    %209 = tpu.concatenate %208, %184 in 1 : vector<8x32xf32>, vector<8x32xf32> -> vector<8x64xf32>
    %210 = arith.truncf %209 : vector<8x64xf32> to vector<8x64xbf16>
    %c0_98 = arith.constant 0 : index
    %c0_99 = arith.constant 0 : index
    %211 = vector.load %arg13[%c0_98, %c0_99] : memref<64x128xbf16, #tpu.memory_space<vmem>>, vector<64x128xbf16>
    %cst_100 = arith.constant dense<0.000000e+00> : vector<8x128xf32>
    %212 = tpu.matmul %210, %211, %cst_100 {dimension_numbers = #tpu.dot_dimension_numbers<[1], [0], [0], [1], [0, 0, 1, 1], [], []>} : vector<8x64xbf16>, vector<64x128xbf16>, vector<8x128xf32> -> vector<8x128xf32>
    %c0_101 = arith.constant 0 : index
    %c0_102 = arith.constant 0 : index
    %213 = vector.load %arg14[%c0_101, %c0_102] : memref<1x128xf32, #tpu.memory_space<vmem>>, vector<1x128xf32>
    %214 = vector.broadcast %213 : vector<1x128xf32> to vector<8x128xf32>
    %215 = arith.addf %212, %214 : vector<8x128xf32>
    %216 = arith.negf %215 : vector<8x128xf32>
    %217 = math.exp %216 : vector<8x128xf32>
    %cst_103 = arith.constant 1.000000e+00 : f32
    %218 = vector.broadcast %cst_103 : f32 to vector<8x128xf32>
    %219 = arith.addf %218, %217 : vector<8x128xf32>
    %220 = arith.divf %218, %219 : vector<8x128xf32>
    %221 = vector.extract_strided_slice %220 {offsets = [0, 0], sizes = [8, 96], strides = [1, 1]} : vector<8x128xf32> to vector<8x96xf32>
    %222 = math.tanh %215 : vector<8x128xf32>
    %223 = vector.extract_strided_slice %222 {offsets = [0, 96], sizes = [8, 32], strides = [1, 1]} : vector<8x128xf32> to vector<8x32xf32>
    %224 = vector.extract_strided_slice %221 {offsets = [0, 0], sizes = [8, 32], strides = [1, 1]} : vector<8x96xf32> to vector<8x32xf32>
    %225 = vector.extract_strided_slice %221 {offsets = [0, 32], sizes = [8, 32], strides = [1, 1]} : vector<8x96xf32> to vector<8x32xf32>
    %226 = vector.extract_strided_slice %221 {offsets = [0, 64], sizes = [8, 32], strides = [1, 1]} : vector<8x96xf32> to vector<8x32xf32>
    %227 = arith.mulf %225, %182 : vector<8x32xf32>
    %228 = arith.mulf %224, %223 : vector<8x32xf32>
    %229 = arith.addf %227, %228 : vector<8x32xf32>
    %230 = math.tanh %229 : vector<8x32xf32>
    %231 = arith.mulf %226, %230 : vector<8x32xf32>
    %c3_i32 = arith.constant 3 : i32
    %232 = arith.index_cast %c3_i32 : i32 to index
    %c0_104 = arith.constant 0 : index
    %c0_105 = arith.constant 0 : index
    %233 = vector.load %arg20[%232, %c0_104, %c0_105] : memref<8x8x128xbf16, #tpu.memory_space<vmem>>, vector<1x8x128xbf16>
    %234 = vector.shape_cast %233 : vector<1x8x128xbf16> to vector<8x128xbf16>
    %235 = arith.extf %234 : vector<8x128xbf16> to vector<8x128xf32>
    %236 = arith.truncf %208 : vector<8x32xf32> to vector<8x32xbf16>
    %c0_106 = arith.constant 0 : index
    %c0_107 = arith.constant 0 : index
    %237 = vector.load %arg11[%c0_106, %c0_107] : memref<32x128xbf16, #tpu.memory_space<vmem>>, vector<32x128xbf16>
    %cst_108 = arith.constant dense<0.000000e+00> : vector<8x128xf32>
    %238 = tpu.matmul %236, %237, %cst_108 {dimension_numbers = #tpu.dot_dimension_numbers<[1], [0], [0], [1], [0, 0, 1, 1], [], []>} : vector<8x32xbf16>, vector<32x128xbf16>, vector<8x128xf32> -> vector<8x128xf32>
    %239 = arith.addf %235, %238 : vector<8x128xf32>
    %240 = arith.negf %239 : vector<8x128xf32>
    %241 = math.exp %240 : vector<8x128xf32>
    %cst_109 = arith.constant 1.000000e+00 : f32
    %242 = vector.broadcast %cst_109 : f32 to vector<8x128xf32>
    %243 = arith.addf %242, %241 : vector<8x128xf32>
    %244 = arith.divf %242, %243 : vector<8x128xf32>
    %245 = vector.extract_strided_slice %244 {offsets = [0, 0], sizes = [8, 96], strides = [1, 1]} : vector<8x128xf32> to vector<8x96xf32>
    %246 = math.tanh %239 : vector<8x128xf32>
    %247 = vector.extract_strided_slice %246 {offsets = [0, 96], sizes = [8, 32], strides = [1, 1]} : vector<8x128xf32> to vector<8x32xf32>
    %248 = vector.extract_strided_slice %245 {offsets = [0, 0], sizes = [8, 32], strides = [1, 1]} : vector<8x96xf32> to vector<8x32xf32>
    %249 = vector.extract_strided_slice %245 {offsets = [0, 32], sizes = [8, 32], strides = [1, 1]} : vector<8x96xf32> to vector<8x32xf32>
    %250 = vector.extract_strided_slice %245 {offsets = [0, 64], sizes = [8, 32], strides = [1, 1]} : vector<8x96xf32> to vector<8x32xf32>
    %251 = arith.mulf %249, %206 : vector<8x32xf32>
    %252 = arith.mulf %248, %247 : vector<8x32xf32>
    %253 = arith.addf %251, %252 : vector<8x32xf32>
    %254 = math.tanh %253 : vector<8x32xf32>
    %255 = arith.mulf %250, %254 : vector<8x32xf32>
    %256 = tpu.concatenate %255, %231 in 1 : vector<8x32xf32>, vector<8x32xf32> -> vector<8x64xf32>
    %257 = arith.truncf %256 : vector<8x64xf32> to vector<8x64xbf16>
    %c0_110 = arith.constant 0 : index
    %c0_111 = arith.constant 0 : index
    %258 = vector.load %arg13[%c0_110, %c0_111] : memref<64x128xbf16, #tpu.memory_space<vmem>>, vector<64x128xbf16>
    %cst_112 = arith.constant dense<0.000000e+00> : vector<8x128xf32>
    %259 = tpu.matmul %257, %258, %cst_112 {dimension_numbers = #tpu.dot_dimension_numbers<[1], [0], [0], [1], [0, 0, 1, 1], [], []>} : vector<8x64xbf16>, vector<64x128xbf16>, vector<8x128xf32> -> vector<8x128xf32>
    %c0_113 = arith.constant 0 : index
    %c0_114 = arith.constant 0 : index
    %260 = vector.load %arg14[%c0_113, %c0_114] : memref<1x128xf32, #tpu.memory_space<vmem>>, vector<1x128xf32>
    %261 = vector.broadcast %260 : vector<1x128xf32> to vector<8x128xf32>
    %262 = arith.addf %259, %261 : vector<8x128xf32>
    %263 = arith.negf %262 : vector<8x128xf32>
    %264 = math.exp %263 : vector<8x128xf32>
    %cst_115 = arith.constant 1.000000e+00 : f32
    %265 = vector.broadcast %cst_115 : f32 to vector<8x128xf32>
    %266 = arith.addf %265, %264 : vector<8x128xf32>
    %267 = arith.divf %265, %266 : vector<8x128xf32>
    %268 = vector.extract_strided_slice %267 {offsets = [0, 0], sizes = [8, 96], strides = [1, 1]} : vector<8x128xf32> to vector<8x96xf32>
    %269 = math.tanh %262 : vector<8x128xf32>
    %270 = vector.extract_strided_slice %269 {offsets = [0, 96], sizes = [8, 32], strides = [1, 1]} : vector<8x128xf32> to vector<8x32xf32>
    %271 = vector.extract_strided_slice %268 {offsets = [0, 0], sizes = [8, 32], strides = [1, 1]} : vector<8x96xf32> to vector<8x32xf32>
    %272 = vector.extract_strided_slice %268 {offsets = [0, 32], sizes = [8, 32], strides = [1, 1]} : vector<8x96xf32> to vector<8x32xf32>
    %273 = vector.extract_strided_slice %268 {offsets = [0, 64], sizes = [8, 32], strides = [1, 1]} : vector<8x96xf32> to vector<8x32xf32>
    %274 = arith.mulf %272, %229 : vector<8x32xf32>
    %275 = arith.mulf %271, %270 : vector<8x32xf32>
    %276 = arith.addf %274, %275 : vector<8x32xf32>
    %277 = math.tanh %276 : vector<8x32xf32>
    %278 = arith.mulf %273, %277 : vector<8x32xf32>
    %c4_i32 = arith.constant 4 : i32
    %279 = arith.index_cast %c4_i32 : i32 to index
    %c0_116 = arith.constant 0 : index
    %c0_117 = arith.constant 0 : index
    %280 = vector.load %arg20[%279, %c0_116, %c0_117] : memref<8x8x128xbf16, #tpu.memory_space<vmem>>, vector<1x8x128xbf16>
    %281 = vector.shape_cast %280 : vector<1x8x128xbf16> to vector<8x128xbf16>
    %282 = arith.extf %281 : vector<8x128xbf16> to vector<8x128xf32>
    %283 = arith.truncf %255 : vector<8x32xf32> to vector<8x32xbf16>
    %c0_118 = arith.constant 0 : index
    %c0_119 = arith.constant 0 : index
    %284 = vector.load %arg11[%c0_118, %c0_119] : memref<32x128xbf16, #tpu.memory_space<vmem>>, vector<32x128xbf16>
    %cst_120 = arith.constant dense<0.000000e+00> : vector<8x128xf32>
    %285 = tpu.matmul %283, %284, %cst_120 {dimension_numbers = #tpu.dot_dimension_numbers<[1], [0], [0], [1], [0, 0, 1, 1], [], []>} : vector<8x32xbf16>, vector<32x128xbf16>, vector<8x128xf32> -> vector<8x128xf32>
    %286 = arith.addf %282, %285 : vector<8x128xf32>
    %287 = arith.negf %286 : vector<8x128xf32>
    %288 = math.exp %287 : vector<8x128xf32>
    %cst_121 = arith.constant 1.000000e+00 : f32
    %289 = vector.broadcast %cst_121 : f32 to vector<8x128xf32>
    %290 = arith.addf %289, %288 : vector<8x128xf32>
    %291 = arith.divf %289, %290 : vector<8x128xf32>
    %292 = vector.extract_strided_slice %291 {offsets = [0, 0], sizes = [8, 96], strides = [1, 1]} : vector<8x128xf32> to vector<8x96xf32>
    %293 = math.tanh %286 : vector<8x128xf32>
    %294 = vector.extract_strided_slice %293 {offsets = [0, 96], sizes = [8, 32], strides = [1, 1]} : vector<8x128xf32> to vector<8x32xf32>
    %295 = vector.extract_strided_slice %292 {offsets = [0, 0], sizes = [8, 32], strides = [1, 1]} : vector<8x96xf32> to vector<8x32xf32>
    %296 = vector.extract_strided_slice %292 {offsets = [0, 32], sizes = [8, 32], strides = [1, 1]} : vector<8x96xf32> to vector<8x32xf32>
    %297 = vector.extract_strided_slice %292 {offsets = [0, 64], sizes = [8, 32], strides = [1, 1]} : vector<8x96xf32> to vector<8x32xf32>
    %298 = arith.mulf %296, %253 : vector<8x32xf32>
    %299 = arith.mulf %295, %294 : vector<8x32xf32>
    %300 = arith.addf %298, %299 : vector<8x32xf32>
    %301 = math.tanh %300 : vector<8x32xf32>
    %302 = arith.mulf %297, %301 : vector<8x32xf32>
    %303 = tpu.concatenate %302, %278 in 1 : vector<8x32xf32>, vector<8x32xf32> -> vector<8x64xf32>
    %304 = arith.truncf %303 : vector<8x64xf32> to vector<8x64xbf16>
    %c0_122 = arith.constant 0 : index
    %c0_123 = arith.constant 0 : index
    %305 = vector.load %arg13[%c0_122, %c0_123] : memref<64x128xbf16, #tpu.memory_space<vmem>>, vector<64x128xbf16>
    %cst_124 = arith.constant dense<0.000000e+00> : vector<8x128xf32>
    %306 = tpu.matmul %304, %305, %cst_124 {dimension_numbers = #tpu.dot_dimension_numbers<[1], [0], [0], [1], [0, 0, 1, 1], [], []>} : vector<8x64xbf16>, vector<64x128xbf16>, vector<8x128xf32> -> vector<8x128xf32>
    %c0_125 = arith.constant 0 : index
    %c0_126 = arith.constant 0 : index
    %307 = vector.load %arg14[%c0_125, %c0_126] : memref<1x128xf32, #tpu.memory_space<vmem>>, vector<1x128xf32>
    %308 = vector.broadcast %307 : vector<1x128xf32> to vector<8x128xf32>
    %309 = arith.addf %306, %308 : vector<8x128xf32>
    %310 = arith.negf %309 : vector<8x128xf32>
    %311 = math.exp %310 : vector<8x128xf32>
    %cst_127 = arith.constant 1.000000e+00 : f32
    %312 = vector.broadcast %cst_127 : f32 to vector<8x128xf32>
    %313 = arith.addf %312, %311 : vector<8x128xf32>
    %314 = arith.divf %312, %313 : vector<8x128xf32>
    %315 = vector.extract_strided_slice %314 {offsets = [0, 0], sizes = [8, 96], strides = [1, 1]} : vector<8x128xf32> to vector<8x96xf32>
    %316 = math.tanh %309 : vector<8x128xf32>
    %317 = vector.extract_strided_slice %316 {offsets = [0, 96], sizes = [8, 32], strides = [1, 1]} : vector<8x128xf32> to vector<8x32xf32>
    %318 = vector.extract_strided_slice %315 {offsets = [0, 0], sizes = [8, 32], strides = [1, 1]} : vector<8x96xf32> to vector<8x32xf32>
    %319 = vector.extract_strided_slice %315 {offsets = [0, 32], sizes = [8, 32], strides = [1, 1]} : vector<8x96xf32> to vector<8x32xf32>
    %320 = vector.extract_strided_slice %315 {offsets = [0, 64], sizes = [8, 32], strides = [1, 1]} : vector<8x96xf32> to vector<8x32xf32>
    %321 = arith.mulf %319, %276 : vector<8x32xf32>
    %322 = arith.mulf %318, %317 : vector<8x32xf32>
    %323 = arith.addf %321, %322 : vector<8x32xf32>
    %324 = math.tanh %323 : vector<8x32xf32>
    %325 = arith.mulf %320, %324 : vector<8x32xf32>
    %c5_i32 = arith.constant 5 : i32
    %326 = arith.index_cast %c5_i32 : i32 to index
    %c0_128 = arith.constant 0 : index
    %c0_129 = arith.constant 0 : index
    %327 = vector.load %arg20[%326, %c0_128, %c0_129] : memref<8x8x128xbf16, #tpu.memory_space<vmem>>, vector<1x8x128xbf16>
    %328 = vector.shape_cast %327 : vector<1x8x128xbf16> to vector<8x128xbf16>
    %329 = arith.extf %328 : vector<8x128xbf16> to vector<8x128xf32>
    %330 = arith.truncf %302 : vector<8x32xf32> to vector<8x32xbf16>
    %c0_130 = arith.constant 0 : index
    %c0_131 = arith.constant 0 : index
    %331 = vector.load %arg11[%c0_130, %c0_131] : memref<32x128xbf16, #tpu.memory_space<vmem>>, vector<32x128xbf16>
    %cst_132 = arith.constant dense<0.000000e+00> : vector<8x128xf32>
    %332 = tpu.matmul %330, %331, %cst_132 {dimension_numbers = #tpu.dot_dimension_numbers<[1], [0], [0], [1], [0, 0, 1, 1], [], []>} : vector<8x32xbf16>, vector<32x128xbf16>, vector<8x128xf32> -> vector<8x128xf32>
    %333 = arith.addf %329, %332 : vector<8x128xf32>
    %334 = arith.negf %333 : vector<8x128xf32>
    %335 = math.exp %334 : vector<8x128xf32>
    %cst_133 = arith.constant 1.000000e+00 : f32
    %336 = vector.broadcast %cst_133 : f32 to vector<8x128xf32>
    %337 = arith.addf %336, %335 : vector<8x128xf32>
    %338 = arith.divf %336, %337 : vector<8x128xf32>
    %339 = vector.extract_strided_slice %338 {offsets = [0, 0], sizes = [8, 96], strides = [1, 1]} : vector<8x128xf32> to vector<8x96xf32>
    %340 = math.tanh %333 : vector<8x128xf32>
    %341 = vector.extract_strided_slice %340 {offsets = [0, 96], sizes = [8, 32], strides = [1, 1]} : vector<8x128xf32> to vector<8x32xf32>
    %342 = vector.extract_strided_slice %339 {offsets = [0, 0], sizes = [8, 32], strides = [1, 1]} : vector<8x96xf32> to vector<8x32xf32>
    %343 = vector.extract_strided_slice %339 {offsets = [0, 32], sizes = [8, 32], strides = [1, 1]} : vector<8x96xf32> to vector<8x32xf32>
    %344 = vector.extract_strided_slice %339 {offsets = [0, 64], sizes = [8, 32], strides = [1, 1]} : vector<8x96xf32> to vector<8x32xf32>
    %345 = arith.mulf %343, %300 : vector<8x32xf32>
    %346 = arith.mulf %342, %341 : vector<8x32xf32>
    %347 = arith.addf %345, %346 : vector<8x32xf32>
    %348 = math.tanh %347 : vector<8x32xf32>
    %349 = arith.mulf %344, %348 : vector<8x32xf32>
    %350 = tpu.concatenate %349, %325 in 1 : vector<8x32xf32>, vector<8x32xf32> -> vector<8x64xf32>
    %351 = arith.truncf %350 : vector<8x64xf32> to vector<8x64xbf16>
    %c0_134 = arith.constant 0 : index
    %c0_135 = arith.constant 0 : index
    %352 = vector.load %arg13[%c0_134, %c0_135] : memref<64x128xbf16, #tpu.memory_space<vmem>>, vector<64x128xbf16>
    %cst_136 = arith.constant dense<0.000000e+00> : vector<8x128xf32>
    %353 = tpu.matmul %351, %352, %cst_136 {dimension_numbers = #tpu.dot_dimension_numbers<[1], [0], [0], [1], [0, 0, 1, 1], [], []>} : vector<8x64xbf16>, vector<64x128xbf16>, vector<8x128xf32> -> vector<8x128xf32>
    %c0_137 = arith.constant 0 : index
    %c0_138 = arith.constant 0 : index
    %354 = vector.load %arg14[%c0_137, %c0_138] : memref<1x128xf32, #tpu.memory_space<vmem>>, vector<1x128xf32>
    %355 = vector.broadcast %354 : vector<1x128xf32> to vector<8x128xf32>
    %356 = arith.addf %353, %355 : vector<8x128xf32>
    %357 = arith.negf %356 : vector<8x128xf32>
    %358 = math.exp %357 : vector<8x128xf32>
    %cst_139 = arith.constant 1.000000e+00 : f32
    %359 = vector.broadcast %cst_139 : f32 to vector<8x128xf32>
    %360 = arith.addf %359, %358 : vector<8x128xf32>
    %361 = arith.divf %359, %360 : vector<8x128xf32>
    %362 = vector.extract_strided_slice %361 {offsets = [0, 0], sizes = [8, 96], strides = [1, 1]} : vector<8x128xf32> to vector<8x96xf32>
    %363 = math.tanh %356 : vector<8x128xf32>
    %364 = vector.extract_strided_slice %363 {offsets = [0, 96], sizes = [8, 32], strides = [1, 1]} : vector<8x128xf32> to vector<8x32xf32>
    %365 = vector.extract_strided_slice %362 {offsets = [0, 0], sizes = [8, 32], strides = [1, 1]} : vector<8x96xf32> to vector<8x32xf32>
    %366 = vector.extract_strided_slice %362 {offsets = [0, 32], sizes = [8, 32], strides = [1, 1]} : vector<8x96xf32> to vector<8x32xf32>
    %367 = vector.extract_strided_slice %362 {offsets = [0, 64], sizes = [8, 32], strides = [1, 1]} : vector<8x96xf32> to vector<8x32xf32>
    %368 = arith.mulf %366, %323 : vector<8x32xf32>
    %369 = arith.mulf %365, %364 : vector<8x32xf32>
    %370 = arith.addf %368, %369 : vector<8x32xf32>
    %371 = math.tanh %370 : vector<8x32xf32>
    %372 = arith.mulf %367, %371 : vector<8x32xf32>
    %c6_i32 = arith.constant 6 : i32
    %373 = arith.index_cast %c6_i32 : i32 to index
    %c0_140 = arith.constant 0 : index
    %c0_141 = arith.constant 0 : index
    %374 = vector.load %arg20[%373, %c0_140, %c0_141] : memref<8x8x128xbf16, #tpu.memory_space<vmem>>, vector<1x8x128xbf16>
    %375 = vector.shape_cast %374 : vector<1x8x128xbf16> to vector<8x128xbf16>
    %376 = arith.extf %375 : vector<8x128xbf16> to vector<8x128xf32>
    %377 = arith.truncf %349 : vector<8x32xf32> to vector<8x32xbf16>
    %c0_142 = arith.constant 0 : index
    %c0_143 = arith.constant 0 : index
    %378 = vector.load %arg11[%c0_142, %c0_143] : memref<32x128xbf16, #tpu.memory_space<vmem>>, vector<32x128xbf16>
    %cst_144 = arith.constant dense<0.000000e+00> : vector<8x128xf32>
    %379 = tpu.matmul %377, %378, %cst_144 {dimension_numbers = #tpu.dot_dimension_numbers<[1], [0], [0], [1], [0, 0, 1, 1], [], []>} : vector<8x32xbf16>, vector<32x128xbf16>, vector<8x128xf32> -> vector<8x128xf32>
    %380 = arith.addf %376, %379 : vector<8x128xf32>
    %381 = arith.negf %380 : vector<8x128xf32>
    %382 = math.exp %381 : vector<8x128xf32>
    %cst_145 = arith.constant 1.000000e+00 : f32
    %383 = vector.broadcast %cst_145 : f32 to vector<8x128xf32>
    %384 = arith.addf %383, %382 : vector<8x128xf32>
    %385 = arith.divf %383, %384 : vector<8x128xf32>
    %386 = vector.extract_strided_slice %385 {offsets = [0, 0], sizes = [8, 96], strides = [1, 1]} : vector<8x128xf32> to vector<8x96xf32>
    %387 = math.tanh %380 : vector<8x128xf32>
    %388 = vector.extract_strided_slice %387 {offsets = [0, 96], sizes = [8, 32], strides = [1, 1]} : vector<8x128xf32> to vector<8x32xf32>
    %389 = vector.extract_strided_slice %386 {offsets = [0, 0], sizes = [8, 32], strides = [1, 1]} : vector<8x96xf32> to vector<8x32xf32>
    %390 = vector.extract_strided_slice %386 {offsets = [0, 32], sizes = [8, 32], strides = [1, 1]} : vector<8x96xf32> to vector<8x32xf32>
    %391 = vector.extract_strided_slice %386 {offsets = [0, 64], sizes = [8, 32], strides = [1, 1]} : vector<8x96xf32> to vector<8x32xf32>
    %392 = arith.mulf %390, %347 : vector<8x32xf32>
    %393 = arith.mulf %389, %388 : vector<8x32xf32>
    %394 = arith.addf %392, %393 : vector<8x32xf32>
    %395 = math.tanh %394 : vector<8x32xf32>
    %396 = arith.mulf %391, %395 : vector<8x32xf32>
    %397 = tpu.concatenate %396, %372 in 1 : vector<8x32xf32>, vector<8x32xf32> -> vector<8x64xf32>
    %398 = arith.truncf %397 : vector<8x64xf32> to vector<8x64xbf16>
    %c0_146 = arith.constant 0 : index
    %c0_147 = arith.constant 0 : index
    %399 = vector.load %arg13[%c0_146, %c0_147] : memref<64x128xbf16, #tpu.memory_space<vmem>>, vector<64x128xbf16>
    %cst_148 = arith.constant dense<0.000000e+00> : vector<8x128xf32>
    %400 = tpu.matmul %398, %399, %cst_148 {dimension_numbers = #tpu.dot_dimension_numbers<[1], [0], [0], [1], [0, 0, 1, 1], [], []>} : vector<8x64xbf16>, vector<64x128xbf16>, vector<8x128xf32> -> vector<8x128xf32>
    %c0_149 = arith.constant 0 : index
    %c0_150 = arith.constant 0 : index
    %401 = vector.load %arg14[%c0_149, %c0_150] : memref<1x128xf32, #tpu.memory_space<vmem>>, vector<1x128xf32>
    %402 = vector.broadcast %401 : vector<1x128xf32> to vector<8x128xf32>
    %403 = arith.addf %400, %402 : vector<8x128xf32>
    %404 = arith.negf %403 : vector<8x128xf32>
    %405 = math.exp %404 : vector<8x128xf32>
    %cst_151 = arith.constant 1.000000e+00 : f32
    %406 = vector.broadcast %cst_151 : f32 to vector<8x128xf32>
    %407 = arith.addf %406, %405 : vector<8x128xf32>
    %408 = arith.divf %406, %407 : vector<8x128xf32>
    %409 = vector.extract_strided_slice %408 {offsets = [0, 0], sizes = [8, 96], strides = [1, 1]} : vector<8x128xf32> to vector<8x96xf32>
    %410 = math.tanh %403 : vector<8x128xf32>
    %411 = vector.extract_strided_slice %410 {offsets = [0, 96], sizes = [8, 32], strides = [1, 1]} : vector<8x128xf32> to vector<8x32xf32>
    %412 = vector.extract_strided_slice %409 {offsets = [0, 0], sizes = [8, 32], strides = [1, 1]} : vector<8x96xf32> to vector<8x32xf32>
    %413 = vector.extract_strided_slice %409 {offsets = [0, 32], sizes = [8, 32], strides = [1, 1]} : vector<8x96xf32> to vector<8x32xf32>
    %414 = vector.extract_strided_slice %409 {offsets = [0, 64], sizes = [8, 32], strides = [1, 1]} : vector<8x96xf32> to vector<8x32xf32>
    %415 = arith.mulf %413, %370 : vector<8x32xf32>
    %416 = arith.mulf %412, %411 : vector<8x32xf32>
    %417 = arith.addf %415, %416 : vector<8x32xf32>
    %418 = math.tanh %417 : vector<8x32xf32>
    %419 = arith.mulf %414, %418 : vector<8x32xf32>
    %c7_i32 = arith.constant 7 : i32
    %420 = arith.index_cast %c7_i32 : i32 to index
    %c0_152 = arith.constant 0 : index
    %c0_153 = arith.constant 0 : index
    %421 = vector.load %arg20[%420, %c0_152, %c0_153] : memref<8x8x128xbf16, #tpu.memory_space<vmem>>, vector<1x8x128xbf16>
    %422 = vector.shape_cast %421 : vector<1x8x128xbf16> to vector<8x128xbf16>
    %423 = arith.extf %422 : vector<8x128xbf16> to vector<8x128xf32>
    %424 = arith.truncf %396 : vector<8x32xf32> to vector<8x32xbf16>
    %c0_154 = arith.constant 0 : index
    %c0_155 = arith.constant 0 : index
    %425 = vector.load %arg11[%c0_154, %c0_155] : memref<32x128xbf16, #tpu.memory_space<vmem>>, vector<32x128xbf16>
    %cst_156 = arith.constant dense<0.000000e+00> : vector<8x128xf32>
    %426 = tpu.matmul %424, %425, %cst_156 {dimension_numbers = #tpu.dot_dimension_numbers<[1], [0], [0], [1], [0, 0, 1, 1], [], []>} : vector<8x32xbf16>, vector<32x128xbf16>, vector<8x128xf32> -> vector<8x128xf32>
    %427 = arith.addf %423, %426 : vector<8x128xf32>
    %428 = arith.negf %427 : vector<8x128xf32>
    %429 = math.exp %428 : vector<8x128xf32>
    %cst_157 = arith.constant 1.000000e+00 : f32
    %430 = vector.broadcast %cst_157 : f32 to vector<8x128xf32>
    %431 = arith.addf %430, %429 : vector<8x128xf32>
    %432 = arith.divf %430, %431 : vector<8x128xf32>
    %433 = vector.extract_strided_slice %432 {offsets = [0, 0], sizes = [8, 96], strides = [1, 1]} : vector<8x128xf32> to vector<8x96xf32>
    %434 = math.tanh %427 : vector<8x128xf32>
    %435 = vector.extract_strided_slice %434 {offsets = [0, 96], sizes = [8, 32], strides = [1, 1]} : vector<8x128xf32> to vector<8x32xf32>
    %436 = vector.extract_strided_slice %433 {offsets = [0, 0], sizes = [8, 32], strides = [1, 1]} : vector<8x96xf32> to vector<8x32xf32>
    %437 = vector.extract_strided_slice %433 {offsets = [0, 32], sizes = [8, 32], strides = [1, 1]} : vector<8x96xf32> to vector<8x32xf32>
    %438 = vector.extract_strided_slice %433 {offsets = [0, 64], sizes = [8, 32], strides = [1, 1]} : vector<8x96xf32> to vector<8x32xf32>
    %439 = arith.mulf %437, %394 : vector<8x32xf32>
    %440 = arith.mulf %436, %435 : vector<8x32xf32>
    %441 = arith.addf %439, %440 : vector<8x32xf32>
    %442 = math.tanh %441 : vector<8x32xf32>
    %443 = arith.mulf %438, %442 : vector<8x32xf32>
    %444 = tpu.concatenate %443, %419 in 1 : vector<8x32xf32>, vector<8x32xf32> -> vector<8x64xf32>
    %445 = arith.truncf %444 : vector<8x64xf32> to vector<8x64xbf16>
    %c0_158 = arith.constant 0 : index
    %c0_159 = arith.constant 0 : index
    %446 = vector.load %arg13[%c0_158, %c0_159] : memref<64x128xbf16, #tpu.memory_space<vmem>>, vector<64x128xbf16>
    %cst_160 = arith.constant dense<0.000000e+00> : vector<8x128xf32>
    %447 = tpu.matmul %445, %446, %cst_160 {dimension_numbers = #tpu.dot_dimension_numbers<[1], [0], [0], [1], [0, 0, 1, 1], [], []>} : vector<8x64xbf16>, vector<64x128xbf16>, vector<8x128xf32> -> vector<8x128xf32>
    %c0_161 = arith.constant 0 : index
    %c0_162 = arith.constant 0 : index
    %448 = vector.load %arg14[%c0_161, %c0_162] : memref<1x128xf32, #tpu.memory_space<vmem>>, vector<1x128xf32>
    %449 = vector.broadcast %448 : vector<1x128xf32> to vector<8x128xf32>
    %450 = arith.addf %447, %449 : vector<8x128xf32>
    %451 = arith.negf %450 : vector<8x128xf32>
    %452 = math.exp %451 : vector<8x128xf32>
    %cst_163 = arith.constant 1.000000e+00 : f32
    %453 = vector.broadcast %cst_163 : f32 to vector<8x128xf32>
    %454 = arith.addf %453, %452 : vector<8x128xf32>
    %455 = arith.divf %453, %454 : vector<8x128xf32>
    %456 = vector.extract_strided_slice %455 {offsets = [0, 0], sizes = [8, 96], strides = [1, 1]} : vector<8x128xf32> to vector<8x96xf32>
    %457 = math.tanh %450 : vector<8x128xf32>
    %458 = vector.extract_strided_slice %457 {offsets = [0, 96], sizes = [8, 32], strides = [1, 1]} : vector<8x128xf32> to vector<8x32xf32>
    %459 = vector.extract_strided_slice %456 {offsets = [0, 0], sizes = [8, 32], strides = [1, 1]} : vector<8x96xf32> to vector<8x32xf32>
    %460 = vector.extract_strided_slice %456 {offsets = [0, 32], sizes = [8, 32], strides = [1, 1]} : vector<8x96xf32> to vector<8x32xf32>
    %461 = vector.extract_strided_slice %456 {offsets = [0, 64], sizes = [8, 32], strides = [1, 1]} : vector<8x96xf32> to vector<8x32xf32>
    %462 = arith.mulf %460, %417 : vector<8x32xf32>
    %463 = arith.mulf %459, %458 : vector<8x32xf32>
    %464 = arith.addf %462, %463 : vector<8x32xf32>
    %465 = math.tanh %464 : vector<8x32xf32>
    %466 = arith.mulf %461, %465 : vector<8x32xf32>
    %c8_i32 = arith.constant 8 : i32
    %467 = arith.truncf %466 : vector<8x32xf32> to vector<8x32xbf16>
    %c0_164 = arith.constant 0 : index
    %c0_165 = arith.constant 0 : index
    %468 = vector.load %arg15[%c0_164, %c0_165] : memref<32x16xbf16, #tpu.memory_space<vmem>>, vector<32x16xbf16>
    %cst_166 = arith.constant dense<0.000000e+00> : vector<8x16xf32>
    %469 = tpu.matmul %467, %468, %cst_166 {dimension_numbers = #tpu.dot_dimension_numbers<[1], [0], [0], [1], [0, 0, 1, 1], [], []>} : vector<8x32xbf16>, vector<32x16xbf16>, vector<8x16xf32> -> vector<8x16xf32>
    %c0_167 = arith.constant 0 : index
    %c0_168 = arith.constant 0 : index
    %470 = vector.load %arg16[%c0_167, %c0_168] : memref<1x16xf32, #tpu.memory_space<vmem>>, vector<1x16xf32>
    %471 = vector.broadcast %470 : vector<1x16xf32> to vector<8x16xf32>
    %472 = arith.addf %469, %471 : vector<8x16xf32>
    %cst_169 = arith.constant 0.000000e+00 : f32
    %473 = vector.broadcast %cst_169 : f32 to vector<8x16xf32>
    %474 = arith.maximumf %472, %473 : vector<8x16xf32>
    %475 = arith.truncf %474 : vector<8x16xf32> to vector<8x16xbf16>
    %c0_170 = arith.constant 0 : index
    %c0_171 = arith.constant 0 : index
    %476 = vector.load %arg17[%c0_170, %c0_171] : memref<16x5xbf16, #tpu.memory_space<vmem>>, vector<16x5xbf16>
    %cst_172 = arith.constant dense<0.000000e+00> : vector<8x5xf32>
    %477 = tpu.matmul %475, %476, %cst_172 {dimension_numbers = #tpu.dot_dimension_numbers<[1], [0], [0], [1], [0, 0, 1, 1], [], []>} : vector<8x16xbf16>, vector<16x5xbf16>, vector<8x5xf32> -> vector<8x5xf32>
    %c0_173 = arith.constant 0 : index
    %c0_174 = arith.constant 0 : index
    %478 = vector.load %arg18[%c0_173, %c0_174] : memref<1x5xf32, #tpu.memory_space<vmem>>, vector<1x5xf32>
    %479 = vector.broadcast %478 : vector<1x5xf32> to vector<8x5xf32>
    %480 = arith.addf %477, %479 : vector<8x5xf32>
    %c0_175 = arith.constant 0 : index
    %c0_176 = arith.constant 0 : index
    %481 = vector.load %arg19[%c0_175, %c0_176] : memref<8x5xf32, #tpu.memory_space<vmem>>, vector<8x5xf32>
    tpu.vector_store %arg19[%c0_175, %c0_176], %480 {strides = array<i32>} : memref<8x5xf32, #tpu.memory_space<vmem>>, vector<8x5xf32>,
    return
  }
  func.func @transform_0(%arg0: i32) -> (i32, i32, i32) {
    %c0_i32 = arith.constant 0 : i32
    %c0_i32_0 = arith.constant 0 : i32
    %c0_i32_1 = arith.constant 0 : i32
    return %arg0, %c0_i32, %c0_i32_0 : i32, i32, i32
  }
  func.func @transform_1(%arg0: i32) -> (i32, i32, i32) {
    %c0_i32 = arith.constant 0 : i32
    %c0_i32_0 = arith.constant 0 : i32
    %c0_i32_1 = arith.constant 0 : i32
    %c0_i32_2 = arith.constant 0 : i32
    return %c0_i32, %c0_i32_0, %c0_i32_1 : i32, i32, i32
  }
  func.func @transform_2(%arg0: i32) -> (i32, i32) {
    %c0_i32 = arith.constant 0 : i32
    %c0_i32_0 = arith.constant 0 : i32
    %c0_i32_1 = arith.constant 0 : i32
    return %c0_i32, %c0_i32_0 : i32, i32
  }
  func.func @transform_3(%arg0: i32) -> (i32, i32, i32) {
    %c0_i32 = arith.constant 0 : i32
    %c0_i32_0 = arith.constant 0 : i32
    %c0_i32_1 = arith.constant 0 : i32
    %c0_i32_2 = arith.constant 0 : i32
    return %c0_i32, %c0_i32_0, %c0_i32_1 : i32, i32, i32
  }
  func.func @transform_4(%arg0: i32) -> (i32, i32) {
    %c0_i32 = arith.constant 0 : i32
    %c0_i32_0 = arith.constant 0 : i32
    %c0_i32_1 = arith.constant 0 : i32
    return %c0_i32, %c0_i32_0 : i32, i32
  }
  func.func @transform_5(%arg0: i32) -> (i32, i32, i32) {
    %c0_i32 = arith.constant 0 : i32
    %c0_i32_0 = arith.constant 0 : i32
    %c0_i32_1 = arith.constant 0 : i32
    %c0_i32_2 = arith.constant 0 : i32
    return %c0_i32, %c0_i32_0, %c0_i32_1 : i32, i32, i32
  }
  func.func @transform_6(%arg0: i32) -> (i32, i32) {
    %c0_i32 = arith.constant 0 : i32
    %c0_i32_0 = arith.constant 0 : i32
    %c0_i32_1 = arith.constant 0 : i32
    return %c0_i32, %c0_i32_0 : i32, i32
  }
  func.func @transform_7(%arg0: i32) -> (i32, i32, i32) {
    %c0_i32 = arith.constant 0 : i32
    %c0_i32_0 = arith.constant 0 : i32
    %c0_i32_1 = arith.constant 0 : i32
    %c0_i32_2 = arith.constant 0 : i32
    return %c0_i32, %c0_i32_0, %c0_i32_1 : i32, i32, i32
  }
  func.func @transform_8(%arg0: i32) -> (i32, i32) {
    %c0_i32 = arith.constant 0 : i32
    %c0_i32_0 = arith.constant 0 : i32
    %c0_i32_1 = arith.constant 0 : i32
    return %c0_i32, %c0_i32_0 : i32, i32
  }
  func.func @transform_9(%arg0: i32) -> (i32, i32) {
    %c0_i32 = arith.constant 0 : i32
    %c0_i32_0 = arith.constant 0 : i32
    %c0_i32_1 = arith.constant 0 : i32
    return %c0_i32, %c0_i32_0 : i32, i32
  }
  func.func @transform_10(%arg0: i32) -> (i32, i32) {
    %c0_i32 = arith.constant 0 : i32
    %c0_i32_0 = arith.constant 0 : i32
    %c0_i32_1 = arith.constant 0 : i32
    return %c0_i32, %c0_i32_0 : i32, i32
  }
  func.func @transform_11(%arg0: i32) -> (i32, i32) {
    %c0_i32 = arith.constant 0 : i32
    %c0_i32_0 = arith.constant 0 : i32
    %c0_i32_1 = arith.constant 0 : i32
    return %c0_i32, %c0_i32_0 : i32, i32
  }
  func.func @transform_12(%arg0: i32) -> (i32, i32) {
    %c0_i32 = arith.constant 0 : i32
    %c0_i32_0 = arith.constant 0 : i32
    %c0_i32_1 = arith.constant 0 : i32
    return %c0_i32, %c0_i32_0 : i32, i32
  }
  func.func @transform_13(%arg0: i32) -> (i32, i32) {
    %c0_i32 = arith.constant 0 : i32
    %c0_i32_0 = arith.constant 0 : i32
    %c0_i32_1 = arith.constant 0 : i32
    return %c0_i32, %c0_i32_0 : i32, i32
  }
  func.func @transform_14(%arg0: i32) -> (i32, i32) {
    %c0_i32 = arith.constant 0 : i32
    %c0_i32_0 = arith.constant 0 : i32
    %c0_i32_1 = arith.constant 0 : i32
    return %c0_i32, %c0_i32_0 : i32, i32
  }
  func.func @transform_15(%arg0: i32) -> (i32, i32) {
    %c0_i32 = arith.constant 0 : i32
    %c0_i32_0 = arith.constant 0 : i32
    %c0_i32_1 = arith.constant 0 : i32
    return %c0_i32, %c0_i32_0 : i32, i32
  }
  func.func @transform_16(%arg0: i32) -> (i32, i32) {
    %c0_i32 = arith.constant 0 : i32
    %c0_i32_0 = arith.constant 0 : i32
    %c0_i32_1 = arith.constant 0 : i32
    return %c0_i32, %c0_i32_0 : i32, i32
  }
  func.func @transform_17(%arg0: i32) -> (i32, i32) {
    %c0_i32 = arith.constant 0 : i32
    %c0_i32_0 = arith.constant 0 : i32
    %c0_i32_1 = arith.constant 0 : i32
    return %c0_i32, %c0_i32_0 : i32, i32
  }
  func.func @transform_18(%arg0: i32) -> (i32, i32) {
    %c0_i32 = arith.constant 0 : i32
    %c0_i32_0 = arith.constant 0 : i32
    return %arg0, %c0_i32 : i32, i32
  }
}

</mosaic_0001>

<bundles_post_ra>
// kernel: deepconvlstm_forward.1
= control target key start
LH: loop header
LB: loop body
LE: loop exit
PB: predicated region body
PF: predicated region fallthrough
CT: control target
= control target key end

     0   :  { %vm144_vm0 = vcmask 1043456   ;;  %vm145_vm1 = vcmask 1044480   ;;  %v2832_v2 = vmov 65535   ;;  %vm122_vm2 = vcmask 72704   ;;  %s2835_s23 = smov 64   ;;  %s2836_s25 = smov 96   ;;  %s3488_s1 = inlined_call_operand.vmem [shape: bf16[3,9,8], index: 1, kind: input, shape index: {}]   ;;  %s3489_s0 = inlined_call_operand.vmem [shape: bf16[1,128,9], index: 0, kind: input, shape index: {}]   ;;  %s3490_s2 = inlined_call_operand.vmem [shape: f32[1,8], index: 2, kind: input, shape index: {}]   ;;  %s3491_s3 = inlined_call_operand.vmem [shape: bf16[3,8,16], index: 3, kind: input, shape index: {}]   ;;  %s3492_s4 = inlined_call_operand.vmem [shape: f32[1,16], index: 4, kind: input, shape index: {}]   ;;  %s3493_s5 = inlined_call_operand.vmem [shape: bf16[3,16,32], index: 5, kind: input, shape index: {}]   ;;  %s3494_s6 = inlined_call_operand.vmem [shape: f32[1,32], index: 6, kind: input, shape index: {}]   ;;  %s3495_s7 = inlined_call_operand.vmem [shape: bf16[3,32,64], index: 7, kind: input, shape index: {}]   ;;  %s3496_s8 = inlined_call_operand.vmem [shape: f32[1,64], index: 8, kind: input, shape index: {}]   ;;  %s3497_s9 = inlined_call_operand.vmem [shape: bf16[64,128], index: 9, kind: input, shape index: {}]   ;;  %s3498_s10 = inlined_call_operand.vmem [shape: bf16[32,128], index: 10, kind: input, shape index: {}]   ;;  %s3499_s11 = inlined_call_operand.vmem [shape: f32[1,128], index: 11, kind: input, shape index: {}]   ;;  %s3500_s12 = inlined_call_operand.vmem [shape: bf16[64,128], index: 12, kind: input, shape index: {}]   ;;  %s3501_s13 = inlined_call_operand.vmem [shape: f32[1,128], index: 13, kind: input, shape index: {}]   ;;  %s3502_s14 = inlined_call_operand.vmem [shape: bf16[32,16], index: 14, kind: input, shape index: {}]   ;;  %s3503_s15 = inlined_call_operand.vmem [shape: f32[1,16], index: 15, kind: input, shape index: {}]   ;;  %s3504_s16 = inlined_call_operand.vmem [shape: bf16[16,5], index: 16, kind: input, shape index: {}]   ;;  %s3505_s17 = inlined_call_operand.vmem [shape: f32[1,5], index: 17, kind: input, shape index: {}]   ;;  %s3506_s18 = inlined_call_operand.vmem [shape: f32[8,5], index: 18, kind: output, shape index: {}]  }
   0x1   :  { %3509 = sst [smem:[#allocation3_spill]] %s3488_s1  ;;  %v146_v3 = vsel %vm144_vm0, 4294967295, %v2832_v2  ;;  %v397_v30 = vld [vmem:[%s3491_s3] sm:$0xf]  ;;  %v2383_v31 = vld [vmem:[%s3491_s3 + $0x8] sm:$0xf] }
   0x2   :  { %3510 = sst [smem:[#allocation4_spill]] %s3489_s0  ;;  %v147_v5 = vsel %vm145_vm1, %v146_v3, 0  ;;  %v452_v32 = vsel %vm144_vm0, %v397_v30, 0  ;;  %v584_v33 = vsel %vm144_vm0, %v2383_v31, 0  ;;  %v2376_v37 = vld [vmem:[%s3491_s3 + $0x4] sm:$0xf] }
   0x3   :  { %3511 = sst [smem:[#allocation5_spill]] %s3490_s2  ;;  %461 = vmatpush.bf16.msra.mxu3 %v452_v32  ;;  %v522_v38 = vsel %vm144_vm0, %v2376_v37, 0  ;;  %vm432_vm3 = vcmask 64512   ;;  %vm698_vm4 = vcmask 130048   ;;  %vm942_vm5 = vcmask 261120  }
   0x4   :  { %s3512_s29 = sld [smem:[#allocation3_spill]]  ;;  %vm1164_vm6 = vcmask 523264  }
   0x5   :  { %s3513_s27 = sld [smem:[#allocation4_spill]] }
   0x6   :  { %s3514_s0 = sld [smem:[#allocation5_spill]] }
   0x7   :  { %531 = vmatpush.bf16.msrb.mxu3 %v522_v38 }
   0xa   :  { %v2335_v0 = vld [vmem:[%s3512_s29] sm:$0xf]  ;;  %v2554_v1 = vld [vmem:[%s3512_s29] sm:$0x10]  ;;  %v2348_v6 = vld [vmem:[%s3512_s29 + $0x8] sm:$0xf] }
   0xb   :  { %v2336_v4 = vor.u32 %v2554_v1, %v2335_v0  ;;  %v2555_v7 = vld [vmem:[%s3512_s29 + $0x8] sm:$0x10]  ;;  %v2361_v9 = vld [vmem:[%s3512_s29 + $0x10] sm:$0xf]  ;;  %v2556_v10 = vld [vmem:[%s3512_s29 + $0x10] sm:$0x10] }
   0xc   :  { %v2349_v8 = vor.u32 %v2555_v7, %v2348_v6  ;;  %v2362_v12 = vor.u32 %v2556_v10, %v2361_v9  ;;  %v2580_v15 = vld [vmem:[%s3513_s27] sm:$0xff]   ;;  %v2631_v17 = vld [vmem:[%s3513_s27 + $0x8] sm:$0xff]   ;;  %v2632_v19 = vld [vmem:[%s3513_s27 + $0x10] sm:$0xff]  }
   0xd   :  { %v149_v11 = vand.u32 %v2336_v4, %v147_v5  ;;  %v2673_v16 = vld [vmem:[%s3513_s27 + $0x4] sm:$0xff]   ;;  %v2675_v18 = vld [vmem:[%s3513_s27 + $0xc] sm:$0xff]   ;;  %v2677_v20 = vld [vmem:[%s3513_s27 + $0x14] sm:$0xff]  }
   0xe   :  { %v234_v13 = vand.u32 %v2349_v8, %v147_v5  ;;  %v309_v14 = vand.u32 %v2362_v12, %v147_v5  ;;  %v2633_v21 = vld [vmem:[%s3513_s27 + $0x18] sm:$0xff]   ;;  %v2634_v23 = vld [vmem:[%s3513_s27 + $0x20] sm:$0xff]   ;;  %v2635_v25 = vld [vmem:[%s3513_s27 + $0x28] sm:$0xff]  }
   0xf   :  { %158 = vmatpush.bf16.msra.mxu0 %v149_v11  ;;  %v2679_v22 = vld [vmem:[%s3513_s27 + $0x1c] sm:$0xff]   ;;  %v2681_v24 = vld [vmem:[%s3513_s27 + $0x24] sm:$0xff]   ;;  %v2682_v26 = vld [vmem:[%s3513_s27 + $0x2c] sm:$0xff]  }
  0x10   :  { %243 = vmatpush.bf16.msra.mxu1 %v234_v13  ;;  %318 = vmatpush.bf16.msra.mxu2 %v309_v14  ;;  %v2636_v27 = vld [vmem:[%s3513_s27 + $0x30] sm:$0xff]   ;;  %v2637_v29 = vld [vmem:[%s3513_s27 + $0x38] sm:$0xff]   ;;  %v3028_v34 = vld [vmem:[%s3514_s0] ss:$0 sm:$0xff] }
  0x11   :  { %v2689_v28 = vld [vmem:[%s3513_s27 + $0x34] sm:$0xff]  }
  0x12   :  { %2337 = vmatmul.msk.bf16.vlgmr.msra.gmra.mxu0 %vm122_vm2, %v2580_v15 }
  0x13   :  { %2350 = vmatmul.msk.bf16.vlgmr.msra.gmra.mxu1 %vm122_vm2, %v2673_v16  ;;  %2363 = vmatmul.msk.bf16.vlgmr.msra.gmra.mxu2 %vm122_vm2, %v2631_v17 }
  0x14   :  { %593 = vmatpush.bf16.msrb.mxu0 %v584_v33 }
  0x22   :  { %2338 = vmatmul.msk.bf16.gmra.mxu0 %vm122_vm2, %v2631_v17 }
  0x23   :  { %2351 = vmatmul.msk.bf16.gmra.mxu1 %vm122_vm2, %v2675_v18  ;;  %2364 = vmatmul.msk.bf16.gmra.mxu2 %vm122_vm2, %v2632_v19 }
  0x32   :  { %2339 = vmatmul.msk.bf16.gmra.mxu0 %vm122_vm2, %v2632_v19 }
  0x33   :  { %2352 = vmatmul.msk.bf16.gmra.mxu1 %vm122_vm2, %v2677_v20  ;;  %2365 = vmatmul.msk.bf16.gmra.mxu2 %vm122_vm2, %v2633_v21 }
  0x42   :  { %2340 = vmatmul.msk.bf16.gmra.mxu0 %vm122_vm2, %v2633_v21 }
  0x43   :  { %2353 = vmatmul.msk.bf16.gmra.mxu1 %vm122_vm2, %v2679_v22  ;;  %2366 = vmatmul.msk.bf16.gmra.mxu2 %vm122_vm2, %v2634_v23 }
  0x52   :  { %2341 = vmatmul.msk.bf16.gmra.mxu0 %vm122_vm2, %v2634_v23 }
  0x53   :  { %2354 = vmatmul.msk.bf16.gmra.mxu1 %vm122_vm2, %v2681_v24  ;;  %2367 = vmatmul.msk.bf16.gmra.mxu2 %vm122_vm2, %v2635_v25 }
  0x62   :  { %2342 = vmatmul.msk.bf16.gmra.mxu0 %vm122_vm2, %v2635_v25 }
  0x63   :  { %2355 = vmatmul.msk.bf16.gmra.mxu1 %vm122_vm2, %v2682_v26  ;;  %2368 = vmatmul.msk.bf16.gmra.mxu2 %vm122_vm2, %v2636_v27 }
  0x72   :  { %2343 = vmatmul.msk.bf16.gmra.mxu0 %vm122_vm2, %v2636_v27 }
  0x73   :  { %2356 = vmatmul.msk.bf16.gmra.mxu1 %vm122_vm2, %v2689_v28  ;;  %2369 = vmatmul.msk.bf16.gmra.mxu2 %vm122_vm2, %v2637_v29 }
  0x8f   :  { %v160_v35 = vpop.f32.mrf.mxu0 }
  0x90   :  { %v245_v36 = vpop.f32.mrf.mxu1  ;;  %v161_v39 = vadd.f32 %v3028_v34, %v160_v35 }
  0x92   :  { %v280_v40 = vadd.f32 %v245_v36, %v161_v39 }
  0x96   :  { %v320_v41 = vpop.f32.mrf.mxu2 }
  0x97   :  { %v162_v42 = vpop.f32.mrf.mxu0  ;;  %v355_v44 = vadd.f32 %v320_v41, %v280_v40 }
  0x98   :  { %v247_v43 = vpop.f32.mrf.mxu1  ;;  %v163_v45 = vadd.f32 %v3028_v34, %v162_v42 }
  0x99   :  { %v369_v46 = vmax.f32 %v355_v44, 0.0 }
  0x9a   :  { %v281_v47 = vadd.f32 %v247_v43, %v163_v45 }
  0x9b   :  { %v383_v53 = vpack.c.bf16 %v369_v46, %v369_v46 }
  0x9d   :  { %v414_v57 = vunpack.c.l.b16 %v383_v53 }
  0x9e   :  { %v322_v48 = vpop.f32.mrf.mxu2 }
  0x9f   :  { %v165_v49 = vpop.f32.mrf.mxu0  ;;  %v356_v50 = vadd.f32 %v322_v48, %v281_v47 }
  0xa0   :  { %v166_v51 = vadd.f32 %v3028_v34, %v165_v49  ;;  %v250_v52 = vpop.f32.mrf.mxu1 }
  0xa1   :  { %v370_v54 = vmax.f32 %v356_v50, 0.0 }
  0xa2   :  { %v282_v56 = vadd.f32 %v250_v52, %v166_v51 }
  0xa3   :  { %v384_v55 = vpack.c.bf16 %v370_v54, %v370_v54 }
  0xa5   :  { %v415_v58 = vunpack.c.l.b16 %v384_v55 }
  0xa6   :  { %v325_v59 = vpop.f32.mrf.mxu2 }
  0xa7   :  { %v167_v60 = vpop.f32.mrf.mxu0  ;;  %v357_v61 = vadd.f32 %v325_v59, %v282_v56  ;;  %v426_v63 = vpack.c.b16 %v415_v58, %v414_v57 }
  0xa8   :  { %v252_v62 = vpop.f32.mrf.mxu1  ;;  %v168_v1 = vadd.f32 %v3028_v34, %v167_v60 }
  0xa9   :  { %v371_v0 = vmax.f32 %v357_v61, 0.0  ;;  %2370 = vmatmul.msk.bf16.vlgmr.msra.gmra.mxu3 %vm432_vm3, %v426_v63 }
  0xaa   :  { %v283_v4 = vadd.f32 %v252_v62, %v168_v1 }
  0xab   :  { %v385_v2 = vpack.c.bf16 %v371_v0, %v371_v0 }
  0xad   :  { %v416_v3 = vunpack.c.l.b16 %v385_v2 }
  0xae   :  { %v327_v5 = vpop.f32.mrf.mxu2 }
  0xaf   :  { %v170_v6 = vpop.f32.mrf.mxu0  ;;  %v3039_v7 = vpack.c.b16 %v416_v3, %v415_v58  ;;  %v358_v8 = vadd.f32 %v327_v5, %v283_v4 }
  0xb0   :  { %v171_v9 = vadd.f32 %v3028_v34, %v170_v6  ;;  %v255_v10 = vpop.f32.mrf.mxu1 }
  0xb1   :  { %v372_v11 = vmax.f32 %v358_v8, 0.0 }
  0xb2   :  { %v284_v13 = vadd.f32 %v255_v10, %v171_v9 }
  0xb3   :  { %v386_v12 = vpack.c.bf16 %v372_v11, %v372_v11 }
  0xb5   :  { %v417_v14 = vunpack.c.l.b16 %v386_v12 }
  0xb6   :  { %v330_v15 = vpop.f32.mrf.mxu2 }
  0xb7   :  { %v172_v16 = vpop.f32.mrf.mxu0  ;;  %v359_v17 = vadd.f32 %v330_v15, %v284_v13  ;;  %v427_v19 = vpack.c.b16 %v417_v14, %v416_v3 }
  0xb8   :  { %v257_v18 = vpop.f32.mrf.mxu1  ;;  %v173_v21 = vadd.f32 %v3028_v34, %v172_v16 }
  0xb9   :  { %v373_v20 = vmax.f32 %v359_v17, 0.0  ;;  %2371 = vmatmul.msk.bf16.gmra.mxu3 %vm432_vm3, %v427_v19  ;;  %2384 = vmatmul.msk.bf16.vlgmr.msrb.gmra.mxu0 %vm432_vm3, %v427_v19 }
  0xba   :  { %v285_v24 = vadd.f32 %v257_v18, %v173_v21 }
  0xbb   :  { %v387_v22 = vpack.c.bf16 %v373_v20, %v373_v20 }
  0xbd   :  { %v418_v23 = vunpack.c.l.b16 %v387_v22 }
  0xbe   :  { %v332_v25 = vpop.f32.mrf.mxu2 }
  0xbf   :  { %v175_v26 = vpop.f32.mrf.mxu0  ;;  %v360_v27 = vadd.f32 %v332_v25, %v285_v24  ;;  %v3046_v30 = vpack.c.b16 %v418_v23, %v417_v14 }
  0xc0   :  { %v176_v28 = vadd.f32 %v3028_v34, %v175_v26  ;;  %v260_v29 = vpop.f32.mrf.mxu1 }
  0xc1   :  { %v374_v31 = vmax.f32 %v360_v27, 0.0 }
  0xc2   :  { %v286_v33 = vadd.f32 %v260_v29, %v176_v28 }
  0xc3   :  { %v388_v32 = vpack.c.bf16 %v374_v31, %v374_v31  ;;  %v2557_v31 = vld [vmem:[%s3493_s5] sm:$0xff] }
  0xc4   :  { %721 = vmatpush.bf16.msrb.mxu1 %v2557_v31 }
  0xc5   :  { %v419_v35 = vunpack.c.l.b16 %v388_v32 }
  0xc6   :  { %v335_v36 = vpop.f32.mrf.mxu2 }
  0xc7   :  { %v177_v37 = vpop.f32.mrf.mxu0  ;;  %v361_v38 = vadd.f32 %v335_v36, %v286_v33  ;;  %v428_v40 = vpack.c.b16 %v419_v35, %v418_v23 }
  0xc8   :  { %v262_v39 = vpop.f32.mrf.mxu1  ;;  %v178_v42 = vadd.f32 %v3028_v34, %v177_v37 }
  0xc9   :  { %v375_v41 = vmax.f32 %v361_v38, 0.0  ;;  %2372 = vmatmul.msk.bf16.gmra.mxu3 %vm432_vm3, %v428_v40  ;;  %2385 = vmatmul.msk.bf16.gmra.mxu0 %vm432_vm3, %v428_v40 }
  0xca   :  { %v287_v45 = vadd.f32 %v262_v39, %v178_v42 }
  0xcb   :  { %v389_v43 = vpack.c.bf16 %v375_v41, %v375_v41 }
  0xcd   :  { %v420_v44 = vunpack.c.l.b16 %v389_v43 }
  0xce   :  { %v337_v46 = vpop.f32.mrf.mxu2 }
  0xcf   :  { %v180_v47 = vpop.f32.mrf.mxu0  ;;  %v362_v48 = vadd.f32 %v337_v46, %v287_v45  ;;  %v499_v51 = vpack.c.b16 %v420_v44, %v419_v35 }
  0xd0   :  { %v181_v49 = vadd.f32 %v3028_v34, %v180_v47  ;;  %v265_v50 = vpop.f32.mrf.mxu1 }
  0xd1   :  { %v376_v52 = vmax.f32 %v362_v48, 0.0 }
  0xd2   :  { %v288_v54 = vadd.f32 %v265_v50, %v181_v49 }
  0xd3   :  { %v390_v53 = vpack.c.bf16 %v376_v52, %v376_v52 }
  0xd5   :  { %v421_v55 = vunpack.c.l.b16 %v390_v53 }
  0xd6   :  { %v340_v56 = vpop.f32.mrf.mxu2 }
  0xd7   :  { %v182_v57 = vpop.f32.mrf.mxu0  ;;  %v363_v58 = vadd.f32 %v340_v56, %v288_v54  ;;  %v429_v59 = vpack.c.b16 %v421_v55, %v420_v44 }
  0xd8   :  { %v267_v60 = vpop.f32.mrf.mxu1  ;;  %v183_v62 = vadd.f32 %v3028_v34, %v182_v57 }
  0xd9   :  { %v377_v61 = vmax.f32 %v363_v58, 0.0  ;;  %2373 = vmatmul.msk.bf16.gmra.mxu3 %vm432_vm3, %v429_v59  ;;  %2386 = vmatmul.msk.bf16.gmra.mxu0 %vm432_vm3, %v429_v59 }
  0xda   :  { %v289_v1 = vadd.f32 %v267_v60, %v183_v62 }
  0xdb   :  { %v391_v63 = vpack.c.bf16 %v377_v61, %v377_v61 }
  0xdd   :  { %v422_v0 = vunpack.c.l.b16 %v391_v63 }
  0xde   :  { %v342_v2 = vpop.f32.mrf.mxu2 }
  0xdf   :  { %v185_v3 = vpop.f32.mrf.mxu0  ;;  %v364_v4 = vadd.f32 %v342_v2, %v289_v1  ;;  %v500_v6 = vpack.c.b16 %v422_v0, %v421_v55  ;;  %v2558_v55 = vld [vmem:[%s3493_s5 + $0x8] sm:$0xff]  ;;  %v3093_v1 = vld [vmem:[%s3492_s4] ss:$0 sm:$0xff]  ;;  %v2559_v2 = vld [vmem:[%s3493_s5 + $0x10] sm:$0xff] }
  0xe0   :  { %v186_v5 = vadd.f32 %v3028_v34, %v185_v3  ;;  %v270_v9 = vpop.f32.mrf.mxu1  ;;  %786 = vmatpush.bf16.msrb.mxu2 %v2558_v55  ;;  %845 = vmatpush.bf16.msra.mxu1 %v2559_v2 }
  0xe1   :  { %v378_v8 = vmax.f32 %v364_v4, 0.0 }
  0xe2   :  { %v290_v11 = vadd.f32 %v270_v9, %v186_v5 }
  0xe3   :  { %v392_v10 = vpack.c.bf16 %v378_v8, %v378_v8 }
  0xe5   :  { %v423_v12 = vunpack.c.l.b16 %v392_v10 }
  0xe6   :  { %v345_v13 = vpop.f32.mrf.mxu2 }
  0xe7   :  { %v187_v14 = vpop.f32.mrf.mxu0  ;;  %v365_v15 = vadd.f32 %v345_v13, %v290_v11  ;;  %v430_v16 = vpack.c.b16 %v423_v12, %v422_v0 }
  0xe8   :  { %v188_v18 = vadd.f32 %v3028_v34, %v187_v14  ;;  %v272_v20 = vpop.f32.mrf.mxu1 }
  0xe9   :  { %v379_v17 = vmax.f32 %v365_v15, 0.0  ;;  %2374 = vmatmul.msk.bf16.gmra.mxu3 %vm432_vm3, %v430_v16  ;;  %2387 = vmatmul.msk.bf16.gmra.mxu0 %vm432_vm3, %v430_v16 }
  0xea   :  { %v291_v22 = vadd.f32 %v272_v20, %v188_v18 }
  0xeb   :  { %v393_v19 = vpack.c.bf16 %v379_v17, %v379_v17 }
  0xed   :  { %v424_v21 = vunpack.c.l.b16 %v393_v19 }
  0xee   :  { %v347_v23 = vpop.f32.mrf.mxu2 }
  0xef   :  { %v366_v24 = vadd.f32 %v347_v23, %v291_v22  ;;  %v501_v25 = vpack.c.b16 %v424_v21, %v423_v12  ;;  %v190_v32 = vpop.f32.mrf.mxu0 }
  0xf0   :  { %v275_v33 = vpop.f32.mrf.mxu1  ;;  %v191_v35 = vadd.f32 %v3028_v34, %v190_v32 }
  0xf1   :  { %v380_v26 = vmax.f32 %v366_v24, 0.0 }
  0xf2   :  { %v292_v36 = vadd.f32 %v275_v33, %v191_v35 }
  0xf3   :  { %v394_v27 = vpack.c.bf16 %v380_v26, %v380_v26 }
  0xf5   :  { %v425_v28 = vunpack.c.l.b16 %v394_v27 }
  0xf6   :  { %v350_v38 = vpop.f32.mrf.mxu2 }
  0xf7   :  { %v431_v29 = vpack.c.b16 %v425_v28, %v424_v21  ;;  %v192_v39 = vpop.f32.mrf.mxu0  ;;  %v367_v41 = vadd.f32 %v350_v38, %v292_v36 }
  0xf8   :  { %v277_v40 = vpop.f32.mrf.mxu1 }
  0xf9   :  { %2375 = vmatmul.msk.bf16.gmra.mxu3 %vm432_vm3, %v431_v29  ;;  %2388 = vmatmul.msk.bf16.gmra.mxu0 %vm432_vm3, %v431_v29  ;;  %v381_v43 = vmax.f32 %v367_v41, 0.0 }
  0xfe   :  { %v352_v45 = vpop.f32.mrf.mxu2 }
 0x109   :  { %2377 = vmatmul.msk.bf16.vlgmr.msrb.gmra.mxu3 %vm432_vm3, %v3039_v7  ;;  %v193_v7 = vadd.f32 %v3028_v34, %v192_v39 }
 0x10b   :  { %v293_v42 = vadd.f32 %v277_v40, %v193_v7 }
 0x10d   :  { %v368_v46 = vadd.f32 %v352_v45, %v293_v42 }
 0x10f   :  { %v382_v47 = vmax.f32 %v368_v46, 0.0 }
 0x111   :  { %v396_v48 = vpack.c.bf16 %v382_v47, %v382_v47 }
 0x119   :  { %2378 = vmatmul.msk.bf16.gmra.mxu3 %vm432_vm3, %v3046_v30  ;;  %v395_v30 = vpack.c.bf16 %v381_v43, %v381_v43 }
 0x11b   :  { %v496_v49 = vunpack.c.l.b16 %v395_v30 }
 0x11d   :  { %v502_v56 = vpack.c.b16 %v496_v49, %v425_v28 }
 0x129   :  { %2379 = vmatmul.msk.bf16.gmra.mxu3 %vm432_vm3, %v499_v51  ;;  %v578_v51 = vunpack.c.l.b16 %v396_v48 }
 0x12b   :  { %v579_v52 = vpack.c.b16 %v578_v51, %v496_v49 }
 0x12c   :  { %v463_v37 = vpop.f32.mrf.mxu3 }
 0x12d   :  { %2389 = vmatmul.msk.bf16.gmra.mxu0 %vm432_vm3, %v579_v52  ;;  %v464_v3 = vadd.f32 %v3093_v1, %v463_v37 }
 0x134   :  { %v465_v44 = vpop.f32.mrf.mxu3 }
 0x135   :  { %v466_v9 = vadd.f32 %v3093_v1, %v465_v44 }
 0x136   :  { %v595_v61 = vpop.f32.mrf.mxu0 }
 0x139   :  { %2380 = vmatmul.msk.bf16.gmra.mxu3 %vm432_vm3, %v500_v6 }
 0x13c   :  { %v468_v50 = vpop.f32.mrf.mxu3 }
 0x13d   :  { %v469_v17 = vadd.f32 %v3093_v1, %v468_v50 }
 0x13e   :  { %v597_v63 = vpop.f32.mrf.mxu0 }
 0x144   :  { %v470_v53 = vpop.f32.mrf.mxu3 }
 0x145   :  { %v471_v27 = vadd.f32 %v3093_v1, %v470_v53 }
 0x146   :  { %v600_v6 = vpop.f32.mrf.mxu0 }
 0x149   :  { %2381 = vmatmul.msk.bf16.gmra.mxu3 %vm432_vm3, %v501_v25 }
 0x14c   :  { %v473_v34 = vpop.f32.mrf.mxu3 }
 0x14d   :  { %v474_v37 = vadd.f32 %v3093_v1, %v473_v34 }
 0x14e   :  { %v602_v14 = vpop.f32.mrf.mxu0 }
 0x154   :  { %v475_v54 = vpop.f32.mrf.mxu3 }
 0x155   :  { %v476_v45 = vadd.f32 %v3093_v1, %v475_v54 }
 0x156   :  { %v605_v26 = vpop.f32.mrf.mxu0 }
 0x159   :  { %2382 = vmatmul.msk.bf16.gmra.mxu3 %vm432_vm3, %v502_v56 }
 0x15c   :  { %v3078_v57 = vpop.f32.mrf.mxu3 }
 0x15d   :  { %v479_v53 = vadd.f32 %v3093_v1, %v3078_v57 }
 0x15e   :  { %v607_v39 = vpop.f32.mrf.mxu0 }
 0x164   :  { %v3080_v58 = vpop.f32.mrf.mxu3 }
 0x166   :  { %v610_v49 = vpop.f32.mrf.mxu0 }
 0x16c   :  { %v3082_v59 = vpop.f32.mrf.mxu3 }
 0x16e   :  { %v612_v54 = vpop.f32.mrf.mxu0 }
 0x174   :  { %v3084_v60 = vpop.f32.mrf.mxu3 }
 0x17c   :  { %v3086_v62 = vpop.f32.mrf.mxu3 }
 0x184   :  { %v3088_v0 = vpop.f32.mrf.mxu3 }
 0x18c   :  { %v533_v4 = vpop.f32.mrf.mxu3 }
 0x18d   :  { %v563_v5 = vadd.f32 %v533_v4, %v464_v3  ;;  %v481_v4 = vadd.f32 %v3093_v1, %v3080_v58 }
 0x18f   :  { %v625_v8 = vadd.f32 %v595_v61, %v563_v5 }
 0x191   :  { %v637_v11 = vmax.f32 %v625_v8, 0.0 }
 0x193   :  { %v649_v15 = vpack.c.bf16 %v637_v11, %v637_v11 }
 0x194   :  { %v535_v10 = vpop.f32.mrf.mxu3 }
 0x195   :  { %v564_v12 = vadd.f32 %v535_v10, %v466_v9  ;;  %v677_v20 = vunpack.c.l.b16 %v649_v15 }
 0x197   :  { %v626_v13 = vadd.f32 %v597_v63, %v564_v12  ;;  %v615_v12 = vpop.f32.mrf.mxu0 }
 0x199   :  { %v638_v16 = vmax.f32 %v626_v13, 0.0  ;;  %v484_v13 = vadd.f32 %v3093_v1, %v3082_v59 }
 0x19b   :  { %v650_v18 = vpack.c.bf16 %v638_v16, %v638_v16 }
 0x19c   :  { %v538_v19 = vpop.f32.mrf.mxu3 }
 0x19d   :  { %v678_v21 = vunpack.c.l.b16 %v650_v18  ;;  %v565_v22 = vadd.f32 %v538_v19, %v469_v17 }
 0x19f   :  { %v687_v23 = vpack.c.b16 %v678_v21, %v677_v20  ;;  %v627_v24 = vadd.f32 %v600_v6, %v565_v22  ;;  %v486_v20 = vadd.f32 %v3093_v1, %v3084_v60  ;;  %v617_v22 = vpop.f32.mrf.mxu0 }
 0x1a1   :  { %v639_v25 = vmax.f32 %v627_v24, 0.0  ;;  %2394 = vmatmul.msk.bf16.vlgmr.msrb.gmra.mxu1 %vm698_vm4, %v687_v23 }
 0x1a3   :  { %v651_v28 = vpack.c.bf16 %v639_v25, %v639_v25 }
 0x1a4   :  { %v540_v29 = vpop.f32.mrf.mxu3 }
 0x1a5   :  { %v679_v31 = vunpack.c.l.b16 %v651_v28  ;;  %v566_v32 = vadd.f32 %v540_v29, %v471_v27  ;;  %v489_v28 = vadd.f32 %v3093_v1, %v3086_v62  ;;  %v2563_v62 = vld [vmem:[%s3495_s7 + $0x18] sm:$0xff] }
 0x1a6   :  { %1025 = vmatpush.bf16.msra.mxu3 %v2563_v62 }
 0x1a7   :  { %v753_v33 = vpack.c.b16 %v679_v31, %v678_v21  ;;  %v628_v35 = vadd.f32 %v602_v14, %v566_v32 }
 0x1a9   :  { %v640_v36 = vmax.f32 %v628_v35, 0.0  ;;  %2405 = vmatmul.msk.bf16.vlgmr.msrb.gmra.mxu2 %vm698_vm4, %v753_v33 }
 0x1aa   :  { %v620_v32 = vpop.f32.mrf.mxu0 }
 0x1ab   :  { %v652_v38 = vpack.c.bf16 %v640_v36, %v640_v36 }
 0x1ac   :  { %v543_v7 = vpop.f32.mrf.mxu3 }
 0x1ad   :  { %v680_v40 = vunpack.c.l.b16 %v652_v38  ;;  %v567_v41 = vadd.f32 %v543_v7, %v474_v37 }
 0x1af   :  { %v629_v42 = vadd.f32 %v605_v26, %v567_v41  ;;  %v3105_v43 = vpack.c.b16 %v680_v40, %v679_v31  ;;  %v2561_v41 = vld [vmem:[%s3495_s7 + $0x8] sm:$0xff] }
 0x1b0   :  { %961 = vmatpush.bf16.msra.mxu2 %v2561_v41 }
 0x1b1   :  { %v641_v44 = vmax.f32 %v629_v42, 0.0  ;;  %2395 = vmatmul.msk.bf16.gmra.mxu1 %vm698_vm4, %v3105_v43 }
 0x1b3   :  { %v653_v46 = vpack.c.bf16 %v641_v44, %v641_v44 }
 0x1b4   :  { %v545_v30 = vpop.f32.mrf.mxu3 }
 0x1b5   :  { %v681_v47 = vunpack.c.l.b16 %v653_v46  ;;  %v568_v48 = vadd.f32 %v545_v30, %v476_v45  ;;  %v622_v45 = vpop.f32.mrf.mxu0 }
 0x1b7   :  { %v630_v50 = vadd.f32 %v607_v39, %v568_v48  ;;  %v754_v51 = vpack.c.b16 %v681_v47, %v680_v40  ;;  %v2565_v40 = vld [vmem:[%s3495_s7 + $0x28] sm:$0xff] }
 0x1b8   :  { %1085 = vmatpush.bf16.msra.mxu0 %v2565_v40 }
 0x1b9   :  { %v642_v52 = vmax.f32 %v630_v50, 0.0  ;;  %2406 = vmatmul.msk.bf16.gmra.mxu2 %vm698_vm4, %v754_v51 }
 0x1bb   :  { %v654_v34 = vpack.c.bf16 %v642_v52, %v642_v52 }
 0x1bc   :  { %v548_v55 = vpop.f32.mrf.mxu3 }
 0x1bd   :  { %v682_v56 = vunpack.c.l.b16 %v654_v34  ;;  %v569_v61 = vadd.f32 %v548_v55, %v479_v53  ;;  %v2560_v34 = vld [vmem:[%s3495_s7] sm:$0xff] }
 0x1be   :  { %v2564_v55 = vld [vmem:[%s3495_s7 + $0x20] sm:$0xff]  ;;  %962 = vmatpush.bf16.msra.mxu2 %v2560_v34 }
 0x1bf   :  { %v631_v63 = vadd.f32 %v610_v49, %v569_v61  ;;  %v689_v2 = vpack.c.b16 %v682_v56, %v681_v47  ;;  %1086 = vmatpush.bf16.msra.mxu0 %v2564_v55 }
 0x1c1   :  { %v643_v3 = vmax.f32 %v631_v63, 0.0  ;;  %2396 = vmatmul.msk.bf16.gmra.mxu1 %vm698_vm4, %v689_v2 }
 0x1c3   :  { %v655_v5 = vpack.c.bf16 %v643_v3, %v643_v3 }
 0x1c4   :  { %v550_v6 = vpop.f32.mrf.mxu3 }
 0x1c5   :  { %v683_v8 = vunpack.c.l.b16 %v655_v5  ;;  %v570_v9 = vadd.f32 %v550_v6, %v481_v4  ;;  %v3162_v4 = vld [vmem:[%s3494_s6] ss:$0 sm:$0xff] }
 0x1c7   :  { %v632_v10 = vadd.f32 %v612_v54, %v570_v9  ;;  %v755_v11 = vpack.c.b16 %v683_v8, %v682_v56 }
 0x1c9   :  { %v644_v57 = vmax.f32 %v632_v10, 0.0  ;;  %2407 = vmatmul.msk.bf16.gmra.mxu2 %vm698_vm4, %v755_v11 }
 0x1cb   :  { %v656_v14 = vpack.c.bf16 %v644_v57, %v644_v57 }
 0x1cc   :  { %v553_v15 = vpop.f32.mrf.mxu3 }
 0x1cd   :  { %v684_v16 = vunpack.c.l.b16 %v656_v14  ;;  %v571_v17 = vadd.f32 %v553_v15, %v484_v13 }
 0x1cf   :  { %v633_v18 = vadd.f32 %v615_v12, %v571_v17  ;;  %v690_v19 = vpack.c.b16 %v684_v16, %v683_v8 }
 0x1d1   :  { %v645_v58 = vmax.f32 %v633_v18, 0.0  ;;  %2397 = vmatmul.msk.bf16.gmra.mxu1 %vm698_vm4, %v690_v19 }
 0x1d3   :  { %v657_v21 = vpack.c.bf16 %v645_v58, %v645_v58 }
 0x1d4   :  { %v555_v23 = vpop.f32.mrf.mxu3 }
 0x1d5   :  { %v685_v24 = vunpack.c.l.b16 %v657_v21  ;;  %v572_v25 = vadd.f32 %v555_v23, %v486_v20 }
 0x1d7   :  { %v634_v26 = vadd.f32 %v617_v22, %v572_v25  ;;  %v756_v27 = vpack.c.b16 %v685_v24, %v684_v16 }
 0x1d9   :  { %v646_v59 = vmax.f32 %v634_v26, 0.0  ;;  %2408 = vmatmul.msk.bf16.gmra.mxu2 %vm698_vm4, %v756_v27 }
 0x1db   :  { %v658_v29 = vpack.c.bf16 %v646_v59, %v646_v59 }
 0x1dc   :  { %v558_v31 = vpop.f32.mrf.mxu3 }
 0x1dd   :  { %v686_v33 = vunpack.c.l.b16 %v658_v29  ;;  %v573_v35 = vadd.f32 %v558_v31, %v489_v28 }
 0x1df   :  { %v635_v36 = vadd.f32 %v620_v32, %v573_v35  ;;  %v691_v60 = vpack.c.b16 %v686_v33, %v685_v24 }
 0x1e1   :  { %v647_v37 = vmax.f32 %v635_v36, 0.0  ;;  %2398 = vmatmul.msk.bf16.gmra.mxu1 %vm698_vm4, %v691_v60 }
 0x1e3   :  { %v659_v38 = vpack.c.bf16 %v647_v37, %v647_v37 }
 0x1e4   :  { %v560_v42 = vpop.f32.mrf.mxu3 }
 0x1e5   :  { %v752_v39 = vunpack.c.l.b16 %v659_v38 }
 0x1e7   :  { %v757_v7 = vpack.c.b16 %v752_v39, %v686_v33 }
 0x1e9   :  { %2409 = vmatmul.msk.bf16.gmra.mxu2 %vm698_vm4, %v757_v7 }
 0x1f1   :  { %2416 = vmatmul.msk.bf16.vlgmr.msra.gmra.mxu1 %vm698_vm4, %v3105_v43  ;;  %v491_v43 = vadd.f32 %v3093_v1, %v3088_v0  ;;  %v2562_v0 = vld [vmem:[%s3495_s7 + $0x10] sm:$0xff] }
 0x1f2   :  { %1026 = vmatpush.bf16.msra.mxu3 %v2562_v0 }
 0x1f3   :  { %v574_v44 = vadd.f32 %v560_v42, %v491_v43 }
 0x1f5   :  { %v636_v30 = vadd.f32 %v622_v45, %v574_v44 }
 0x1f7   :  { %v648_v47 = vmax.f32 %v636_v30, 0.0 }
 0x1f9   :  { %v660_v49 = vpack.c.bf16 %v648_v47, %v648_v47 }
 0x1fb   :  { %v827_v50 = vunpack.c.l.b16 %v660_v49 }
 0x1fd   :  { %v828_v52 = vpack.c.b16 %v827_v50, %v752_v39 }
 0x201   :  { %2417 = vmatmul.msk.bf16.gmra.mxu1 %vm698_vm4, %v689_v2 }
 0x211   :  { %2418 = vmatmul.msk.bf16.gmra.mxu1 %vm698_vm4, %v690_v19 }
 0x21e   :  { %v723_v46 = vpop.f32.mrf.mxu1 }
 0x21f   :  { %v724_v9 = vadd.f32 %v3162_v4, %v723_v46 }
 0x221   :  { %2419 = vmatmul.msk.bf16.gmra.mxu1 %vm698_vm4, %v691_v60 }
 0x226   :  { %v725_v48 = vpop.f32.mrf.mxu1 }
 0x227   :  { %v726_v12 = vadd.f32 %v3162_v4, %v725_v48 }
 0x22c   :  { %v788_v2 = vpop.f32.mrf.mxu2 }
 0x22d   :  { %v813_v11 = vadd.f32 %v788_v2, %v724_v9 }
 0x22e   :  { %v728_v51 = vpop.f32.mrf.mxu1 }
 0x22f   :  { %v729_v58 = vadd.f32 %v3162_v4, %v728_v51 }
 0x231   :  { %2420 = vmatmul.msk.bf16.gmra.mxu1 %vm698_vm4, %v828_v52 }
 0x234   :  { %v790_v3 = vpop.f32.mrf.mxu2 }
 0x235   :  { %v814_v13 = vadd.f32 %v790_v3, %v726_v12 }
 0x236   :  { %v730_v53 = vpop.f32.mrf.mxu1 }
 0x237   :  { %v731_v28 = vadd.f32 %v3162_v4, %v730_v53 }
 0x23c   :  { %v793_v8 = vpop.f32.mrf.mxu2 }
 0x23d   :  { %v815_v21 = vadd.f32 %v793_v8, %v729_v58 }
 0x23e   :  { %v733_v1 = vpop.f32.mrf.mxu1 }
 0x23f   :  { %v734_v38 = vadd.f32 %v3162_v4, %v733_v1 }
 0x244   :  { %v795_v15 = vpop.f32.mrf.mxu2 }
 0x245   :  { %v816_v31 = vadd.f32 %v795_v15, %v731_v28 }
 0x246   :  { %v735_v56 = vpop.f32.mrf.mxu1 }
 0x247   :  { %v736_v44 = vadd.f32 %v3162_v4, %v735_v56 }
 0x24c   :  { %v798_v27 = vpop.f32.mrf.mxu2 }
 0x24d   :  { %v817_v7 = vadd.f32 %v798_v27, %v734_v38 }
 0x24e   :  { %v3153_v61 = vpop.f32.mrf.mxu1 }
 0x24f   :  { %v739_v52 = vadd.f32 %v3162_v4, %v3153_v61  ;;  %v3188_v61 = vld [vmem:[%s3498_s10 + $0x8] sm:$0xff] }
 0x250   :  { %1249 = vmatpush.bf16.msrb.mxu3 %v3188_v61  ;;  %1405 = vmatpush.bf16.msrb.mxu1 %v3188_v61 }
 0x254   :  { %v800_v37 = vpop.f32.mrf.mxu2 }
 0x255   :  { %v818_v30 = vadd.f32 %v800_v37, %v736_v44 }
 0x256   :  { %v3155_v63 = vpop.f32.mrf.mxu1 }
 0x257   :  { %v741_v8 = vadd.f32 %v3162_v4, %v3155_v63  ;;  %v2567_v63 = vld [vmem:[%s3497_s9 + $0x8] sm:$0xff] }
 0x25c   :  { %v803_v46 = vpop.f32.mrf.mxu2 }
 0x25d   :  { %v819_v0 = vadd.f32 %v803_v46, %v739_v52 }
 0x25e   :  { %v3157_v54 = vpop.f32.mrf.mxu1 }
 0x264   :  { %v805_v34 = vpop.f32.mrf.mxu2 }
 0x266   :  { %v745_v5 = vpop.f32.mrf.mxu1 }
 0x267   :  { %v3165_v6 = vadd.f32 %v3162_v4, %v745_v5  ;;  %v2569_v5 = vld [vmem:[%s3497_s9 + $0x18] sm:$0xff] }
 0x268   :  { %1181 = vmatpush.bf16.msrb.mxu2 %v2569_v5 }
 0x26c   :  { %v808_v15 = vpop.f32.mrf.mxu2 }
 0x26e   :  { %v847_v10 = vpop.f32.mrf.mxu1 }
 0x26f   :  { %v872_v57 = vadd.f32 %v847_v10, %v813_v11  ;;  %v2568_v10 = vld [vmem:[%s3497_s9 + $0x10] sm:$0xff]  ;;  %v820_v11 = vadd.f32 %v805_v34, %v741_v8 }
 0x270   :  { %1182 = vmatpush.bf16.msrb.mxu2 %v2568_v10 }
 0x271   :  { %v882_v14 = vmax.f32 %v872_v57, 0.0 }
 0x273   :  { %v892_v18 = vpack.c.bf16 %v882_v14, %v882_v14 }
 0x274   :  { %1183 = vmatpush.bf16.msrb.mxu2 %v2567_v63 }
 0x275   :  { %v918_v22 = vunpack.c.l.b16 %v892_v18 }
 0x276   :  { %v849_v16 = vpop.f32.mrf.mxu1 }
 0x277   :  { %v873_v17 = vadd.f32 %v849_v16, %v814_v13 }
 0x279   :  { %v883_v19 = vmax.f32 %v873_v17, 0.0  ;;  %v744_v17 = vadd.f32 %v3162_v4, %v3157_v54 }
 0x27b   :  { %v893_v20 = vpack.c.bf16 %v883_v19, %v883_v19  ;;  %v821_v19 = vadd.f32 %v808_v15, %v744_v17 }
 0x27d   :  { %v919_v23 = vunpack.c.l.b16 %v893_v20 }
 0x27e   :  { %v852_v24 = vpop.f32.mrf.mxu1 }
 0x27f   :  { %v926_v25 = vpack.c.b16 %v919_v23, %v918_v22  ;;  %v874_v26 = vadd.f32 %v852_v24, %v815_v21  ;;  %v810_v24 = vpop.f32.mrf.mxu2 }
 0x281   :  { %v884_v59 = vmax.f32 %v874_v26, 0.0  ;;  %2429 = vmatmul.msk.bf16.vlgmr.msra.gmra.mxu2 %vm942_vm5, %v926_v25  ;;  %v822_v26 = vadd.f32 %v810_v24, %v3165_v6  ;;  %v3215_v6 = vld [vmem:[%s3498_s10] sm:$0xff]  ;;  %s2834_s10 = smov 32  }
 0x282   :  { %1250 = vmatpush.bf16.msrb.mxu3 %v3215_v6  ;;  %1406 = vmatpush.bf16.msrb.mxu1 %v3215_v6 }
 0x283   :  { %v894_v29 = vpack.c.bf16 %v884_v59, %v884_v59 }
 0x285   :  { %v920_v32 = vunpack.c.l.b16 %v894_v29 }
 0x286   :  { %v854_v33 = vpop.f32.mrf.mxu1 }
 0x287   :  { %v991_v35 = vpack.c.b16 %v920_v32, %v919_v23  ;;  %v875_v36 = vadd.f32 %v854_v33, %v816_v31  ;;  %v2566_v33 = vld [vmem:[%s3497_s9] sm:$0xff] }
 0x288   :  { %1184 = vmatpush.bf16.msrb.mxu2 %v2566_v33 }
 0x289   :  { %v885_v60 = vmax.f32 %v875_v36, 0.0  ;;  %2445 = vmatmul.msk.bf16.vlgmr.msra.gmra.mxu3 %vm942_vm5, %v991_v35  ;;  %v2698_v36 = vld [vmem:[%s3496_s8] ss:$0 sm:$0xff] }
 0x28b   :  { %v895_v39 = vpack.c.bf16 %v885_v60, %v885_v60  ;;  %v2833_v60 = vmov 0  }
 0x28c   :  { %2025 = vmatpush.bf16.msra.mxu2 %v3188_v61 }
 0x28d   :  { %v921_v62 = vunpack.c.l.b16 %v895_v39 }
 0x28e   :  { %v857_v40 = vpop.f32.mrf.mxu1 }
 0x28f   :  { %v927_v41 = vpack.c.b16 %v921_v62, %v920_v32  ;;  %v876_v42 = vadd.f32 %v857_v40, %v817_v7 }
 0x290   :  { %2026 = vmatpush.bf16.msra.mxu2 %v3215_v6 }
 0x291   :  { %v886_v43 = vmax.f32 %v876_v42, 0.0  ;;  %2430 = vmatmul.msk.bf16.gmra.mxu2 %vm942_vm5, %v927_v41  ;;  %2461 = vmatmul.msk.bf16.vlgmr.msra.gmra.mxu0 %vm942_vm5, %v927_v41 }
 0x293   :  { %v896_v45 = vpack.c.bf16 %v886_v43, %v886_v43 }
 0x295   :  { %v922_v47 = vunpack.c.l.b16 %v896_v45 }
 0x296   :  { %v859_v48 = vpop.f32.mrf.mxu1 }
 0x297   :  { %v992_v49 = vpack.c.b16 %v922_v47, %v921_v62  ;;  %v877_v50 = vadd.f32 %v859_v48, %v818_v30 }
 0x299   :  { %v887_v51 = vmax.f32 %v877_v50, 0.0  ;;  %2446 = vmatmul.msk.bf16.gmra.mxu3 %vm942_vm5, %v992_v49 }
 0x29b   :  { %v897_v53 = vpack.c.bf16 %v887_v51, %v887_v51 }
 0x29d   :  { %v923_v1 = vunpack.c.l.b16 %v897_v53 }
 0x29e   :  { %v862_v55 = vpop.f32.mrf.mxu1 }
 0x29f   :  { %v928_v2 = vpack.c.b16 %v923_v1, %v922_v47  ;;  %v878_v56 = vadd.f32 %v862_v55, %v819_v0 }
 0x2a1   :  { %v888_v3 = vmax.f32 %v878_v56, 0.0  ;;  %2431 = vmatmul.msk.bf16.gmra.mxu2 %vm942_vm5, %v928_v2  ;;  %2462 = vmatmul.msk.bf16.gmra.mxu0 %vm942_vm5, %v928_v2 }
 0x2a3   :  { %v898_v9 = vpack.c.bf16 %v888_v3, %v888_v3 }
 0x2a5   :  { %v924_v57 = vunpack.c.l.b16 %v898_v9 }
 0x2a6   :  { %v864_v12 = vpop.f32.mrf.mxu1 }
 0x2a7   :  { %v993_v13 = vpack.c.b16 %v924_v57, %v923_v1  ;;  %v879_v14 = vadd.f32 %v864_v12, %v820_v11 }
 0x2a9   :  { %v889_v16 = vmax.f32 %v879_v14, 0.0  ;;  %2447 = vmatmul.msk.bf16.gmra.mxu3 %vm942_vm5, %v993_v13 }
 0x2ab   :  { %v899_v18 = vpack.c.bf16 %v889_v16, %v889_v16 }
 0x2ad   :  { %v925_v58 = vunpack.c.l.b16 %v899_v18 }
 0x2ae   :  { %v867_v20 = vpop.f32.mrf.mxu1 }
 0x2af   :  { %v929_v21 = vpack.c.b16 %v925_v58, %v924_v57  ;;  %v880_v22 = vadd.f32 %v867_v20, %v821_v19 }
 0x2b1   :  { %v890_v23 = vmax.f32 %v880_v22, 0.0  ;;  %2432 = vmatmul.msk.bf16.gmra.mxu2 %vm942_vm5, %v929_v21  ;;  %2463 = vmatmul.msk.bf16.gmra.mxu0 %vm942_vm5, %v929_v21 }
 0x2b3   :  { %v900_v25 = vpack.c.bf16 %v890_v23, %v890_v23 }
 0x2b5   :  { %v990_v27 = vunpack.c.l.b16 %v900_v25 }
 0x2b6   :  { %v869_v59 = vpop.f32.mrf.mxu1 }
 0x2b7   :  { %v994_v28 = vpack.c.b16 %v990_v27, %v925_v58  ;;  %v881_v54 = vadd.f32 %v869_v59, %v822_v26 }
 0x2b9   :  { %v891_v4 = vmax.f32 %v881_v54, 0.0  ;;  %2448 = vmatmul.msk.bf16.gmra.mxu3 %vm942_vm5, %v994_v28 }
 0x2bb   :  { %v901_v29 = vpack.c.bf16 %v891_v4, %v891_v4 }
 0x2bd   :  { %v1062_v31 = vunpack.c.l.b16 %v901_v29 }
 0x2bf   :  { %v1063_v32 = vpack.c.b16 %v1062_v31, %v990_v27 }
 0x2c1   :  { %2464 = vmatmul.msk.bf16.gmra.mxu0 %vm942_vm5, %v1063_v32 }
 0x2c9   :  { %1251 = vmatmul.bf16.vlgmr.msrb.gmra.mxu3 %v2833_v60 }
 0x304   :  { %v964_v35 = vpop.f32.mrf.mxu2 }
 0x305   :  { %v965_v7 = vadd.f32 %v2698_v36, %v964_v35 }
 0x30c   :  { %v966_v37 = vpop.f32.mrf.mxu2  ;;  %v1028_v38 = vpop.f32.mrf.mxu3 }
 0x30d   :  { %v1048_v62 = vadd.f32 %v1028_v38, %v965_v7  ;;  %v967_v40 = vadd.f32 %v2698_v36, %v966_v37  ;;  %v2699_v38 = vld [vmem:[%s3499_s11] ss:$0 sm:$0xff] }
 0x30e   :  { %v1088_v39 = vpop.f32.mrf.mxu0 }
 0x30f   :  { %v1108_v43 = vadd.f32 %v1088_v39, %v1048_v62 }
 0x311   :  { %v1116_v30 = vmax.f32 %v1108_v43, 0.0 }
 0x314   :  { %v969_v41 = vpop.f32.mrf.mxu2  ;;  %v1030_v42 = vpop.f32.mrf.mxu3 }
 0x315   :  { %v1049_v44 = vadd.f32 %v1030_v42, %v967_v40  ;;  %v970_v52 = vadd.f32 %v2698_v36, %v969_v41 }
 0x316   :  { %v1090_v45 = vpop.f32.mrf.mxu0 }
 0x317   :  { %v1109_v46 = vadd.f32 %v1090_v45, %v1049_v44 }
 0x319   :  { %v1117_v47 = vmax.f32 %v1109_v46, 0.0 }
 0x31b   :  { %v1124_v48 = vpack.c.bf16 %v1117_v47, %v1116_v30 }
 0x31c   :  { %v971_v49 = vpop.f32.mrf.mxu2  ;;  %v1033_v50 = vpop.f32.mrf.mxu3 }
 0x31d   :  { %2481 = vmatmul.msk.bf16.vlgmr.msrb.gmra.mxu2 %vm1164_vm6, %v1124_v48  ;;  %v1050_v53 = vadd.f32 %v1033_v50, %v970_v52  ;;  %v972_v0 = vadd.f32 %v2698_v36, %v971_v49 }
 0x31e   :  { %v1093_v51 = vpop.f32.mrf.mxu0 }
 0x31f   :  { %v1110_v55 = vadd.f32 %v1093_v51, %v1050_v53 }
 0x321   :  { %v1118_v5 = vmax.f32 %v1110_v55, 0.0 }
 0x324   :  { %v974_v1 = vpop.f32.mrf.mxu2  ;;  %v1035_v34 = vpop.f32.mrf.mxu3 }
 0x325   :  { %v1051_v2 = vadd.f32 %v1035_v34, %v972_v0  ;;  %v975_v12 = vadd.f32 %v2698_v36, %v974_v1 }
 0x326   :  { %v1095_v56 = vpop.f32.mrf.mxu0 }
 0x327   :  { %v1111_v3 = vadd.f32 %v1095_v56, %v1051_v2 }
 0x329   :  { %v1119_v8 = vmax.f32 %v1111_v3, 0.0 }
 0x32b   :  { %v1125_v9 = vpack.c.bf16 %v1119_v8, %v1118_v5 }
 0x32c   :  { %v976_v10 = vpop.f32.mrf.mxu2  ;;  %v1038_v11 = vpop.f32.mrf.mxu3 }
 0x32d   :  { %2482 = vmatmul.msk.bf16.gmra.mxu2 %vm1164_vm6, %v1125_v9  ;;  %v1052_v13 = vadd.f32 %v1038_v11, %v975_v12  ;;  %v977_v14 = vadd.f32 %v2698_v36, %v976_v10 }
 0x32e   :  { %v1098_v57 = vpop.f32.mrf.mxu0 }
 0x32f   :  { %v1112_v15 = vadd.f32 %v1098_v57, %v1052_v13 }
 0x331   :  { %v1120_v58 = vmax.f32 %v1112_v15, 0.0 }
 0x334   :  { %v1040_v63 = vpop.f32.mrf.mxu3  ;;  %v979_v17 = vpop.f32.mrf.mxu2 }
 0x335   :  { %v1053_v16 = vadd.f32 %v1040_v63, %v977_v14  ;;  %v980_v24 = vadd.f32 %v2698_v36, %v979_v17 }
 0x336   :  { %v1100_v18 = vpop.f32.mrf.mxu0 }
 0x337   :  { %v1113_v19 = vadd.f32 %v1100_v18, %v1053_v16 }
 0x339   :  { %v1121_v20 = vmax.f32 %v1113_v19, 0.0 }
 0x33b   :  { %v1126_v21 = vpack.c.bf16 %v1121_v20, %v1120_v58  ;;  %v3239_v20 = vld [vmem:[%s3500_s12 + $0x18] sm:$0xff] }
 0x33c   :  { %v1043_v22 = vpop.f32.mrf.mxu3  ;;  %v981_v25 = vpop.f32.mrf.mxu2  ;;  %1343 = vmatpush.bf16.msrb.mxu0 %v3239_v20  ;;  %1467 = vmatpush.bf16.msra.mxu3 %v3239_v20 }
 0x33d   :  { %2483 = vmatmul.msk.bf16.gmra.mxu2 %vm1164_vm6, %v1126_v21  ;;  %v1054_v26 = vadd.f32 %v1043_v22, %v980_v24  ;;  %v982_v27 = vadd.f32 %v2698_v36, %v981_v25  ;;  %v3245_v21 = vld [vmem:[%s3500_s12 + $0x10] sm:$0xff]  ;;  %1591 = vmatpush.bf16.msra.mxu1 %v3239_v20  ;;  %v3253_v22 = vld [vmem:[%s3500_s12 + $0x8] sm:$0xff] }
 0x33e   :  { %v1103_v23 = vpop.f32.mrf.mxu0 }
 0x33f   :  { %v1114_v28 = vadd.f32 %v1103_v23, %v1054_v26  ;;  %v3265_v26 = vld [vmem:[%s3500_s12] sm:$0xff] }
 0x340   :  { %1344 = vmatpush.bf16.msrb.mxu0 %v3245_v21  ;;  %1468 = vmatpush.bf16.msra.mxu3 %v3245_v21 }
 0x341   :  { %v1122_v31 = vmax.f32 %v1114_v28, 0.0  ;;  %1592 = vmatpush.bf16.msra.mxu1 %v3245_v21 }
 0x344   :  { %v1045_v59 = vpop.f32.mrf.mxu3  ;;  %1345 = vmatpush.bf16.msrb.mxu0 %v3253_v22  ;;  %1469 = vmatpush.bf16.msra.mxu3 %v3253_v22 }
 0x345   :  { %v1055_v54 = vadd.f32 %v1045_v59, %v982_v27  ;;  %1593 = vmatpush.bf16.msra.mxu1 %v3253_v22 }
 0x346   :  { %v1105_v4 = vpop.f32.mrf.mxu0 }
 0x347   :  { %v1115_v29 = vadd.f32 %v1105_v4, %v1055_v54 }
 0x348   :  { %1346 = vmatpush.bf16.msrb.mxu0 %v3265_v26  ;;  %1470 = vmatpush.bf16.msra.mxu3 %v3265_v26 }
 0x349   :  { %v1123_v32 = vmax.f32 %v1115_v29, 0.0  ;;  %1594 = vmatpush.bf16.msra.mxu1 %v3265_v26 }
 0x34b   :  { %v1127_v33 = vpack.c.bf16 %v1123_v32, %v1122_v31 }
 0x34c   :  { %v1252_v35 = vpop.f32.mrf.mxu3  ;;  %1529 = vmatpush.bf16.msra.mxu0 %v3188_v61  ;;  %1653 = vmatpush.bf16.msrb.mxu3 %v3188_v61 }
 0x34d   :  { %2484 = vmatmul.msk.bf16.gmra.mxu2 %vm1164_vm6, %v1127_v33 }
 0x350   :  { %1530 = vmatpush.bf16.msra.mxu0 %v3215_v6  ;;  %1654 = vmatpush.bf16.msrb.mxu3 %v3215_v6 }
 0x354   :  { %v1254_v60 = vpop.f32.mrf.mxu3 }
 0x355   :  { %v3287_v60 = vld [vmem:[%s3501_s13] ss:$0 sm:$0xff] }
 0x3a0   :  { %v1186_v37 = vpop.f32.mrf.mxu2 }
 0x3a1   :  { %v1187_v7 = vadd.f32 %v2699_v38, %v1186_v37 }
 0x3a8   :  { %v1188_v39 = vpop.f32.mrf.mxu2 }
 0x3a9   :  { %v1189_v36 = vadd.f32 %v2699_v38, %v1188_v39 }
 0x3ab   :  { %v2614_v62 = vpack.c.bf16 %v1189_v36, %v1187_v7 }
 0x3ad   :  { %2615 = vst [vmem:[#allocation2] sm:$0xff] %v2614_v62  }
 0x3b0   :  { %v1191_v40 = vpop.f32.mrf.mxu2 }
 0x3b1   :  { %v1192_v45 = vadd.f32 %v2699_v38, %v1191_v40 }
 0x3b4   :  { %v1222_v41 = vld [vmem:[#allocation2] sm:$0xf]  ;;  %v1390_v4 = vld [vmem:[#allocation2 + $0x4] sm:$0xf] }
 0x3b5   :  { %v1223_v42 = vunpack.c.l.bf16 %v1222_v41  ;;  %v1391_v29 = vunpack.c.l.bf16 %v1390_v4 }
 0x3b7   :  { %v1256_v43 = vadd.f32 %v1252_v35, %v1223_v42 }
 0x3b8   :  { %v1193_v44 = vpop.f32.mrf.mxu2 }
 0x3b9   :  { %2703 = vtanh.f32 %v1256_v43  ;;  %v1194_v46 = vadd.f32 %v2699_v38, %v1193_v44  ;;  %v2493_v2 = vmul.f32 -1.442695, %v1256_v43 }
 0x3bb   :  { %v2619_v30 = vpack.c.bf16 %v1194_v46, %v1192_v45  ;;  %2705 = vpow2.f32 %v2493_v2 }
 0x3bd   :  { %2668 = vst [vmem:[#allocation2 + $0x8] sm:$0xff] %v2619_v30  }
 0x3bf   :  { %v2704_v47 = vpop.eup %2703 }
 0x3c0   :  { %v1196_v48 = vpop.f32.mrf.mxu2  ;;  %1279 = vrot.lane.b32.xlu0 %v2704_v47, %s2834_s10 }
 0x3c1   :  { %v1197_v50 = vadd.f32 %v2699_v38, %v1196_v48  ;;  %v2706_v56 = vpop.eup %2705 }
 0x3c2   :  { %v1260_v3 = vadd.f32 1.0, %v2706_v56 }
 0x3c4   :  { %2707 = vrcp.f32 %v1260_v3  ;;  %v1272_v57 = vand.u32 2147483648, %v1260_v3  ;;  %vm1266_vm8 = vweird.f32 %v1260_v3  ;;  %v1270_v12 = vand.u32 2147483647, %v1260_v3 }
 0x3c6   :  { %v1273_v14 = vor.u32 1.1754944e-38, %v1272_v57  ;;  %vm1271_vm10 = vcmp.eq.f32.partialorder %v1270_v12, 8.507059e+37 }
 0x3c8   :  { %v1198_v49 = vpop.f32.mrf.mxu2 }
 0x3c9   :  { %v1199_v51 = vadd.f32 %v2699_v38, %v1198_v49 }
 0x3ca   :  { %v2708_v5 = vpop.eup %2707 }
 0x3cb   :  { %v2624_v52 = vpack.c.bf16 %v1199_v51, %v1197_v50  ;;  %v1262_v8 = vmul.f32 %v2708_v5, %v1260_v3  ;;  %vm1267_vm7 = vweird.f32 %v2708_v5 }
 0x3cc   :  { %vm1268_vm9 = vmor %vm1266_vm8, %vm1267_vm7 }
 0x3cd   :  { %2669 = vst [vmem:[#allocation2 + $0x10] sm:$0xff] %v2624_v52   ;;  %v1263_v9 = vsub.f32 1.0, %v1262_v8 }
 0x3cf   :  { %v1264_v10 = vmul.f32 %v2708_v5, %v1263_v9 }
 0x3d0   :  { %v1201_v53 = vpop.f32.mrf.mxu2 }
 0x3d1   :  { %v1202_v1 = vadd.f32 %v2699_v38, %v1201_v53  ;;  %v1265_v11 = vadd.f32 %v2708_v5, %v1264_v10 }
 0x3d3   :  { %v1269_v13 = vsel %vm1268_vm9, %v2708_v5, %v1265_v11 }
 0x3d4   :  { %v1274_v15 = vsel %vm1271_vm10, %v1273_v14, %v1269_v13 }
 0x3d5   :  { %v1277_v17 = vmul.f32 0.0, %v1274_v15 }
 0x3d8   :  { %v1203_v0 = vpop.f32.mrf.mxu2 }
 0x3d9   :  { %v1204_v34 = vadd.f32 %v2699_v38, %v1203_v0 }
 0x3db   :  { %v2629_v55 = vpack.c.bf16 %v1204_v34, %v1202_v1 }
 0x3dd   :  { %2670 = vst [vmem:[#allocation2 + $0x18] sm:$0xff] %v2629_v55  }
 0x432   :  { %v1280_v63 = vpop.permute.xlu0 %1279 }
 0x433   :  { %v1282_v16 = vmul.f32 %v1280_v63, %v1274_v15 }
 0x435   :  { %1284 = vrot.lane.b32.xlu0 %v1282_v16, %s2834_s10 }
 0x4a7   :  { %v1285_v18 = vpop.permute.xlu0 %1284 }
 0x4a8   :  { %v3232_v19 = vadd.f32 %v1285_v18, %v1277_v17 }
 0x4aa   :  { %2709 = vtanh.f32 %v3232_v19 }
 0x4b0   :  { %v2710_v58 = vpop.eup %2709 }
 0x4b1   :  { %1290 = vrot.lane.b32.xlu1 %v2710_v58, %s2834_s10 }
 0x523   :  { %v1291_v23 = vpop.permute.xlu1 %1290 }
 0x524   :  { %v1293_v24 = vmul.f32 %v1291_v23, %v1274_v15 }
 0x526   :  { %1295 = vrot.lane.b32.xlu1 %v1293_v24, %s2835_s23  ;;  %v1392_v25 = vpack.c.bf16 %v1293_v24, %v1293_v24 }
 0x528   :  { %1394 = vrot.lane.b32.xlu2 %v1392_v25, %s2835_s23 }
 0x582   :  { %v1395_v27 = vpop.permute.xlu2 %1394 }
 0x583   :  { %2512 = vmatmul.msk.bf16.vlgmr.msrb.gmra.mxu1 %vm942_vm5, %v1395_v27 }
 0x584   :  { %1777 = vmatpush.bf16.msrb.mxu1 %v3188_v61 }
 0x588   :  { %1778 = vmatpush.bf16.msrb.mxu1 %v3215_v6 }
 0x598   :  { %v1296_v59 = vpop.permute.xlu1 %1295 }
 0x599   :  { %v1298_v28 = vsel %vm942_vm5, %v1296_v59, 0.0 }
 0x59a   :  { %v1299_v54 = vpack.c.bf16 %v1298_v28, %v1298_v28 }
 0x59c   :  { %2510 = vmatmul.msk.bf16.vlgmr.msrb.gmra.mxu0 %vm1164_vm6, %v1299_v54 }
 0x59d   :  { %1715 = vmatpush.bf16.msrb.mxu0 %v3239_v20 }
 0x5a1   :  { %1716 = vmatpush.bf16.msrb.mxu0 %v3245_v21 }
 0x5a5   :  { %1717 = vmatpush.bf16.msrb.mxu0 %v3253_v22 }
 0x5a9   :  { %1718 = vmatpush.bf16.msrb.mxu0 %v3265_v26 }
 0x600   :  { %v1408_v31 = vpop.f32.mrf.mxu1 }
 0x601   :  { %v1412_v32 = vadd.f32 %v1408_v31, %v1391_v29  ;;  %v3314_v29 = vld [vmem:[#allocation2 + $0x8] sm:$0xff]  }
 0x602   :  { %v1515_v31 = vunpack.c.l.bf16 %v3314_v29 }
 0x603   :  { %2711 = vtanh.f32 %v1412_v32  ;;  %v2513_v36 = vmul.f32 -1.442695, %v1412_v32 }
 0x608   :  { %v1410_v33 = vpop.f32.mrf.mxu1 }
 0x609   :  { %v2712_v35 = vpop.eup %2711 }
 0x60a   :  { %1435 = vrot.lane.b32.xlu0 %v2712_v35, %s2834_s10 }
 0x619   :  { %v1348_v37 = vpop.f32.mrf.mxu0 }
 0x61a   :  { %v1349_v38 = vadd.f32 %v3287_v60, %v1348_v37 }
 0x61c   :  { %2713 = vtanh.f32 %v1349_v38  ;;  %v2511_v62 = vmul.f32 -1.442695, %v1349_v38 }
 0x61d   :  { %2715 = vpow2.f32 %v2513_v36 }
 0x61e   :  { %2717 = vpow2.f32 %v2511_v62 }
 0x621   :  { %v1350_v39 = vpop.f32.mrf.mxu0 }
 0x622   :  { %v2714_v7 = vpop.eup %2713 }
 0x623   :  { %1374 = vrot.lane.b32.xlu2 %v2714_v7, %s2834_s10  ;;  %v2716_v40 = vpop.eup %2715 }
 0x624   :  { %v2718_v41 = vpop.eup %2717  ;;  %v1416_v42 = vadd.f32 1.0, %v2716_v40 }
 0x625   :  { %v1355_v43 = vadd.f32 1.0, %v2718_v41 }
 0x626   :  { %2719 = vrcp.f32 %v1416_v42  ;;  %v1428_v52 = vand.u32 2147483648, %v1416_v42  ;;  %vm1422_vm13 = vweird.f32 %v1416_v42  ;;  %v1426_v0 = vand.u32 2147483647, %v1416_v42 }
 0x627   :  { %2721 = vrcp.f32 %v1355_v43  ;;  %v1367_v1 = vand.u32 2147483648, %v1355_v43  ;;  %vm1361_vm15 = vweird.f32 %v1355_v43  ;;  %v1365_v34 = vand.u32 2147483647, %v1355_v43 }
 0x628   :  { %v1429_v2 = vor.u32 1.1754944e-38, %v1428_v52  ;;  %vm1427_vm1 = vcmp.eq.f32.partialorder %v1426_v0, 8.507059e+37 }
 0x629   :  { %v1368_v3 = vor.u32 1.1754944e-38, %v1367_v1  ;;  %vm1366_vm2 = vcmp.eq.f32.partialorder %v1365_v34, 8.507059e+37 }
 0x62c   :  { %v2720_v44 = vpop.eup %2719 }
 0x62d   :  { %v2722_v45 = vpop.eup %2721  ;;  %v1418_v46 = vmul.f32 %v2720_v44, %v1416_v42  ;;  %vm1423_vm11 = vweird.f32 %v2720_v44 }
 0x62e   :  { %v1357_v30 = vmul.f32 %v2722_v45, %v1355_v43  ;;  %vm1362_vm12 = vweird.f32 %v2722_v45  ;;  %vm1424_vm14 = vmor %vm1422_vm13, %vm1423_vm11 }
 0x62f   :  { %v1419_v47 = vsub.f32 1.0, %v1418_v46  ;;  %vm1363_vm0 = vmor %vm1361_vm15, %vm1362_vm12 }
 0x630   :  { %v1358_v48 = vsub.f32 1.0, %v1357_v30 }
 0x631   :  { %v1420_v49 = vmul.f32 %v2720_v44, %v1419_v47 }
 0x632   :  { %v1359_v50 = vmul.f32 %v2722_v45, %v1358_v48 }
 0x633   :  { %v1421_v51 = vadd.f32 %v2720_v44, %v1420_v49 }
 0x634   :  { %v1360_v53 = vadd.f32 %v2722_v45, %v1359_v50 }
 0x635   :  { %v1425_v55 = vsel %vm1424_vm14, %v2720_v44, %v1421_v51 }
 0x636   :  { %v1364_v56 = vsel %vm1363_vm0, %v2722_v45, %v1360_v53  ;;  %v1430_v8 = vsel %vm1427_vm1, %v1429_v2, %v1425_v55 }
 0x637   :  { %v1369_v10 = vsel %vm1366_vm2, %v1368_v3, %v1364_v56  ;;  %v1433_v12 = vmul.f32 %v1430_v8, %v3232_v19 }
 0x638   :  { %v1372_v15 = vmul.f32 0.0, %v1369_v10 }
 0x67c   :  { %v1436_v5 = vpop.permute.xlu0 %1435 }
 0x67d   :  { %v1438_v9 = vmul.f32 %v1436_v5, %v1430_v8  ;;  %v1375_v11 = vpop.permute.xlu2 %1374 }
 0x67e   :  { %v1377_v57 = vmul.f32 %v1375_v11, %v1369_v10 }
 0x67f   :  { %1440 = vrot.lane.b32.xlu2 %v1438_v9, %s2834_s10 }
 0x680   :  { %1379 = vrot.lane.b32.xlu1 %v1377_v57, %s2834_s10 }
 0x6d9   :  { %v1441_v13 = vpop.permute.xlu2 %1440 }
 0x6da   :  { %v3294_v14 = vadd.f32 %v1441_v13, %v1433_v12 }
 0x6dc   :  { %2723 = vtanh.f32 %v3294_v14 }
 0x6e2   :  { %v2724_v63 = vpop.eup %2723 }
 0x6e3   :  { %1446 = vrot.lane.b32.xlu1 %v2724_v63, %s2834_s10 }
 0x6f2   :  { %v1380_v16 = vpop.permute.xlu1 %1379 }
 0x6f3   :  { %v3298_v17 = vadd.f32 %v1380_v16, %v1372_v15 }
 0x6f5   :  { %2725 = vtanh.f32 %v3298_v17 }
 0x6fb   :  { %v2726_v18 = vpop.eup %2725 }
 0x6fc   :  { %1385 = vrot.lane.b32.xlu0 %v2726_v18, %s2834_s10 }
 0x755   :  { %v1447_v58 = vpop.permute.xlu1 %1446 }
 0x756   :  { %v1449_v23 = vmul.f32 %v1447_v58, %v1430_v8 }
 0x758   :  { %v1516_v19 = vpack.c.bf16 %v1449_v23, %v1449_v23  ;;  %1451 = vrot.lane.b32.xlu2 %v1449_v23, %s2835_s23 }
 0x75a   :  { %1518 = vrot.lane.b32.xlu1 %v1516_v19, %s2835_s23 }
 0x76e   :  { %v1386_v24 = vpop.permute.xlu0 %1385 }
 0x76f   :  { %v1388_v25 = vmul.f32 %v1386_v24, %v1369_v10 }
 0x771   :  { %1455 = vrot.lane.b32.xlu0 %v1388_v25, %s2836_s25 }
 0x7b2   :  { %v1452_v59 = vpop.permute.xlu2 %1451 }
 0x7cc   :  { %v1519_v27 = vpop.permute.xlu1 %1518 }
 0x7cd   :  { %2516 = vmatmul.msk.bf16.vlgmr.msra.gmra.mxu0 %vm942_vm5, %v1519_v27 }
 0x7ce   :  { %1901 = vmatpush.bf16.msra.mxu0 %v3188_v61 }
 0x7d2   :  { %1902 = vmatpush.bf16.msra.mxu0 %v3215_v6 }
 0x7e3   :  { %v1456_v28 = vpop.permute.xlu0 %1455 }
 0x7e4   :  { %v1458_v54 = vsel %vm942_vm5, %v1452_v59, %v1456_v28 }
 0x7e5   :  { %v1459_v4 = vpack.c.bf16 %v1458_v54, %v1458_v54 }
 0x7e7   :  { %2514 = vmatmul.msk.bf16.vlgmr.msra.gmra.mxu3 %vm1164_vm6, %v1459_v4 }
 0x7e8   :  { %1839 = vmatpush.bf16.msra.mxu3 %v3239_v20 }
 0x7ec   :  { %1840 = vmatpush.bf16.msra.mxu3 %v3245_v21 }
 0x7f0   :  { %1841 = vmatpush.bf16.msra.mxu3 %v3253_v22 }
 0x7f4   :  { %1842 = vmatpush.bf16.msra.mxu3 %v3265_v26 }
 0x84a   :  { %v1532_v32 = vpop.f32.mrf.mxu0 }
 0x84b   :  { %v1536_v33 = vadd.f32 %v1532_v32, %v1515_v31  ;;  %v1639_v32 = vunpack.c.h.bf16 %v3314_v29 }
 0x84d   :  { %2727 = vtanh.f32 %v1536_v33  ;;  %v2517_v62 = vmul.f32 -1.442695, %v1536_v33 }
 0x852   :  { %v1534_v35 = vpop.f32.mrf.mxu0 }
 0x853   :  { %v2728_v37 = vpop.eup %2727 }
 0x854   :  { %1559 = vrot.lane.b32.xlu2 %v2728_v37, %s2834_s10 }
 0x86a   :  { %v1472_v38 = vpop.f32.mrf.mxu3 }
 0x86b   :  { %v1473_v39 = vadd.f32 %v3287_v60, %v1472_v38 }
 0x86d   :  { %2729 = vtanh.f32 %v1473_v39  ;;  %v2515_v53 = vmul.f32 -1.442695, %v1473_v39 }
 0x86e   :  { %2731 = vpow2.f32 %v2517_v62 }
 0x872   :  { %v1474_v7 = vpop.f32.mrf.mxu3 }
 0x873   :  { %v2730_v36 = vpop.eup %2729 }
 0x874   :  { %1498 = vrot.lane.b32.xlu0 %v2730_v36, %s2834_s10  ;;  %v2732_v40 = vpop.eup %2731 }
 0x875   :  { %v1540_v41 = vadd.f32 1.0, %v2732_v40 }
 0x877   :  { %2733 = vrcp.f32 %v1540_v41  ;;  %v1552_v30 = vand.u32 2147483648, %v1540_v41  ;;  %vm1546_vm7 = vweird.f32 %v1540_v41  ;;  %v1550_v47 = vand.u32 2147483647, %v1540_v41 }
 0x878   :  { %2735 = vpow2.f32 %v2515_v53 }
 0x879   :  { %v1553_v49 = vor.u32 1.1754944e-38, %v1552_v30  ;;  %vm1551_vm9 = vcmp.eq.f32.partialorder %v1550_v47, 8.507059e+37 }
 0x87d   :  { %v2734_v42 = vpop.eup %2733 }
 0x87e   :  { %v1542_v43 = vmul.f32 %v2734_v42, %v1540_v41  ;;  %vm1547_vm3 = vweird.f32 %v2734_v42  ;;  %v2736_v0 = vpop.eup %2735 }
 0x87f   :  { %vm1548_vm8 = vmor %vm1546_vm7, %vm1547_vm3  ;;  %v1479_v1 = vadd.f32 1.0, %v2736_v0 }
 0x880   :  { %v1543_v44 = vsub.f32 1.0, %v1542_v43 }
 0x881   :  { %2737 = vrcp.f32 %v1479_v1  ;;  %v1491_v5 = vand.u32 2147483648, %v1479_v1  ;;  %vm1485_vm11 = vweird.f32 %v1479_v1  ;;  %v1489_v8 = vand.u32 2147483647, %v1479_v1 }
 0x882   :  { %v1544_v45 = vmul.f32 %v2734_v42, %v1543_v44 }
 0x883   :  { %v1492_v10 = vor.u32 1.1754944e-38, %v1491_v5  ;;  %vm1490_vm13 = vcmp.eq.f32.partialorder %v1489_v8, 8.507059e+37 }
 0x884   :  { %v1545_v46 = vadd.f32 %v2734_v42, %v1544_v45 }
 0x886   :  { %v1549_v48 = vsel %vm1548_vm8, %v2734_v42, %v1545_v46 }
 0x887   :  { %v1554_v51 = vsel %vm1551_vm9, %v1553_v49, %v1549_v48  ;;  %v2738_v34 = vpop.eup %2737 }
 0x888   :  { %v1481_v55 = vmul.f32 %v2738_v34, %v1479_v1  ;;  %vm1486_vm10 = vweird.f32 %v2738_v34  ;;  %v1557_v13 = vmul.f32 %v1554_v51, %v3294_v14 }
 0x889   :  { %vm1487_vm12 = vmor %vm1485_vm11, %vm1486_vm10 }
 0x88a   :  { %v1482_v2 = vsub.f32 1.0, %v1481_v55 }
 0x88c   :  { %v1483_v56 = vmul.f32 %v2738_v34, %v1482_v2 }
 0x88e   :  { %v1484_v3 = vadd.f32 %v2738_v34, %v1483_v56 }
 0x890   :  { %v1488_v9 = vsel %vm1487_vm12, %v2738_v34, %v1484_v3 }
 0x891   :  { %v1493_v57 = vsel %vm1490_vm13, %v1492_v10, %v1488_v9 }
 0x892   :  { %v1496_v18 = vmul.f32 %v1493_v57, %v3298_v17 }
 0x8ae   :  { %v1560_v50 = vpop.permute.xlu2 %1559 }
 0x8af   :  { %v1562_v52 = vmul.f32 %v1560_v50, %v1554_v51 }
 0x8b1   :  { %1564 = vrot.lane.b32.xlu1 %v1562_v52, %s2834_s10 }
 0x8e6   :  { %v1499_v11 = vpop.permute.xlu0 %1498 }
 0x8e7   :  { %v1501_v12 = vmul.f32 %v1499_v11, %v1493_v57 }
 0x8e9   :  { %1503 = vrot.lane.b32.xlu2 %v1501_v12, %s2834_s10 }
 0x923   :  { %v1565_v63 = vpop.permute.xlu1 %1564 }
 0x924   :  { %v3323_v15 = vadd.f32 %v1565_v63, %v1557_v13 }
 0x926   :  { %2739 = vtanh.f32 %v3323_v15 }
 0x92c   :  { %v2740_v16 = vpop.eup %2739 }
 0x92d   :  { %1570 = vrot.lane.b32.xlu0 %v2740_v16, %s2834_s10 }
 0x943   :  { %v1504_v58 = vpop.permute.xlu2 %1503 }
 0x944   :  { %v3328_v23 = vadd.f32 %v1504_v58, %v1496_v18 }
 0x946   :  { %2741 = vtanh.f32 %v3328_v23 }
 0x94c   :  { %v2742_v19 = vpop.eup %2741 }
 0x94d   :  { %1509 = vrot.lane.b32.xlu1 %v2742_v19, %s2834_s10 }
 0x99f   :  { %v1571_v24 = vpop.permute.xlu0 %1570 }
 0x9a0   :  { %v1573_v14 = vmul.f32 %v1571_v24, %v1554_v51 }
 0x9a2   :  { %v1640_v25 = vpack.c.bf16 %v1573_v14, %v1573_v14  ;;  %1575 = vrot.lane.b32.xlu0 %v1573_v14, %s2835_s23 }
 0x9a4   :  { %1642 = vrot.lane.b32.xlu2 %v1640_v25, %s2835_s23 }
 0x9bf   :  { %v1510_v27 = vpop.permute.xlu1 %1509 }
 0x9c0   :  { %v1512_v59 = vmul.f32 %v1510_v27, %v1493_v57 }
 0x9c2   :  { %1579 = vrot.lane.b32.xlu1 %v1512_v59, %s2836_s25 }
 0x9fe   :  { %v1643_v17 = vpop.permute.xlu2 %1642 }
 0x9ff   :  { %2520 = vmatmul.msk.bf16.vlgmr.msrb.gmra.mxu3 %vm942_vm5, %v1643_v17 }
 0xa00   :  { %2087 = vmatpush.bf16.msrb.mxu3 %v3239_v20 }
 0xa04   :  { %2088 = vmatpush.bf16.msrb.mxu3 %v3245_v21 }
 0xa08   :  { %2089 = vmatpush.bf16.msrb.mxu3 %v3253_v22 }
 0xa0c   :  { %2090 = vmatpush.bf16.msrb.mxu3 %v3265_v26 }
 0xa14   :  { %v1576_v28 = vpop.permute.xlu0 %1575 }
 0xa34   :  { %v1580_v54 = vpop.permute.xlu1 %1579 }
 0xa35   :  { %v1582_v4 = vsel %vm942_vm5, %v1576_v28, %v1580_v54 }
 0xa36   :  { %v1583_v31 = vpack.c.bf16 %v1582_v4, %v1582_v4 }
 0xa38   :  { %2518 = vmatmul.msk.bf16.vlgmr.msra.gmra.mxu1 %vm1164_vm6, %v1583_v31 }
 0xa39   :  { %1963 = vmatpush.bf16.msra.mxu1 %v3239_v20 }
 0xa3d   :  { %1964 = vmatpush.bf16.msra.mxu1 %v3245_v21 }
 0xa41   :  { %1965 = vmatpush.bf16.msra.mxu1 %v3253_v22 }
 0xa45   :  { %1966 = vmatpush.bf16.msra.mxu1 %v3265_v26 }
 0xa82   :  { %v1656_v33 = vpop.f32.mrf.mxu3 }
 0xa83   :  { %v1660_v35 = vadd.f32 %v1656_v33, %v1639_v32  ;;  %v3374_v32 = vld [vmem:[#allocation2 + $0x10] sm:$0xff]  }
 0xa85   :  { %2743 = vtanh.f32 %v1660_v35  ;;  %v2521_v40 = vmul.f32 -1.442695, %v1660_v35 }
 0xa8a   :  { %v1658_v37 = vpop.f32.mrf.mxu3 }
 0xa8b   :  { %v2744_v38 = vpop.eup %2743 }
 0xa8c   :  { %1683 = vrot.lane.b32.xlu0 %v2744_v38, %s2834_s10 }
 0xab5   :  { %v1596_v39 = vpop.f32.mrf.mxu1 }
 0xab6   :  { %v1597_v7 = vadd.f32 %v3287_v60, %v1596_v39 }
 0xab8   :  { %2745 = vtanh.f32 %v1597_v7  ;;  %v2519_v44 = vmul.f32 -1.442695, %v1597_v7 }
 0xab9   :  { %2747 = vpow2.f32 %v2521_v40 }
 0xabd   :  { %v1598_v36 = vpop.f32.mrf.mxu1 }
 0xabe   :  { %v2746_v62 = vpop.eup %2745 }
 0xabf   :  { %1622 = vrot.lane.b32.xlu2 %v2746_v62, %s2834_s10  ;;  %v2748_v41 = vpop.eup %2747 }
 0xac0   :  { %v1664_v42 = vadd.f32 1.0, %v2748_v41 }
 0xac2   :  { %2749 = vrcp.f32 %v1664_v42  ;;  %v1676_v48 = vand.u32 2147483648, %v1664_v42  ;;  %vm1670_vm15 = vweird.f32 %v1664_v42  ;;  %v1674_v50 = vand.u32 2147483647, %v1664_v42 }
 0xac3   :  { %2751 = vpow2.f32 %v2519_v44 }
 0xac4   :  { %v1677_v52 = vor.u32 1.1754944e-38, %v1676_v48  ;;  %vm1675_vm1 = vcmp.eq.f32.partialorder %v1674_v50, 8.507059e+37 }
 0xac8   :  { %v2750_v29 = vpop.eup %2749 }
 0xac9   :  { %v1666_v43 = vmul.f32 %v2750_v29, %v1664_v42  ;;  %v2752_v30 = vpop.eup %2751  ;;  %vm1671_vm14 = vweird.f32 %v2750_v29 }
 0xaca   :  { %v1603_v49 = vadd.f32 1.0, %v2752_v30  ;;  %vm1672_vm0 = vmor %vm1670_vm15, %vm1671_vm14 }
 0xacb   :  { %v1667_v45 = vsub.f32 1.0, %v1666_v43 }
 0xacc   :  { %2753 = vrcp.f32 %v1603_v49  ;;  %v1615_v5 = vand.u32 2147483648, %v1603_v49  ;;  %vm1609_vm3 = vweird.f32 %v1603_v49  ;;  %v1613_v8 = vand.u32 2147483647, %v1603_v49 }
 0xacd   :  { %v1668_v46 = vmul.f32 %v2750_v29, %v1667_v45 }
 0xace   :  { %v1616_v10 = vor.u32 1.1754944e-38, %v1615_v5  ;;  %vm1614_vm8 = vcmp.eq.f32.partialorder %v1613_v8, 8.507059e+37 }
 0xacf   :  { %v1669_v47 = vadd.f32 %v2750_v29, %v1668_v46 }
 0xad1   :  { %v1673_v51 = vsel %vm1672_vm0, %v2750_v29, %v1669_v47 }
 0xad2   :  { %v1678_v0 = vsel %vm1675_vm1, %v1677_v52, %v1673_v51  ;;  %v2754_v34 = vpop.eup %2753 }
 0xad3   :  { %v1605_v55 = vmul.f32 %v2754_v34, %v1603_v49  ;;  %vm1610_vm2 = vweird.f32 %v2754_v34  ;;  %v1681_v13 = vmul.f32 %v1678_v0, %v3323_v15 }
 0xad4   :  { %vm1611_vm7 = vmor %vm1609_vm3, %vm1610_vm2 }
 0xad5   :  { %v1606_v2 = vsub.f32 1.0, %v1605_v55 }
 0xad7   :  { %v1607_v56 = vmul.f32 %v2754_v34, %v1606_v2 }
 0xad9   :  { %v1608_v3 = vadd.f32 %v2754_v34, %v1607_v56 }
 0xadb   :  { %v1612_v9 = vsel %vm1611_vm7, %v2754_v34, %v1608_v3 }
 0xadc   :  { %v1617_v11 = vsel %vm1614_vm8, %v1616_v10, %v1612_v9 }
 0xadd   :  { %v1620_v58 = vmul.f32 %v1617_v11, %v3328_v23 }
 0xafe   :  { %v1684_v53 = vpop.permute.xlu0 %1683 }
 0xaff   :  { %v1686_v1 = vmul.f32 %v1684_v53, %v1678_v0 }
 0xb01   :  { %1688 = vrot.lane.b32.xlu2 %v1686_v1, %s2834_s10 }
 0xb19   :  { %v1623_v57 = vpop.permute.xlu2 %1622 }
 0xb1a   :  { %v1625_v12 = vmul.f32 %v1623_v57, %v1617_v11 }
 0xb1c   :  { %1627 = vrot.lane.b32.xlu1 %v1625_v12, %s2834_s10 }
 0xb5b   :  { %v1689_v63 = vpop.permute.xlu2 %1688 }
 0xb5c   :  { %v3353_v16 = vadd.f32 %v1689_v63, %v1681_v13 }
 0xb5e   :  { %2755 = vtanh.f32 %v3353_v16 }
 0xb64   :  { %v2756_v18 = vpop.eup %2755 }
 0xb65   :  { %1694 = vrot.lane.b32.xlu1 %v2756_v18, %s2834_s10 }
 0xb8e   :  { %v1628_v19 = vpop.permute.xlu1 %1627 }
 0xb8f   :  { %v3358_v24 = vadd.f32 %v1628_v19, %v1620_v58 }
 0xb91   :  { %2757 = vtanh.f32 %v3358_v24 }
 0xb97   :  { %v2758_v14 = vpop.eup %2757 }
 0xb98   :  { %1633 = vrot.lane.b32.xlu0 %v2758_v14, %s2834_s10 }
 0xbd7   :  { %v1695_v25 = vpop.permute.xlu1 %1694 }
 0xbd8   :  { %v1697_v15 = vmul.f32 %v1695_v25, %v1678_v0 }
 0xbda   :  { %v1764_v27 = vpack.c.bf16 %v1697_v15, %v1697_v15  ;;  %1699 = vrot.lane.b32.xlu2 %v1697_v15, %s2835_s23 }
 0xbdc   :  { %1766 = vrot.lane.b32.xlu1 %v1764_v27, %s2835_s23 }
 0xc0a   :  { %v1634_v59 = vpop.permute.xlu0 %1633 }
 0xc0b   :  { %v1636_v17 = vmul.f32 %v1634_v59, %v1617_v11 }
 0xc0d   :  { %1703 = vrot.lane.b32.xlu0 %v1636_v17, %s2836_s25 }
 0xc34   :  { %v1700_v28 = vpop.permute.xlu2 %1699 }
 0xc4e   :  { %v1767_v23 = vpop.permute.xlu1 %1766 }
 0xc4f   :  { %2524 = vmatmul.msk.bf16.vlgmr.msrb.gmra.mxu1 %vm942_vm5, %v1767_v23  ;;  %v1887_v23 = vunpack.c.h.bf16 %v3374_v32 }
 0xc50   :  { %2211 = vmatpush.bf16.msrb.mxu1 %v3239_v20  ;;  %v1763_v20 = vunpack.c.l.bf16 %v3374_v32 }
 0xc54   :  { %2212 = vmatpush.bf16.msrb.mxu1 %v3245_v21 }
 0xc58   :  { %2213 = vmatpush.bf16.msrb.mxu1 %v3253_v22 }
 0xc5c   :  { %2214 = vmatpush.bf16.msrb.mxu1 %v3265_v26 }
 0xc7f   :  { %v1704_v54 = vpop.permute.xlu0 %1703 }
 0xc80   :  { %v1706_v4 = vsel %vm942_vm5, %v1700_v28, %v1704_v54 }
 0xc81   :  { %v1707_v31 = vpack.c.bf16 %v1706_v4, %v1706_v4 }
 0xc83   :  { %2522 = vmatmul.msk.bf16.vlgmr.msrb.gmra.mxu0 %vm1164_vm6, %v1707_v31 }
 0xc84   :  { %2149 = vmatpush.bf16.msrb.mxu0 %v3188_v61 }
 0xc88   :  { %2150 = vmatpush.bf16.msrb.mxu0 %v3215_v6 }
 0xccc   :  { %v1780_v21 = vpop.f32.mrf.mxu1 }
 0xccd   :  { %v1784_v33 = vadd.f32 %v1780_v21, %v1763_v20 }
 0xccf   :  { %2759 = vtanh.f32 %v1784_v33  ;;  %v2525_v61 = vmul.f32 -1.442695, %v1784_v33 }
 0xcd4   :  { %v1782_v22 = vpop.f32.mrf.mxu1 }
 0xcd5   :  { %v2760_v26 = vpop.eup %2759 }
 0xcd6   :  { %1807 = vrot.lane.b32.xlu0 %v2760_v26, %s2834_s10 }
 0xd00   :  { %v1720_v35 = vpop.f32.mrf.mxu0 }
 0xd01   :  { %v1721_v37 = vadd.f32 %v3287_v60, %v1720_v35 }
 0xd03   :  { %2761 = vtanh.f32 %v1721_v37  ;;  %v2523_v40 = vmul.f32 -1.442695, %v1721_v37 }
 0xd04   :  { %2763 = vpow2.f32 %v2525_v61 }
 0xd08   :  { %v1722_v38 = vpop.f32.mrf.mxu0 }
 0xd09   :  { %v2762_v39 = vpop.eup %2761 }
 0xd0a   :  { %1746 = vrot.lane.b32.xlu2 %v2762_v39, %s2834_s10  ;;  %v2764_v6 = vpop.eup %2763 }
 0xd0b   :  { %v1788_v7 = vadd.f32 1.0, %v2764_v6 }
 0xd0d   :  { %2765 = vrcp.f32 %v1788_v7  ;;  %v1800_v44 = vand.u32 2147483648, %v1788_v7  ;;  %vm1794_vm10 = vweird.f32 %v1788_v7  ;;  %v1798_v45 = vand.u32 2147483647, %v1788_v7 }
 0xd0e   :  { %2767 = vpow2.f32 %v2523_v40 }
 0xd0f   :  { %v1801_v47 = vor.u32 1.1754944e-38, %v1800_v44  ;;  %vm1799_vm12 = vcmp.eq.f32.partialorder %v1798_v45, 8.507059e+37 }
 0xd13   :  { %v2766_v36 = vpop.eup %2765 }
 0xd14   :  { %v1790_v62 = vmul.f32 %v2766_v36, %v1788_v7  ;;  %v2768_v29 = vpop.eup %2767  ;;  %vm1795_vm9 = vweird.f32 %v2766_v36 }
 0xd15   :  { %v1727_v46 = vadd.f32 1.0, %v2768_v29  ;;  %vm1796_vm11 = vmor %vm1794_vm10, %vm1795_vm9 }
 0xd16   :  { %v1791_v41 = vsub.f32 1.0, %v1790_v62 }
 0xd17   :  { %2769 = vrcp.f32 %v1727_v46  ;;  %v1739_v34 = vand.u32 2147483648, %v1727_v46  ;;  %vm1733_vm14 = vweird.f32 %v1727_v46  ;;  %v1737_v55 = vand.u32 2147483647, %v1727_v46 }
 0xd18   :  { %v1792_v42 = vmul.f32 %v2766_v36, %v1791_v41 }
 0xd19   :  { %v1740_v56 = vor.u32 1.1754944e-38, %v1739_v34  ;;  %vm1738_vm0 = vcmp.eq.f32.partialorder %v1737_v55, 8.507059e+37 }
 0xd1a   :  { %v1793_v43 = vadd.f32 %v2766_v36, %v1792_v42 }
 0xd1c   :  { %v1797_v30 = vsel %vm1796_vm11, %v2766_v36, %v1793_v43 }
 0xd1d   :  { %v1802_v49 = vsel %vm1799_vm12, %v1801_v47, %v1797_v30  ;;  %v2770_v51 = vpop.eup %2769 }
 0xd1e   :  { %v1729_v52 = vmul.f32 %v2770_v51, %v1727_v46  ;;  %vm1734_vm13 = vweird.f32 %v2770_v51  ;;  %v1805_v9 = vmul.f32 %v1802_v49, %v3353_v16 }
 0xd1f   :  { %vm1735_vm15 = vmor %vm1733_vm14, %vm1734_vm13 }
 0xd20   :  { %v1730_v53 = vsub.f32 1.0, %v1729_v52 }
 0xd22   :  { %v1731_v0 = vmul.f32 %v2770_v51, %v1730_v53 }
 0xd24   :  { %v1732_v1 = vadd.f32 %v2770_v51, %v1731_v0 }
 0xd26   :  { %v1736_v2 = vsel %vm1735_vm15, %v2770_v51, %v1732_v1 }
 0xd27   :  { %v1741_v5 = vsel %vm1738_vm0, %v1740_v56, %v1736_v2 }
 0xd28   :  { %v1744_v12 = vmul.f32 %v1741_v5, %v3358_v24 }
 0xd48   :  { %v1808_v48 = vpop.permute.xlu0 %1807 }
 0xd49   :  { %v1810_v50 = vmul.f32 %v1808_v48, %v1802_v49 }
 0xd4b   :  { %1812 = vrot.lane.b32.xlu2 %v1810_v50, %s2834_s10 }
 0xd64   :  { %v1747_v3 = vpop.permute.xlu2 %1746 }
 0xd65   :  { %v1749_v8 = vmul.f32 %v1747_v3, %v1741_v5 }
 0xd67   :  { %1751 = vrot.lane.b32.xlu1 %v1749_v8, %s2834_s10 }
 0xda5   :  { %v1813_v10 = vpop.permute.xlu2 %1812 }
 0xda6   :  { %v3383_v11 = vadd.f32 %v1813_v10, %v1805_v9 }
 0xda8   :  { %2771 = vtanh.f32 %v3383_v11 }
 0xdae   :  { %v2772_v57 = vpop.eup %2771 }
 0xdaf   :  { %1818 = vrot.lane.b32.xlu1 %v2772_v57, %s2834_s10 }
 0xdd9   :  { %v1752_v13 = vpop.permute.xlu1 %1751 }
 0xdda   :  { %v3388_v63 = vadd.f32 %v1752_v13, %v1744_v12 }
 0xddc   :  { %2773 = vtanh.f32 %v3388_v63 }
 0xde2   :  { %v2774_v18 = vpop.eup %2773 }
 0xde3   :  { %1757 = vrot.lane.b32.xlu0 %v2774_v18, %s2834_s10 }
 0xe21   :  { %v1819_v58 = vpop.permute.xlu1 %1818 }
 0xe22   :  { %v1821_v16 = vmul.f32 %v1819_v58, %v1802_v49 }
 0xe24   :  { %v1888_v19 = vpack.c.bf16 %v1821_v16, %v1821_v16  ;;  %1823 = vrot.lane.b32.xlu2 %v1821_v16, %s2835_s23 }
 0xe26   :  { %1890 = vrot.lane.b32.xlu1 %v1888_v19, %s2835_s23 }
 0xe55   :  { %v1758_v14 = vpop.permute.xlu0 %1757 }
 0xe56   :  { %v1760_v25 = vmul.f32 %v1758_v14, %v1741_v5 }
 0xe58   :  { %1827 = vrot.lane.b32.xlu0 %v1760_v25, %s2836_s25  ;;  %v3420_v25 = vld [vmem:[#allocation2 + $0x18] sm:$0xff]  }
 0xe7e   :  { %v1824_v15 = vpop.permute.xlu2 %1823 }
 0xe98   :  { %v1891_v24 = vpop.permute.xlu1 %1890 }
 0xe99   :  { %2528 = vmatmul.msk.bf16.vlgmr.msra.gmra.mxu0 %vm942_vm5, %v1891_v24  ;;  %v2011_v24 = vunpack.c.l.bf16 %v3420_v25 }
 0xeca   :  { %v1828_v27 = vpop.permute.xlu0 %1827 }
 0xecb   :  { %v1830_v59 = vsel %vm942_vm5, %v1824_v15, %v1828_v27 }
 0xecc   :  { %v1831_v17 = vpack.c.bf16 %v1830_v59, %v1830_v59 }
 0xece   :  { %2526 = vmatmul.msk.bf16.vlgmr.msra.gmra.mxu3 %vm1164_vm6, %v1831_v17 }
 0xf16   :  { %v1904_v28 = vpop.f32.mrf.mxu0 }
 0xf17   :  { %v1908_v54 = vadd.f32 %v1904_v28, %v1887_v23 }
 0xf19   :  { %2775 = vtanh.f32 %v1908_v54  ;;  %v2529_v20 = vmul.f32 -1.442695, %v1908_v54 }
 0xf1b   :  { %2777 = vpow2.f32 %v2529_v20 }
 0xf1e   :  { %v1906_v4 = vpop.f32.mrf.mxu0 }
 0xf1f   :  { %v2776_v31 = vpop.eup %2775 }
 0xf20   :  { %1931 = vrot.lane.b32.xlu2 %v2776_v31, %s2834_s10 }
 0xf21   :  { %v2778_v22 = vpop.eup %2777 }
 0xf22   :  { %v1912_v37 = vadd.f32 1.0, %v2778_v22 }
 0xf24   :  { %v1924_v7 = vand.u32 2147483648, %v1912_v37  ;;  %vm1918_vm2 = vweird.f32 %v1912_v37  ;;  %v1922_v36 = vand.u32 2147483647, %v1912_v37 }
 0xf26   :  { %v1925_v40 = vor.u32 1.1754944e-38, %v1924_v7  ;;  %vm1923_vm7 = vcmp.eq.f32.partialorder %v1922_v36, 8.507059e+37 }
 0xf51   :  { %v1844_v21 = vpop.f32.mrf.mxu3 }
 0xf52   :  { %v1845_v33 = vadd.f32 %v3287_v60, %v1844_v21 }
 0xf54   :  { %2779 = vtanh.f32 %v1845_v33  ;;  %v2527_v43 = vmul.f32 -1.442695, %v1845_v33 }
 0xf55   :  { %2781 = vrcp.f32 %v1912_v37 }
 0xf56   :  { %2783 = vpow2.f32 %v2527_v43 }
 0xf59   :  { %v1846_v26 = vpop.f32.mrf.mxu3 }
 0xf5a   :  { %v2780_v35 = vpop.eup %2779 }
 0xf5b   :  { %1870 = vrot.lane.b32.xlu0 %v2780_v35, %s2834_s10  ;;  %v2782_v32 = vpop.eup %2781 }
 0xf5c   :  { %v1914_v38 = vmul.f32 %v2782_v32, %v1912_v37  ;;  %vm1919_vm1 = vweird.f32 %v2782_v32  ;;  %v2784_v44 = vpop.eup %2783 }
 0xf5d   :  { %vm1920_vm3 = vmor %vm1918_vm2, %vm1919_vm1  ;;  %v1851_v45 = vadd.f32 1.0, %v2784_v44 }
 0xf5e   :  { %v1915_v39 = vsub.f32 1.0, %v1914_v38 }
 0xf5f   :  { %2785 = vrcp.f32 %v1851_v45  ;;  %v1863_v50 = vand.u32 2147483648, %v1851_v45  ;;  %vm1857_vm9 = vweird.f32 %v1851_v45  ;;  %v1861_v51 = vand.u32 2147483647, %v1851_v45 }
 0xf60   :  { %v1916_v61 = vmul.f32 %v2782_v32, %v1915_v39 }
 0xf61   :  { %v1864_v53 = vor.u32 1.1754944e-38, %v1863_v50  ;;  %vm1862_vm11 = vcmp.eq.f32.partialorder %v1861_v51, 8.507059e+37 }
 0xf62   :  { %v1917_v6 = vadd.f32 %v2782_v32, %v1916_v61 }
 0xf64   :  { %v1921_v62 = vsel %vm1920_vm3, %v2782_v32, %v1917_v6 }
 0xf65   :  { %v1926_v42 = vsel %vm1923_vm7, %v1925_v40, %v1921_v62  ;;  %v2786_v46 = vpop.eup %2785 }
 0xf66   :  { %v1853_v30 = vmul.f32 %v2786_v46, %v1851_v45  ;;  %vm1858_vm8 = vweird.f32 %v2786_v46  ;;  %v1929_v55 = vmul.f32 %v1926_v42, %v3383_v11 }
 0xf67   :  { %vm1859_vm10 = vmor %vm1857_vm9, %vm1858_vm8 }
 0xf68   :  { %v1854_v47 = vsub.f32 1.0, %v1853_v30 }
 0xf6a   :  { %v1855_v48 = vmul.f32 %v2786_v46, %v1854_v47 }
 0xf6c   :  { %v1856_v49 = vadd.f32 %v2786_v46, %v1855_v48 }
 0xf6e   :  { %v1860_v52 = vsel %vm1859_vm10, %v2786_v46, %v1856_v49 }
 0xf6f   :  { %v1865_v1 = vsel %vm1862_vm11, %v1864_v53, %v1860_v52 }
 0xf70   :  { %v1868_v5 = vmul.f32 %v1865_v1, %v3388_v63 }
 0xf7a   :  { %v1932_v41 = vpop.permute.xlu2 %1931 }
 0xf7b   :  { %v1934_v29 = vmul.f32 %v1932_v41, %v1926_v42 }
 0xf7d   :  { %1936 = vrot.lane.b32.xlu1 %v1934_v29, %s2834_s10 }
 0xfcd   :  { %v1871_v0 = vpop.permute.xlu0 %1870 }
 0xfce   :  { %v1873_v34 = vmul.f32 %v1871_v0, %v1865_v1 }
 0xfd0   :  { %1875 = vrot.lane.b32.xlu2 %v1873_v34, %s2834_s10 }
 0xfef   :  { %v1937_v2 = vpop.permute.xlu1 %1936 }
 0xff0   :  { %v3405_v56 = vadd.f32 %v1937_v2, %v1929_v55 }
 0xff2   :  { %2787 = vtanh.f32 %v3405_v56 }
 0xff8   :  { %v2788_v3 = vpop.eup %2787 }
 0xff9   :  { %1942 = vrot.lane.b32.xlu0 %v2788_v3, %s2834_s10 }
0x102a   :  { %v1876_v8 = vpop.permute.xlu2 %1875 }
0x102b   :  { %v3410_v9 = vadd.f32 %v1876_v8, %v1868_v5 }
0x102d   :  { %2789 = vtanh.f32 %v3410_v9 }
0x1033   :  { %v2790_v10 = vpop.eup %2789 }
0x1034   :  { %1881 = vrot.lane.b32.xlu1 %v2790_v10, %s2834_s10 }
0x106b   :  { %v1943_v57 = vpop.permute.xlu0 %1942 }
0x106c   :  { %v1945_v11 = vmul.f32 %v1943_v57, %v1926_v42 }
0x106e   :  { %v2012_v12 = vpack.c.bf16 %v1945_v11, %v1945_v11  ;;  %1947 = vrot.lane.b32.xlu0 %v1945_v11, %s2835_s23 }
0x1070   :  { %2014 = vrot.lane.b32.xlu2 %v2012_v12, %s2835_s23 }
0x10a6   :  { %v1882_v13 = vpop.permute.xlu1 %1881 }
0x10a7   :  { %v1884_v18 = vmul.f32 %v1882_v13, %v1865_v1 }
0x10a9   :  { %1951 = vrot.lane.b32.xlu1 %v1884_v18, %s2836_s25  ;;  %v2135_v18 = vunpack.c.h.bf16 %v3420_v25 }
0x10ca   :  { %v2015_v63 = vpop.permute.xlu2 %2014 }
0x10cb   :  { %2532 = vmatmul.msk.bf16.vlgmr.msra.gmra.mxu2 %vm942_vm5, %v2015_v63 }
0x10e0   :  { %v1948_v58 = vpop.permute.xlu0 %1947 }
0x111b   :  { %v1952_v16 = vpop.permute.xlu1 %1951 }
0x111c   :  { %v1954_v19 = vsel %vm942_vm5, %v1948_v58, %v1952_v16 }
0x111d   :  { %v1955_v14 = vpack.c.bf16 %v1954_v19, %v1954_v19 }
0x111f   :  { %2530 = vmatmul.msk.bf16.vlgmr.msra.gmra.mxu1 %vm1164_vm6, %v1955_v14 }
0x114e   :  { %v2028_v15 = vpop.f32.mrf.mxu2 }
0x114f   :  { %v2032_v27 = vadd.f32 %v2028_v15, %v2011_v24  ;;  %v3449_v15 = vld [vmem:[%s3501_s13] ss:$0 sm:$0xff] }
0x1151   :  { %2791 = vtanh.f32 %v2032_v27  ;;  %v2533_v28 = vmul.f32 -1.442695, %v2032_v27 }
0x1156   :  { %v2030_v59 = vpop.f32.mrf.mxu2 }
0x1157   :  { %v2792_v17 = vpop.eup %2791 }
0x1158   :  { %2055 = vrot.lane.b32.xlu0 %v2792_v17, %s2834_s10 }
0x119c   :  { %v1968_v23 = vpop.f32.mrf.mxu1 }
0x119d   :  { %v1969_v54 = vadd.f32 %v3287_v60, %v1968_v23 }
0x119f   :  { %2793 = vtanh.f32 %v1969_v54  ;;  %v2531_v36 = vmul.f32 -1.442695, %v1969_v54 }
0x11a0   :  { %2795 = vpow2.f32 %v2533_v28 }
0x11a4   :  { %v1970_v4 = vpop.f32.mrf.mxu1 }
0x11a5   :  { %v2794_v31 = vpop.eup %2793 }
0x11a6   :  { %1994 = vrot.lane.b32.xlu2 %v2794_v31, %s2834_s10  ;;  %v2796_v20 = vpop.eup %2795 }
0x11a7   :  { %v2036_v21 = vadd.f32 1.0, %v2796_v20 }
0x11a9   :  { %2797 = vrcp.f32 %v2036_v21  ;;  %v2048_v32 = vand.u32 2147483648, %v2036_v21  ;;  %vm2042_vm13 = vweird.f32 %v2036_v21  ;;  %v2046_v38 = vand.u32 2147483647, %v2036_v21 }
0x11aa   :  { %2799 = vpow2.f32 %v2531_v36 }
0x11ab   :  { %v2049_v39 = vor.u32 1.1754944e-38, %v2048_v32  ;;  %vm2047_vm15 = vcmp.eq.f32.partialorder %v2046_v38, 8.507059e+37 }
0x11af   :  { %v2798_v33 = vpop.eup %2797 }
0x11b0   :  { %v2038_v22 = vmul.f32 %v2798_v33, %v2036_v21  ;;  %vm2043_vm12 = vweird.f32 %v2798_v33  ;;  %v2800_v62 = vpop.eup %2799 }
0x11b1   :  { %vm2044_vm14 = vmor %vm2042_vm13, %vm2043_vm12  ;;  %v1975_v40 = vadd.f32 1.0, %v2800_v62 }
0x11b2   :  { %v2039_v26 = vsub.f32 1.0, %v2038_v22 }
0x11b3   :  { %2801 = vrcp.f32 %v1975_v40  ;;  %v1987_v45 = vand.u32 2147483648, %v1975_v40  ;;  %vm1981_vm1 = vweird.f32 %v1975_v40  ;;  %v1985_v46 = vand.u32 2147483647, %v1975_v40 }
0x11b4   :  { %v2040_v35 = vmul.f32 %v2798_v33, %v2039_v26 }
0x11b5   :  { %v1988_v47 = vor.u32 1.1754944e-38, %v1987_v45  ;;  %vm1986_vm3 = vcmp.eq.f32.partialorder %v1985_v46, 8.507059e+37 }
0x11b6   :  { %v2041_v37 = vadd.f32 %v2798_v33, %v2040_v35 }
0x11b8   :  { %v2045_v60 = vsel %vm2044_vm14, %v2798_v33, %v2041_v37 }
0x11b9   :  { %v2050_v6 = vsel %vm2047_vm15, %v2049_v39, %v2045_v60  ;;  %v2802_v41 = vpop.eup %2801 }
0x11ba   :  { %v1977_v42 = vmul.f32 %v2802_v41, %v1975_v40  ;;  %vm1982_vm0 = vweird.f32 %v2802_v41  ;;  %v2053_v51 = vmul.f32 %v2050_v6, %v3405_v56 }
0x11bb   :  { %vm1983_vm2 = vmor %vm1981_vm1, %vm1982_vm0 }
0x11bc   :  { %v1978_v29 = vsub.f32 1.0, %v1977_v42 }
0x11be   :  { %v1979_v43 = vmul.f32 %v2802_v41, %v1978_v29 }
0x11c0   :  { %v1980_v44 = vadd.f32 %v2802_v41, %v1979_v43 }
0x11c2   :  { %v1984_v30 = vsel %vm1983_vm2, %v2802_v41, %v1980_v44  ;;  %vm2327_vm2 = vcmask 39936  }
0x11c3   :  { %v1989_v49 = vsel %vm1986_vm3, %v1988_v47, %v1984_v30 }
0x11c4   :  { %v1992_v1 = vmul.f32 %v1989_v49, %v3410_v9 }
0x11ca   :  { %v2056_v61 = vpop.permute.xlu0 %2055 }
0x11cb   :  { %v2058_v7 = vmul.f32 %v2056_v61, %v2050_v6 }
0x11cd   :  { %2060 = vrot.lane.b32.xlu2 %v2058_v7, %s2834_s10 }
0x1200   :  { %v1995_v48 = vpop.permute.xlu2 %1994 }
0x1201   :  { %v1997_v50 = vmul.f32 %v1995_v48, %v1989_v49 }
0x1203   :  { %1999 = vrot.lane.b32.xlu1 %v1997_v50, %s2834_s10 }
0x1227   :  { %v2061_v52 = vpop.permute.xlu2 %2060 }
0x1228   :  { %v3429_v53 = vadd.f32 %v2061_v52, %v2053_v51 }
0x122a   :  { %2803 = vtanh.f32 %v3429_v53 }
0x1230   :  { %v2804_v0 = vpop.eup %2803 }
0x1231   :  { %2066 = vrot.lane.b32.xlu1 %v2804_v0, %s2834_s10 }
0x1275   :  { %v2000_v34 = vpop.permute.xlu1 %1999 }
0x1276   :  { %v3434_v55 = vadd.f32 %v2000_v34, %v1992_v1 }
0x1278   :  { %2805 = vtanh.f32 %v3434_v55 }
0x127e   :  { %v2806_v2 = vpop.eup %2805 }
0x127f   :  { %2005 = vrot.lane.b32.xlu0 %v2806_v2, %s2834_s10 }
0x12a3   :  { %v2067_v3 = vpop.permute.xlu1 %2066 }
0x12a4   :  { %v2069_v56 = vmul.f32 %v2067_v3, %v2050_v6 }
0x12a6   :  { %v2136_v5 = vpack.c.bf16 %v2069_v56, %v2069_v56  ;;  %2071 = vrot.lane.b32.xlu2 %v2069_v56, %s2835_s23 }
0x12a8   :  { %2138 = vrot.lane.b32.xlu1 %v2136_v5, %s2835_s23 }
0x12f1   :  { %v2006_v8 = vpop.permute.xlu0 %2005 }
0x12f2   :  { %v2008_v10 = vmul.f32 %v2006_v8, %v1989_v49 }
0x12f4   :  { %2075 = vrot.lane.b32.xlu0 %v2008_v10, %s2836_s25 }
0x1300   :  { %v2072_v57 = vpop.permute.xlu2 %2071 }
0x131a   :  { %v2139_v9 = vpop.permute.xlu1 %2138 }
0x131b   :  { %2536 = vmatmul.msk.bf16.vlgmr.msrb.gmra.mxu0 %vm942_vm5, %v2139_v9 }
0x1366   :  { %v2076_v11 = vpop.permute.xlu0 %2075 }
0x1367   :  { %v2078_v12 = vsel %vm942_vm5, %v2072_v57, %v2076_v11 }
0x1368   :  { %v2079_v13 = vpack.c.bf16 %v2078_v12, %v2078_v12 }
0x136a   :  { %2534 = vmatmul.msk.bf16.vlgmr.msrb.gmra.mxu3 %vm1164_vm6, %v2079_v13 }
0x1398   :  { %v2152_v63 = vpop.f32.mrf.mxu0 }
0x1399   :  { %v2156_v58 = vadd.f32 %v2152_v63, %v2135_v18 }
0x139b   :  { %2807 = vtanh.f32 %v2156_v58  ;;  %v2537_v14 = vmul.f32 -1.442695, %v2156_v58 }
0x139d   :  { %2809 = vpow2.f32 %v2537_v14 }
0x13a0   :  { %v2154_v16 = vpop.f32.mrf.mxu0 }
0x13a1   :  { %v2808_v19 = vpop.eup %2807 }
0x13a2   :  { %2179 = vrot.lane.b32.xlu0 %v2808_v19, %s2834_s10 }
0x13a3   :  { %v2810_v59 = vpop.eup %2809 }
0x13a4   :  { %v2160_v25 = vadd.f32 1.0, %v2810_v59 }
0x13a6   :  { %v2172_v21 = vand.u32 2147483648, %v2160_v25  ;;  %vm2166_vm8 = vweird.f32 %v2160_v25  ;;  %v2170_v33 = vand.u32 2147483647, %v2160_v25 }
0x13a8   :  { %v2173_v26 = vor.u32 1.1754944e-38, %v2172_v21  ;;  %vm2171_vm10 = vcmp.eq.f32.partialorder %v2170_v33, 8.507059e+37 }
0x13ed   :  { %v2092_v24 = vpop.f32.mrf.mxu3 }
0x13ee   :  { %v2093_v27 = vadd.f32 %v3449_v15, %v2092_v24 }
0x13f0   :  { %2811 = vtanh.f32 %v2093_v27  ;;  %v2535_v38 = vmul.f32 -1.442695, %v2093_v27 }
0x13f1   :  { %2813 = vrcp.f32 %v2160_v25 }
0x13f2   :  { %2815 = vpow2.f32 %v2535_v38 }
0x13f5   :  { %v2094_v17 = vpop.f32.mrf.mxu3 }
0x13f6   :  { %v2812_v23 = vpop.eup %2811 }
0x13f7   :  { %2118 = vrot.lane.b32.xlu2 %v2812_v23, %s2834_s10  ;;  %v2814_v28 = vpop.eup %2813 }
0x13f8   :  { %v2162_v54 = vmul.f32 %v2814_v28, %v2160_v25  ;;  %vm2167_vm7 = vweird.f32 %v2814_v28  ;;  %v2816_v60 = vpop.eup %2815 }
0x13f9   :  { %vm2168_vm9 = vmor %vm2166_vm8, %vm2167_vm7  ;;  %v2099_v39 = vadd.f32 1.0, %v2816_v60 }
0x13fa   :  { %v2163_v4 = vsub.f32 1.0, %v2162_v54 }
0x13fb   :  { %2817 = vrcp.f32 %v2099_v39  ;;  %v2111_v40 = vand.u32 2147483648, %v2099_v39  ;;  %vm2105_vm12 = vweird.f32 %v2099_v39  ;;  %v2109_v41 = vand.u32 2147483647, %v2099_v39 }
0x13fc   :  { %v2164_v31 = vmul.f32 %v2814_v28, %v2163_v4  ;;  %v2577_v4 = vld [vmem:[%s3502_s14 + $0x8] sm:$0xff] }
0x13fd   :  { %v2112_v29 = vor.u32 1.1754944e-38, %v2111_v40  ;;  %vm2110_vm14 = vcmp.eq.f32.partialorder %v2109_v41, 8.507059e+37  ;;  %2290 = vmatpush.bf16.msrb.mxu2 %v2577_v4 }
0x13fe   :  { %v2165_v20 = vadd.f32 %v2814_v28, %v2164_v31  ;;  %v2576_v31 = vld [vmem:[%s3502_s14] sm:$0xff] }
0x1400   :  { %v2169_v22 = vsel %vm2168_vm9, %v2814_v28, %v2165_v20 }
0x1401   :  { %v2174_v35 = vsel %vm2171_vm10, %v2173_v26, %v2169_v22  ;;  %v2818_v61 = vpop.eup %2817  ;;  %2291 = vmatpush.bf16.msrb.mxu2 %v2576_v31  ;;  %v2578_v22 = vld [vmem:[%s3504_s16] sm:$0xff] }
0x1402   :  { %v2101_v6 = vmul.f32 %v2818_v61, %v2099_v39  ;;  %vm2106_vm11 = vweird.f32 %v2818_v61  ;;  %v2177_v46 = vmul.f32 %v2174_v35, %v3429_v53  ;;  %2321 = vmatpush.bf16.msra.mxu3 %v2578_v22 }
0x1403   :  { %vm2107_vm13 = vmor %vm2105_vm12, %vm2106_vm11 }
0x1404   :  { %v2102_v7 = vsub.f32 1.0, %v2101_v6 }
0x1406   :  { %v2103_v36 = vmul.f32 %v2818_v61, %v2102_v7 }
0x1408   :  { %v2104_v62 = vadd.f32 %v2818_v61, %v2103_v36 }
0x140a   :  { %v2108_v42 = vsel %vm2107_vm13, %v2818_v61, %v2104_v62  ;;  %v2702_v61 = vld [vmem:[%s3505_s17] ss:$0 sm:$0xff] }
0x140b   :  { %v2113_v44 = vsel %vm2110_vm14, %v2112_v29, %v2108_v42 }
0x140c   :  { %v2116_v49 = vmul.f32 %v2113_v44, %v3434_v55 }
0x1414   :  { %v2180_v37 = vpop.permute.xlu0 %2179 }
0x1415   :  { %v2182_v32 = vmul.f32 %v2180_v37, %v2174_v35 }
0x1417   :  { %2184 = vrot.lane.b32.xlu2 %v2182_v32, %s2834_s10 }
0x1451   :  { %v2119_v43 = vpop.permute.xlu2 %2118 }
0x1452   :  { %v2121_v45 = vmul.f32 %v2119_v43, %v2113_v44 }
0x1454   :  { %2123 = vrot.lane.b32.xlu1 %v2121_v45, %s2834_s10 }
0x1471   :  { %v2185_v30 = vpop.permute.xlu2 %2184 }
0x1472   :  { %v2187_v47 = vadd.f32 %v2185_v30, %v2177_v46 }
0x1474   :  { %2819 = vtanh.f32 %v2187_v47 }
0x147a   :  { %v2820_v48 = vpop.eup %2819 }
0x147b   :  { %2190 = vrot.lane.b32.xlu1 %v2820_v48, %s2834_s10 }
0x14c6   :  { %v2124_v50 = vpop.permute.xlu1 %2123 }
0x14c7   :  { %v2126_v51 = vadd.f32 %v2124_v50, %v2116_v49 }
0x14c9   :  { %2821 = vtanh.f32 %v2126_v51 }
0x14cf   :  { %v2822_v52 = vpop.eup %2821 }
0x14d0   :  { %2129 = vrot.lane.b32.xlu0 %v2822_v52, %s2834_s10 }
0x14ed   :  { %v2191_v0 = vpop.permute.xlu1 %2190 }
0x14ee   :  { %v2193_v1 = vmul.f32 %v2191_v0, %v2174_v35  ;;  %v2701_v35 = vld [vmem:[%s3503_s15] ss:$0 sm:$0xff] }
0x14f0   :  { %2195 = vrot.lane.b32.xlu2 %v2193_v1, %s2835_s23 }
0x1542   :  { %v2130_v34 = vpop.permute.xlu0 %2129 }
0x1543   :  { %v2132_v53 = vmul.f32 %v2130_v34, %v2113_v44 }
0x1545   :  { %2199 = vrot.lane.b32.xlu0 %v2132_v53, %s2836_s25 }
0x154a   :  { %v2196_v2 = vpop.permute.xlu2 %2195 }
0x15b7   :  { %v2200_v3 = vpop.permute.xlu0 %2199 }
0x15b8   :  { %v2202_v56 = vsel %vm942_vm5, %v2196_v2, %v2200_v3 }
0x15b9   :  { %v2203_v5 = vpack.c.bf16 %v2202_v56, %v2202_v56 }
0x15bb   :  { %2538 = vmatmul.msk.bf16.vlgmr.msrb.gmra.mxu1 %vm1164_vm6, %v2203_v5 }
0x1638   :  { %v2216_v55 = vpop.f32.mrf.mxu1 }
0x1639   :  { %v2217_v8 = vadd.f32 %v3449_v15, %v2216_v55 }
0x163b   :  { %2823 = vtanh.f32 %v2217_v8  ;;  %v2539_v57 = vmul.f32 -1.442695, %v2217_v8 }
0x163d   :  { %2825 = vpow2.f32 %v2539_v57 }
0x1640   :  { %v2218_v10 = vpop.f32.mrf.mxu1 }
0x1641   :  { %v2824_v9 = vpop.eup %2823 }
0x1642   :  { %2242 = vrot.lane.b32.xlu1 %v2824_v9, %s2834_s10 }
0x1643   :  { %v2826_v11 = vpop.eup %2825 }
0x1644   :  { %v2223_v12 = vadd.f32 1.0, %v2826_v11 }
0x1646   :  { %2827 = vrcp.f32 %v2223_v12  ;;  %v2235_v19 = vand.u32 2147483648, %v2223_v12  ;;  %vm2229_vm6 = vweird.f32 %v2223_v12  ;;  %v2233_v14 = vand.u32 2147483647, %v2223_v12 }
0x1648   :  { %v2236_v15 = vor.u32 1.1754944e-38, %v2235_v19  ;;  %vm2234_vm1 = vcmp.eq.f32.partialorder %v2233_v14, 8.507059e+37 }
0x164c   :  { %v2828_v13 = vpop.eup %2827 }
0x164d   :  { %v2225_v18 = vmul.f32 %v2828_v13, %v2223_v12  ;;  %vm2230_vm15 = vweird.f32 %v2828_v13 }
0x164e   :  { %vm2231_vm0 = vmor %vm2229_vm6, %vm2230_vm15 }
0x164f   :  { %v2226_v63 = vsub.f32 1.0, %v2225_v18 }
0x1651   :  { %v2227_v58 = vmul.f32 %v2828_v13, %v2226_v63 }
0x1653   :  { %v2228_v16 = vadd.f32 %v2828_v13, %v2227_v58 }
0x1655   :  { %v2232_v24 = vsel %vm2231_vm0, %v2828_v13, %v2228_v16 }
0x1656   :  { %v2237_v59 = vsel %vm2234_vm1, %v2236_v15, %v2232_v24 }
0x1657   :  { %v2240_v17 = vmul.f32 %v2237_v59, %v2126_v51 }
0x16b4   :  { %v2243_v27 = vpop.permute.xlu1 %2242 }
0x16b5   :  { %v2245_v25 = vmul.f32 %v2243_v27, %v2237_v59 }
0x16b7   :  { %2247 = vrot.lane.b32.xlu2 %v2245_v25, %s2834_s10 }
0x1711   :  { %v2248_v23 = vpop.permute.xlu2 %2247 }
0x1712   :  { %v2250_v28 = vadd.f32 %v2248_v23, %v2240_v17 }
0x1714   :  { %2829 = vtanh.f32 %v2250_v28 }
0x171a   :  { %v2830_v54 = vpop.eup %2829 }
0x171b   :  { %2253 = vrot.lane.b32.xlu0 %v2830_v54, %s2834_s10 }
0x178d   :  { %v2254_v20 = vpop.permute.xlu0 %2253 }
0x178e   :  { %v2256_v21 = vmul.f32 %v2254_v20, %v2237_v59 }
0x1790   :  { %v2257_v33 = vpack.c.bf16 %v2256_v21, %v2256_v21 }
0x1792   :  { %2267 = vrot.lane.b32.xlu1 %v2257_v33, %s2835_s23 }
0x1804   :  { %v2268_v26 = vpop.permute.xlu1 %2267 }
0x1805   :  { %2548 = vmatmul.msk.bf16.vlgmr.msrb.gmra.mxu2 %vm942_vm5, %v2268_v26 }
0x1888   :  { %v2293_v37 = vpop.f32.mrf.mxu2 }
0x1889   :  { %v2294_v32 = vadd.f32 %v2701_v35, %v2293_v37 }
0x188b   :  { %v2297_v38 = vmax.f32 %v2294_v32, 0.0 }
0x188d   :  { %v2298_v60 = vpack.c.bf16 %v2297_v38, %v2297_v38 }
0x188f   :  { %2553 = vmatmul.msk.bf16.vlgmr.msra.gmra.mxu3 %vm698_vm4, %v2298_v60 }
0x1890   :  { %v2295_v39 = vpop.f32.mrf.mxu2 }
0x1912   :  { %v2323_v6 = vpop.f32.mrf.mxu3 }
0x1913   :  { %v2324_v7 = vadd.f32 %v2702_v61, %v2323_v6 }
0x1915   :  { %2328 = vst.msk [vmem:[%s3506_s18] sm:$0xff] %vm2327_vm2, %v2324_v7 }
0x191a   :  { %v2325_v36 = vpop.f32.mrf.mxu3 }

</bundles_post_ra>
